<compile_context>
chip_gen: v5e
topology: v5e:2x2
jax: 0.10.0
libtpu: 0.0.40
codegen_flags: <defaults>
</compile_context>

<pallas_src>
import functools

import numpy as np
import jax
import jax.numpy as jnp
from jax.experimental import pallas as pl
from jax.experimental.pallas import tpu as pltpu

NEG_SLOPE = 0.2  # GATv2Conv default negative_slope


# --------------------------------------------------------------------------- #
# Fused encoder kernel (all layers, one launch)
# --------------------------------------------------------------------------- #

def _encoder_kernel(*refs, layer_dims, heads, hidden):
    hc = heads * hidden
    n_layers = len(layer_dims)

    it = iter(refs)
    x_ref = next(it)
    repc_ref = next(it)      # [H, H*C]   repc[h, h*C+c] = 1   (per-head expand)
    sumh_ref = next(it)      # [H*C, C]   sumh[h*C+c, c] = 1   (sum over heads)
    per_layer = [tuple(next(it) for _ in range(9)) for _ in range(n_layers)]
    out_ref = next(it)

    repc = repc_ref[...]
    sumh = sumh_ref[...]
    x = x_ref[...]

    for li, d in enumerate(layer_dims):
        (w_lin_ref, b_lin_ref, att_ref, w_skip_ref, b_skip_ref,
         b_conv_ref, bias_ref, blkmask_ref, seg_ref) = per_layer[li]
        n_src, n_dst = d["n_src"], d["n_dst"]
        concat, apply_elu = d["concat"], d["elu"]

        # Two separate MXU passes: lin_l (== lin_r, share_weights) and skip Linear.
        xl = jnp.dot(x, w_lin_ref[...],
                     preferred_element_type=jnp.float32) + b_lin_ref[...]      # [n_src, H*C]
        x_dst = x[:n_dst]
        skip = jnp.dot(x_dst, w_skip_ref[...],
                       preferred_element_type=jnp.float32) + b_skip_ref[...]   # [n_dst, out]

        xr = xl[:n_dst]                  # lin_r(x_dst)
        xl_t = xl.T                      # [H*C, n_src]: source nodes on lanes

        # Raw GATv2 scores per head:
        #   e_h[i, j] = sum_c a_hc * leaky_relu(xr[i, hc] + xl[j, hc])
        # Two partial accumulators break the serial add chain over channels.
        head_e = []
        for h in range(heads):
            acc0 = jnp.zeros((n_dst, n_src), jnp.float32)
            acc1 = jnp.zeros((n_dst, n_src), jnp.float32)
            for c in range(hidden):
                k = h * hidden + c
                s = xr[:, k:k + 1] + xl_t[k:k + 1, :]             # [n_dst, n_src]
                s = jnp.where(s >= 0.0, s, NEG_SLOPE * s)          # leaky_relu(0.2)
                term = att_ref[k] * s                              # scalar (SMEM) splat-mul
                if c % 2 == 0:
                    acc0 = acc0 + term
                else:
                    acc1 = acc1 + term
            head_e.append(acc0 + acc1)

        # Heads stacked on lanes: single bias add / softmax / aggregation pass.
        e = jnp.concatenate(head_e, axis=1) + bias_ref[...]        # [n_dst, H*n_src]

        # Shared per-row max over all heads is a valid softmax shift (softmax is
        # shift-invariant per head); masked entries carry -1e30 so exp == 0.
        m = jnp.max(e, axis=-1, keepdims=True)
        p = jnp.exp(e - m)
        # Per-(dst, head) denominators via one segmented-sum matmul.
        denom = jnp.dot(p, seg_ref[...],
                        preferred_element_type=jnp.float32)        # [n_dst, H]

        # Single block-diagonal aggregation matmul -> concatenated head outputs.
        rhs = blkmask_ref[...] * jnp.concatenate([xl] * heads, axis=0)  # [H*n_src, H*C]
        agg = jnp.dot(p, rhs, preferred_element_type=jnp.float32)       # [n_dst, H*C]
        inv = pl.reciprocal(
            jnp.dot(denom, repc, preferred_element_type=jnp.float32),   # [n_dst, H*C]
            approx=True)
        agg = agg * inv                                                  # normalized

        if concat:
            conv = agg                                                   # [n_dst, H*C]
        else:
            conv = jnp.dot(agg, sumh,
                           preferred_element_type=jnp.float32) * (1.0 / heads)  # mean heads

        out = conv + b_conv_ref[...] + skip
        if apply_elu:
            out = jnp.where(out > 0.0, out, jnp.exp(out) - 1.0)          # ELU
        # TODO(synk): F.dropout(p=0.5, training=...) implemented as inference-mode identity.
        x = out

    out_ref[...] = x


# --------------------------------------------------------------------------- #
# Wrapper: builds constants (hoisted from kernel) and calls the fused kernel.
# --------------------------------------------------------------------------- #

def _full_spec(shape):
    nd = len(shape)
    return pl.BlockSpec(shape, lambda i, _nd=nd: (0,) * _nd)


def encoder_forward(x, masks, params, *, heads, hidden):
    """EncoderI forward. Returns (x_out, 1); attention weights are not returned."""
    num_layers = len(params)
    hc = heads * hidden

    # Layer-independent indicator constants (trace-time numpy -> kernel constants).
    repc = np.zeros((heads, hc), np.float32)
    sumh = np.zeros((hc, hidden), np.float32)
    for h in range(heads):
        repc[h, h * hidden:(h + 1) * hidden] = 1.0
        sumh[h * hidden:(h + 1) * hidden, :] = np.eye(hidden, dtype=np.float32)

    inputs = [x, jnp.asarray(repc), jnp.asarray(sumh)]
    in_specs = [_full_spec(x.shape), _full_spec(repc.shape), _full_spec(sumh.shape)]
    layer_dims = []

    n_src_expected = x.shape[0]
    for i in range(num_layers):
        p, mask = params[i], masks[i]
        n_dst, n_src = mask.shape
        assert n_src == n_src_expected, "layer input size mismatch"
        last = i == num_layers - 1

        # Hoisted: additive softmax mask bias, tiled to the head-stacked layout.
        bias = jnp.where(mask > 0.0, 0.0, -1e30).astype(jnp.float32)
        bias_cat = jnp.tile(bias, (1, heads))                       # [n_dst, H*n_src]

        blkmask = np.zeros((heads * n_src, hc), np.float32)         # block-diag selector
        seg = np.zeros((heads * n_src, heads), np.float32)          # per-head segment sum
        for h in range(heads):
            blkmask[h * n_src:(h + 1) * n_src, h * hidden:(h + 1) * hidden] = 1.0
            seg[h * n_src:(h + 1) * n_src, h] = 1.0

        inputs += [p["w_lin"], p["b_lin"], p["att"], p["w_skip"], p["b_skip"],
                   p["b_conv"], bias_cat, jnp.asarray(blkmask), jnp.asarray(seg)]
        in_specs += [_full_spec(p["w_lin"].shape), _full_spec(p["b_lin"].shape),
                     pl.BlockSpec(memory_space=pltpu.MemorySpace.SMEM),   # att scalars
                     _full_spec(p["w_skip"].shape), _full_spec(p["b_skip"].shape),
                     _full_spec(p["b_conv"].shape),
                     _full_spec((n_dst, heads * n_src)),
                     _full_spec((heads * n_src, hc)),
                     _full_spec((heads * n_src, heads))]
        layer_dims.append(dict(n_src=n_src, n_dst=n_dst, concat=not last, elu=not last))
        n_src_expected = n_dst

    n_dst_last = masks[-1].shape[0]
    out_dim_last = hidden                         # last layer: concat=False

    kernel = functools.partial(_encoder_kernel, layer_dims=tuple(layer_dims),
                               heads=heads, hidden=hidden)

    out = pl.pallas_call(
        kernel,
        out_shape=jax.ShapeDtypeStruct((n_dst_last, out_dim_last), jnp.float32),
        grid=(1,),
        in_specs=in_specs,
        out_specs=_full_spec((n_dst_last, out_dim_last)),
    )(*inputs)
    return out, 1


# ------------------------------ init helpers ------------------------------- #

def glorot(key, shape):
    fan_in, fan_out = shape[0], shape[-1]
    lim = jnp.sqrt(6.0 / (fan_in + fan_out))
    return jax.random.uniform(key, shape, minval=-lim, maxval=lim, dtype=jnp.float32)


def init_params(key, in_channels, hidden, heads, num_layers):
    params = []
    hc = heads * hidden
    dims_in = [in_channels] + [hc] * (num_layers - 1)
    for i in range(num_layers):
        key, k1, k2, k3, k4 = jax.random.split(key, 5)
        last = i == num_layers - 1
        d_in = dims_in[i]
        out_dim = hidden if last else hc            # skip out == layer out dim
        params.append(dict(
            w_lin=glorot(k1, (d_in, hc)),                      # lin_l (== lin_r, share_weights)
            b_lin=jnp.zeros((1, hc), jnp.float32),
            att=glorot(k2, (heads, hidden)).reshape(-1),       # flat [H*C] -> SMEM scalars
            w_skip=glorot(k3, (d_in, out_dim)),
            b_skip=0.01 * jax.random.normal(k4, (1, out_dim), dtype=jnp.float32),
            b_conv=jnp.zeros((1, out_dim), jnp.float32),
        ))
    return params


def make_mask(key, n_dst, n_src, p_edge=0.3):
    m = (jax.random.uniform(key, (n_dst, n_src)) < p_edge).astype(jnp.float32)
    # GATv2Conv(add_self_loops=True): self-loop for every target node.
    diag = jnp.eye(n_dst, n_src, dtype=jnp.float32)
    return jnp.where(diag > 0, 1.0, m)


# ---------------------------------- main ----------------------------------- #

if __name__ == "__main__":
    in_channels, hidden, heads, num_layers = 16, 8, 4, 2
    # NeighborSampler-style sizes per layer: (num_src_nodes, num_dst_nodes)
    sizes = [(24, 16), (16, 8)]

    key = jax.random.PRNGKey(0)
    key, kx, km0, km1, kp = jax.random.split(key, 5)

    x = jax.random.normal(kx, (sizes[0][0], in_channels), dtype=jnp.float32)
    masks = [
        make_mask(km0, sizes[0][1], sizes[0][0]),
        make_mask(km1, sizes[1][1], sizes[1][0]),
    ]
    params = init_params(kp, in_channels, hidden, heads, num_layers)

    fwd = jax.jit(functools.partial(encoder_forward, heads=heads, hidden=hidden))
    out, flag = fwd(x, masks, params)
    jax.block_until_ready(out)
    assert out.shape == (sizes[-1][1], hidden)
    print("KERNEL_OK")
</pallas_src>

<mosaic_0001>
module attributes {stable_mosaic.version = 11 : i64} {
  func.func @_encoder_kernel(%arg0: i32, %arg1: memref<24x16xf32, #tpu.memory_space<vmem>>, %arg2: memref<4x32xf32, #tpu.memory_space<vmem>>, %arg3: memref<32x8xf32, #tpu.memory_space<vmem>>, %arg4: memref<16x32xf32, #tpu.memory_space<vmem>>, %arg5: memref<1x32xf32, #tpu.memory_space<vmem>>, %arg6: memref<32xf32, #tpu.memory_space<smem>>, %arg7: memref<16x32xf32, #tpu.memory_space<vmem>>, %arg8: memref<1x32xf32, #tpu.memory_space<vmem>>, %arg9: memref<1x32xf32, #tpu.memory_space<vmem>>, %arg10: memref<16x96xf32, #tpu.memory_space<vmem>>, %arg11: memref<96x32xf32, #tpu.memory_space<vmem>>, %arg12: memref<96x4xf32, #tpu.memory_space<vmem>>, %arg13: memref<32x32xf32, #tpu.memory_space<vmem>>, %arg14: memref<1x32xf32, #tpu.memory_space<vmem>>, %arg15: memref<32xf32, #tpu.memory_space<smem>>, %arg16: memref<32x8xf32, #tpu.memory_space<vmem>>, %arg17: memref<1x8xf32, #tpu.memory_space<vmem>>, %arg18: memref<1x8xf32, #tpu.memory_space<vmem>>, %arg19: memref<8x64xf32, #tpu.memory_space<vmem>>, %arg20: memref<64x32xf32, #tpu.memory_space<vmem>>, %arg21: memref<64x4xf32, #tpu.memory_space<vmem>>, %arg22: memref<8x8xf32, #tpu.memory_space<vmem>>) attributes {dimension_semantics = [#tpu.dimension_semantics<arbitrary>], iteration_bounds = array<i64: 1>, scalar_prefetch = 0 : i64, scratch_operands = 0 : i64, tpu.core_type = #tpu.core_type<tc>, window_params = [{pipeline_mode = #tpu.pipeline_mode<synchronous>, transform_indices = @transform_0, window_bounds = array<i64: 24, 16>}, {pipeline_mode = #tpu.pipeline_mode<synchronous>, transform_indices = @transform_1, window_bounds = array<i64: 4, 32>}, {pipeline_mode = #tpu.pipeline_mode<synchronous>, transform_indices = @transform_2, window_bounds = array<i64: 32, 8>}, {pipeline_mode = #tpu.pipeline_mode<synchronous>, transform_indices = @transform_3, window_bounds = array<i64: 16, 32>}, {pipeline_mode = #tpu.pipeline_mode<synchronous>, transform_indices = @transform_4, window_bounds = array<i64: 1, 32>}, {transform_indices = @transform_5, window_bounds = array<i64: 32>}, {pipeline_mode = #tpu.pipeline_mode<synchronous>, transform_indices = @transform_6, window_bounds = array<i64: 16, 32>}, {pipeline_mode = #tpu.pipeline_mode<synchronous>, transform_indices = @transform_7, window_bounds = array<i64: 1, 32>}, {pipeline_mode = #tpu.pipeline_mode<synchronous>, transform_indices = @transform_8, window_bounds = array<i64: 1, 32>}, {pipeline_mode = #tpu.pipeline_mode<synchronous>, transform_indices = @transform_9, window_bounds = array<i64: 16, 96>}, {pipeline_mode = #tpu.pipeline_mode<synchronous>, transform_indices = @transform_10, window_bounds = array<i64: 96, 32>}, {pipeline_mode = #tpu.pipeline_mode<synchronous>, transform_indices = @transform_11, window_bounds = array<i64: 96, 4>}, {pipeline_mode = #tpu.pipeline_mode<synchronous>, transform_indices = @transform_12, window_bounds = array<i64: 32, 32>}, {pipeline_mode = #tpu.pipeline_mode<synchronous>, transform_indices = @transform_13, window_bounds = array<i64: 1, 32>}, {transform_indices = @transform_14, window_bounds = array<i64: 32>}, {pipeline_mode = #tpu.pipeline_mode<synchronous>, transform_indices = @transform_15, window_bounds = array<i64: 32, 8>}, {pipeline_mode = #tpu.pipeline_mode<synchronous>, transform_indices = @transform_16, window_bounds = array<i64: 1, 8>}, {pipeline_mode = #tpu.pipeline_mode<synchronous>, transform_indices = @transform_17, window_bounds = array<i64: 1, 8>}, {pipeline_mode = #tpu.pipeline_mode<synchronous>, transform_indices = @transform_18, window_bounds = array<i64: 8, 64>}, {pipeline_mode = #tpu.pipeline_mode<synchronous>, transform_indices = @transform_19, window_bounds = array<i64: 64, 32>}, {pipeline_mode = #tpu.pipeline_mode<synchronous>, transform_indices = @transform_20, window_bounds = array<i64: 64, 4>}, {pipeline_mode = #tpu.pipeline_mode<synchronous>, transform_indices = @transform_21, window_bounds = array<i64: 8, 8>}]} {
    %c0 = arith.constant 0 : index
    %c0_0 = arith.constant 0 : index
    %0 = vector.load %arg2[%c0, %c0_0] : memref<4x32xf32, #tpu.memory_space<vmem>>, vector<4x32xf32>
    %c0_1 = arith.constant 0 : index
    %c0_2 = arith.constant 0 : index
    %1 = vector.load %arg3[%c0_1, %c0_2] : memref<32x8xf32, #tpu.memory_space<vmem>>, vector<32x8xf32>
    %c0_3 = arith.constant 0 : index
    %c0_4 = arith.constant 0 : index
    %2 = vector.load %arg1[%c0_3, %c0_4] : memref<24x16xf32, #tpu.memory_space<vmem>>, vector<24x16xf32>
    %c0_5 = arith.constant 0 : index
    %c0_6 = arith.constant 0 : index
    %3 = vector.load %arg4[%c0_5, %c0_6] : memref<16x32xf32, #tpu.memory_space<vmem>>, vector<16x32xf32>
    %cst = arith.constant dense<0.000000e+00> : vector<24x32xf32>
    %4 = tpu.matmul %2, %3, %cst {dimension_numbers = #tpu.dot_dimension_numbers<[1], [0], [0], [1], [0, 0, 1, 1], [], []>} : vector<24x16xf32>, vector<16x32xf32>, vector<24x32xf32> -> vector<24x32xf32>
    %c0_7 = arith.constant 0 : index
    %c0_8 = arith.constant 0 : index
    %5 = vector.load %arg5[%c0_7, %c0_8] : memref<1x32xf32, #tpu.memory_space<vmem>>, vector<1x32xf32>
    %6 = vector.broadcast %5 : vector<1x32xf32> to vector<24x32xf32>
    %7 = arith.addf %4, %6 : vector<24x32xf32>
    %8 = vector.extract_strided_slice %2 {offsets = [0, 0], sizes = [16, 16], strides = [1, 1]} : vector<24x16xf32> to vector<16x16xf32>
    %c0_9 = arith.constant 0 : index
    %c0_10 = arith.constant 0 : index
    %9 = vector.load %arg7[%c0_9, %c0_10] : memref<16x32xf32, #tpu.memory_space<vmem>>, vector<16x32xf32>
    %cst_11 = arith.constant dense<0.000000e+00> : vector<16x32xf32>
    %10 = tpu.matmul %8, %9, %cst_11 {dimension_numbers = #tpu.dot_dimension_numbers<[1], [0], [0], [1], [0, 0, 1, 1], [], []>} : vector<16x16xf32>, vector<16x32xf32>, vector<16x32xf32> -> vector<16x32xf32>
    %c0_12 = arith.constant 0 : index
    %c0_13 = arith.constant 0 : index
    %11 = vector.load %arg8[%c0_12, %c0_13] : memref<1x32xf32, #tpu.memory_space<vmem>>, vector<1x32xf32>
    %12 = vector.broadcast %11 : vector<1x32xf32> to vector<16x32xf32>
    %13 = arith.addf %10, %12 : vector<16x32xf32>
    %14 = vector.extract_strided_slice %7 {offsets = [0, 0], sizes = [16, 32], strides = [1, 1]} : vector<24x32xf32> to vector<16x32xf32>
    %15 = tpu.transpose %7, [1, 0] : vector<24x32xf32> -> vector<32x24xf32>
    %cst_14 = arith.constant 0.000000e+00 : f32
    %16 = vector.broadcast %cst_14 : f32 to vector<16x24xf32>
    %cst_15 = arith.constant 0.000000e+00 : f32
    %17 = vector.broadcast %cst_15 : f32 to vector<16x24xf32>
    %18 = vector.extract_strided_slice %14 {offsets = [0, 0], sizes = [16, 1], strides = [1, 1]} : vector<16x32xf32> to vector<16x1xf32>
    %19 = vector.extract_strided_slice %15 {offsets = [0, 0], sizes = [1, 24], strides = [1, 1]} : vector<32x24xf32> to vector<1x24xf32>
    %20 = vector.broadcast %18 : vector<16x1xf32> to vector<16x24xf32>
    %21 = vector.broadcast %19 : vector<1x24xf32> to vector<16x24xf32>
    %22 = arith.addf %20, %21 : vector<16x24xf32>
    %cst_16 = arith.constant 0.000000e+00 : f32
    %23 = vector.broadcast %cst_16 : f32 to vector<16x24xf32>
    %24 = arith.cmpf oge, %22, %23 : vector<16x24xf32>
    %cst_17 = arith.constant 2.000000e-01 : f32
    %25 = vector.broadcast %cst_17 : f32 to vector<16x24xf32>
    %26 = arith.mulf %25, %22 : vector<16x24xf32>
    %27 = arith.select %24, %22, %26 : vector<16x24xi1>, vector<16x24xf32>
    %c0_18 = arith.constant 0 : index
    %28 = memref.load %arg6[%c0_18] : memref<32xf32, #tpu.memory_space<smem>>
    %29 = vector.broadcast %28 : f32 to vector<16x24xf32>
    %30 = arith.mulf %29, %27 : vector<16x24xf32>
    %31 = arith.addf %16, %30 : vector<16x24xf32>
    %32 = vector.extract_strided_slice %14 {offsets = [0, 1], sizes = [16, 1], strides = [1, 1]} : vector<16x32xf32> to vector<16x1xf32>
    %33 = vector.extract_strided_slice %15 {offsets = [1, 0], sizes = [1, 24], strides = [1, 1]} : vector<32x24xf32> to vector<1x24xf32>
    %34 = vector.broadcast %32 : vector<16x1xf32> to vector<16x24xf32>
    %35 = vector.broadcast %33 : vector<1x24xf32> to vector<16x24xf32>
    %36 = arith.addf %34, %35 : vector<16x24xf32>
    %cst_19 = arith.constant 0.000000e+00 : f32
    %37 = vector.broadcast %cst_19 : f32 to vector<16x24xf32>
    %38 = arith.cmpf oge, %36, %37 : vector<16x24xf32>
    %cst_20 = arith.constant 2.000000e-01 : f32
    %39 = vector.broadcast %cst_20 : f32 to vector<16x24xf32>
    %40 = arith.mulf %39, %36 : vector<16x24xf32>
    %41 = arith.select %38, %36, %40 : vector<16x24xi1>, vector<16x24xf32>
    %c1 = arith.constant 1 : index
    %42 = memref.load %arg6[%c1] : memref<32xf32, #tpu.memory_space<smem>>
    %43 = vector.broadcast %42 : f32 to vector<16x24xf32>
    %44 = arith.mulf %43, %41 : vector<16x24xf32>
    %45 = arith.addf %17, %44 : vector<16x24xf32>
    %46 = vector.extract_strided_slice %14 {offsets = [0, 2], sizes = [16, 1], strides = [1, 1]} : vector<16x32xf32> to vector<16x1xf32>
    %47 = vector.extract_strided_slice %15 {offsets = [2, 0], sizes = [1, 24], strides = [1, 1]} : vector<32x24xf32> to vector<1x24xf32>
    %48 = vector.broadcast %46 : vector<16x1xf32> to vector<16x24xf32>
    %49 = vector.broadcast %47 : vector<1x24xf32> to vector<16x24xf32>
    %50 = arith.addf %48, %49 : vector<16x24xf32>
    %cst_21 = arith.constant 0.000000e+00 : f32
    %51 = vector.broadcast %cst_21 : f32 to vector<16x24xf32>
    %52 = arith.cmpf oge, %50, %51 : vector<16x24xf32>
    %cst_22 = arith.constant 2.000000e-01 : f32
    %53 = vector.broadcast %cst_22 : f32 to vector<16x24xf32>
    %54 = arith.mulf %53, %50 : vector<16x24xf32>
    %55 = arith.select %52, %50, %54 : vector<16x24xi1>, vector<16x24xf32>
    %c2 = arith.constant 2 : index
    %56 = memref.load %arg6[%c2] : memref<32xf32, #tpu.memory_space<smem>>
    %57 = vector.broadcast %56 : f32 to vector<16x24xf32>
    %58 = arith.mulf %57, %55 : vector<16x24xf32>
    %59 = arith.addf %31, %58 : vector<16x24xf32>
    %60 = vector.extract_strided_slice %14 {offsets = [0, 3], sizes = [16, 1], strides = [1, 1]} : vector<16x32xf32> to vector<16x1xf32>
    %61 = vector.extract_strided_slice %15 {offsets = [3, 0], sizes = [1, 24], strides = [1, 1]} : vector<32x24xf32> to vector<1x24xf32>
    %62 = vector.broadcast %60 : vector<16x1xf32> to vector<16x24xf32>
    %63 = vector.broadcast %61 : vector<1x24xf32> to vector<16x24xf32>
    %64 = arith.addf %62, %63 : vector<16x24xf32>
    %cst_23 = arith.constant 0.000000e+00 : f32
    %65 = vector.broadcast %cst_23 : f32 to vector<16x24xf32>
    %66 = arith.cmpf oge, %64, %65 : vector<16x24xf32>
    %cst_24 = arith.constant 2.000000e-01 : f32
    %67 = vector.broadcast %cst_24 : f32 to vector<16x24xf32>
    %68 = arith.mulf %67, %64 : vector<16x24xf32>
    %69 = arith.select %66, %64, %68 : vector<16x24xi1>, vector<16x24xf32>
    %c3 = arith.constant 3 : index
    %70 = memref.load %arg6[%c3] : memref<32xf32, #tpu.memory_space<smem>>
    %71 = vector.broadcast %70 : f32 to vector<16x24xf32>
    %72 = arith.mulf %71, %69 : vector<16x24xf32>
    %73 = arith.addf %45, %72 : vector<16x24xf32>
    %74 = vector.extract_strided_slice %14 {offsets = [0, 4], sizes = [16, 1], strides = [1, 1]} : vector<16x32xf32> to vector<16x1xf32>
    %75 = vector.extract_strided_slice %15 {offsets = [4, 0], sizes = [1, 24], strides = [1, 1]} : vector<32x24xf32> to vector<1x24xf32>
    %76 = vector.broadcast %74 : vector<16x1xf32> to vector<16x24xf32>
    %77 = vector.broadcast %75 : vector<1x24xf32> to vector<16x24xf32>
    %78 = arith.addf %76, %77 : vector<16x24xf32>
    %cst_25 = arith.constant 0.000000e+00 : f32
    %79 = vector.broadcast %cst_25 : f32 to vector<16x24xf32>
    %80 = arith.cmpf oge, %78, %79 : vector<16x24xf32>
    %cst_26 = arith.constant 2.000000e-01 : f32
    %81 = vector.broadcast %cst_26 : f32 to vector<16x24xf32>
    %82 = arith.mulf %81, %78 : vector<16x24xf32>
    %83 = arith.select %80, %78, %82 : vector<16x24xi1>, vector<16x24xf32>
    %c4 = arith.constant 4 : index
    %84 = memref.load %arg6[%c4] : memref<32xf32, #tpu.memory_space<smem>>
    %85 = vector.broadcast %84 : f32 to vector<16x24xf32>
    %86 = arith.mulf %85, %83 : vector<16x24xf32>
    %87 = arith.addf %59, %86 : vector<16x24xf32>
    %88 = vector.extract_strided_slice %14 {offsets = [0, 5], sizes = [16, 1], strides = [1, 1]} : vector<16x32xf32> to vector<16x1xf32>
    %89 = vector.extract_strided_slice %15 {offsets = [5, 0], sizes = [1, 24], strides = [1, 1]} : vector<32x24xf32> to vector<1x24xf32>
    %90 = vector.broadcast %88 : vector<16x1xf32> to vector<16x24xf32>
    %91 = vector.broadcast %89 : vector<1x24xf32> to vector<16x24xf32>
    %92 = arith.addf %90, %91 : vector<16x24xf32>
    %cst_27 = arith.constant 0.000000e+00 : f32
    %93 = vector.broadcast %cst_27 : f32 to vector<16x24xf32>
    %94 = arith.cmpf oge, %92, %93 : vector<16x24xf32>
    %cst_28 = arith.constant 2.000000e-01 : f32
    %95 = vector.broadcast %cst_28 : f32 to vector<16x24xf32>
    %96 = arith.mulf %95, %92 : vector<16x24xf32>
    %97 = arith.select %94, %92, %96 : vector<16x24xi1>, vector<16x24xf32>
    %c5 = arith.constant 5 : index
    %98 = memref.load %arg6[%c5] : memref<32xf32, #tpu.memory_space<smem>>
    %99 = vector.broadcast %98 : f32 to vector<16x24xf32>
    %100 = arith.mulf %99, %97 : vector<16x24xf32>
    %101 = arith.addf %73, %100 : vector<16x24xf32>
    %102 = vector.extract_strided_slice %14 {offsets = [0, 6], sizes = [16, 1], strides = [1, 1]} : vector<16x32xf32> to vector<16x1xf32>
    %103 = vector.extract_strided_slice %15 {offsets = [6, 0], sizes = [1, 24], strides = [1, 1]} : vector<32x24xf32> to vector<1x24xf32>
    %104 = vector.broadcast %102 : vector<16x1xf32> to vector<16x24xf32>
    %105 = vector.broadcast %103 : vector<1x24xf32> to vector<16x24xf32>
    %106 = arith.addf %104, %105 : vector<16x24xf32>
    %cst_29 = arith.constant 0.000000e+00 : f32
    %107 = vector.broadcast %cst_29 : f32 to vector<16x24xf32>
    %108 = arith.cmpf oge, %106, %107 : vector<16x24xf32>
    %cst_30 = arith.constant 2.000000e-01 : f32
    %109 = vector.broadcast %cst_30 : f32 to vector<16x24xf32>
    %110 = arith.mulf %109, %106 : vector<16x24xf32>
    %111 = arith.select %108, %106, %110 : vector<16x24xi1>, vector<16x24xf32>
    %c6 = arith.constant 6 : index
    %112 = memref.load %arg6[%c6] : memref<32xf32, #tpu.memory_space<smem>>
    %113 = vector.broadcast %112 : f32 to vector<16x24xf32>
    %114 = arith.mulf %113, %111 : vector<16x24xf32>
    %115 = arith.addf %87, %114 : vector<16x24xf32>
    %116 = vector.extract_strided_slice %14 {offsets = [0, 7], sizes = [16, 1], strides = [1, 1]} : vector<16x32xf32> to vector<16x1xf32>
    %117 = vector.extract_strided_slice %15 {offsets = [7, 0], sizes = [1, 24], strides = [1, 1]} : vector<32x24xf32> to vector<1x24xf32>
    %118 = vector.broadcast %116 : vector<16x1xf32> to vector<16x24xf32>
    %119 = vector.broadcast %117 : vector<1x24xf32> to vector<16x24xf32>
    %120 = arith.addf %118, %119 : vector<16x24xf32>
    %cst_31 = arith.constant 0.000000e+00 : f32
    %121 = vector.broadcast %cst_31 : f32 to vector<16x24xf32>
    %122 = arith.cmpf oge, %120, %121 : vector<16x24xf32>
    %cst_32 = arith.constant 2.000000e-01 : f32
    %123 = vector.broadcast %cst_32 : f32 to vector<16x24xf32>
    %124 = arith.mulf %123, %120 : vector<16x24xf32>
    %125 = arith.select %122, %120, %124 : vector<16x24xi1>, vector<16x24xf32>
    %c7 = arith.constant 7 : index
    %126 = memref.load %arg6[%c7] : memref<32xf32, #tpu.memory_space<smem>>
    %127 = vector.broadcast %126 : f32 to vector<16x24xf32>
    %128 = arith.mulf %127, %125 : vector<16x24xf32>
    %129 = arith.addf %101, %128 : vector<16x24xf32>
    %130 = arith.addf %115, %129 : vector<16x24xf32>
    %cst_33 = arith.constant 0.000000e+00 : f32
    %131 = vector.broadcast %cst_33 : f32 to vector<16x24xf32>
    %cst_34 = arith.constant 0.000000e+00 : f32
    %132 = vector.broadcast %cst_34 : f32 to vector<16x24xf32>
    %133 = vector.extract_strided_slice %14 {offsets = [0, 8], sizes = [16, 1], strides = [1, 1]} : vector<16x32xf32> to vector<16x1xf32>
    %134 = vector.extract_strided_slice %15 {offsets = [8, 0], sizes = [1, 24], strides = [1, 1]} : vector<32x24xf32> to vector<1x24xf32>
    %135 = vector.broadcast %133 : vector<16x1xf32> to vector<16x24xf32>
    %136 = vector.broadcast %134 : vector<1x24xf32> to vector<16x24xf32>
    %137 = arith.addf %135, %136 : vector<16x24xf32>
    %cst_35 = arith.constant 0.000000e+00 : f32
    %138 = vector.broadcast %cst_35 : f32 to vector<16x24xf32>
    %139 = arith.cmpf oge, %137, %138 : vector<16x24xf32>
    %cst_36 = arith.constant 2.000000e-01 : f32
    %140 = vector.broadcast %cst_36 : f32 to vector<16x24xf32>
    %141 = arith.mulf %140, %137 : vector<16x24xf32>
    %142 = arith.select %139, %137, %141 : vector<16x24xi1>, vector<16x24xf32>
    %c8 = arith.constant 8 : index
    %143 = memref.load %arg6[%c8] : memref<32xf32, #tpu.memory_space<smem>>
    %144 = vector.broadcast %143 : f32 to vector<16x24xf32>
    %145 = arith.mulf %144, %142 : vector<16x24xf32>
    %146 = arith.addf %131, %145 : vector<16x24xf32>
    %147 = vector.extract_strided_slice %14 {offsets = [0, 9], sizes = [16, 1], strides = [1, 1]} : vector<16x32xf32> to vector<16x1xf32>
    %148 = vector.extract_strided_slice %15 {offsets = [9, 0], sizes = [1, 24], strides = [1, 1]} : vector<32x24xf32> to vector<1x24xf32>
    %149 = vector.broadcast %147 : vector<16x1xf32> to vector<16x24xf32>
    %150 = vector.broadcast %148 : vector<1x24xf32> to vector<16x24xf32>
    %151 = arith.addf %149, %150 : vector<16x24xf32>
    %cst_37 = arith.constant 0.000000e+00 : f32
    %152 = vector.broadcast %cst_37 : f32 to vector<16x24xf32>
    %153 = arith.cmpf oge, %151, %152 : vector<16x24xf32>
    %cst_38 = arith.constant 2.000000e-01 : f32
    %154 = vector.broadcast %cst_38 : f32 to vector<16x24xf32>
    %155 = arith.mulf %154, %151 : vector<16x24xf32>
    %156 = arith.select %153, %151, %155 : vector<16x24xi1>, vector<16x24xf32>
    %c9 = arith.constant 9 : index
    %157 = memref.load %arg6[%c9] : memref<32xf32, #tpu.memory_space<smem>>
    %158 = vector.broadcast %157 : f32 to vector<16x24xf32>
    %159 = arith.mulf %158, %156 : vector<16x24xf32>
    %160 = arith.addf %132, %159 : vector<16x24xf32>
    %161 = vector.extract_strided_slice %14 {offsets = [0, 10], sizes = [16, 1], strides = [1, 1]} : vector<16x32xf32> to vector<16x1xf32>
    %162 = vector.extract_strided_slice %15 {offsets = [10, 0], sizes = [1, 24], strides = [1, 1]} : vector<32x24xf32> to vector<1x24xf32>
    %163 = vector.broadcast %161 : vector<16x1xf32> to vector<16x24xf32>
    %164 = vector.broadcast %162 : vector<1x24xf32> to vector<16x24xf32>
    %165 = arith.addf %163, %164 : vector<16x24xf32>
    %cst_39 = arith.constant 0.000000e+00 : f32
    %166 = vector.broadcast %cst_39 : f32 to vector<16x24xf32>
    %167 = arith.cmpf oge, %165, %166 : vector<16x24xf32>
    %cst_40 = arith.constant 2.000000e-01 : f32
    %168 = vector.broadcast %cst_40 : f32 to vector<16x24xf32>
    %169 = arith.mulf %168, %165 : vector<16x24xf32>
    %170 = arith.select %167, %165, %169 : vector<16x24xi1>, vector<16x24xf32>
    %c10 = arith.constant 10 : index
    %171 = memref.load %arg6[%c10] : memref<32xf32, #tpu.memory_space<smem>>
    %172 = vector.broadcast %171 : f32 to vector<16x24xf32>
    %173 = arith.mulf %172, %170 : vector<16x24xf32>
    %174 = arith.addf %146, %173 : vector<16x24xf32>
    %175 = vector.extract_strided_slice %14 {offsets = [0, 11], sizes = [16, 1], strides = [1, 1]} : vector<16x32xf32> to vector<16x1xf32>
    %176 = vector.extract_strided_slice %15 {offsets = [11, 0], sizes = [1, 24], strides = [1, 1]} : vector<32x24xf32> to vector<1x24xf32>
    %177 = vector.broadcast %175 : vector<16x1xf32> to vector<16x24xf32>
    %178 = vector.broadcast %176 : vector<1x24xf32> to vector<16x24xf32>
    %179 = arith.addf %177, %178 : vector<16x24xf32>
    %cst_41 = arith.constant 0.000000e+00 : f32
    %180 = vector.broadcast %cst_41 : f32 to vector<16x24xf32>
    %181 = arith.cmpf oge, %179, %180 : vector<16x24xf32>
    %cst_42 = arith.constant 2.000000e-01 : f32
    %182 = vector.broadcast %cst_42 : f32 to vector<16x24xf32>
    %183 = arith.mulf %182, %179 : vector<16x24xf32>
    %184 = arith.select %181, %179, %183 : vector<16x24xi1>, vector<16x24xf32>
    %c11 = arith.constant 11 : index
    %185 = memref.load %arg6[%c11] : memref<32xf32, #tpu.memory_space<smem>>
    %186 = vector.broadcast %185 : f32 to vector<16x24xf32>
    %187 = arith.mulf %186, %184 : vector<16x24xf32>
    %188 = arith.addf %160, %187 : vector<16x24xf32>
    %189 = vector.extract_strided_slice %14 {offsets = [0, 12], sizes = [16, 1], strides = [1, 1]} : vector<16x32xf32> to vector<16x1xf32>
    %190 = vector.extract_strided_slice %15 {offsets = [12, 0], sizes = [1, 24], strides = [1, 1]} : vector<32x24xf32> to vector<1x24xf32>
    %191 = vector.broadcast %189 : vector<16x1xf32> to vector<16x24xf32>
    %192 = vector.broadcast %190 : vector<1x24xf32> to vector<16x24xf32>
    %193 = arith.addf %191, %192 : vector<16x24xf32>
    %cst_43 = arith.constant 0.000000e+00 : f32
    %194 = vector.broadcast %cst_43 : f32 to vector<16x24xf32>
    %195 = arith.cmpf oge, %193, %194 : vector<16x24xf32>
    %cst_44 = arith.constant 2.000000e-01 : f32
    %196 = vector.broadcast %cst_44 : f32 to vector<16x24xf32>
    %197 = arith.mulf %196, %193 : vector<16x24xf32>
    %198 = arith.select %195, %193, %197 : vector<16x24xi1>, vector<16x24xf32>
    %c12 = arith.constant 12 : index
    %199 = memref.load %arg6[%c12] : memref<32xf32, #tpu.memory_space<smem>>
    %200 = vector.broadcast %199 : f32 to vector<16x24xf32>
    %201 = arith.mulf %200, %198 : vector<16x24xf32>
    %202 = arith.addf %174, %201 : vector<16x24xf32>
    %203 = vector.extract_strided_slice %14 {offsets = [0, 13], sizes = [16, 1], strides = [1, 1]} : vector<16x32xf32> to vector<16x1xf32>
    %204 = vector.extract_strided_slice %15 {offsets = [13, 0], sizes = [1, 24], strides = [1, 1]} : vector<32x24xf32> to vector<1x24xf32>
    %205 = vector.broadcast %203 : vector<16x1xf32> to vector<16x24xf32>
    %206 = vector.broadcast %204 : vector<1x24xf32> to vector<16x24xf32>
    %207 = arith.addf %205, %206 : vector<16x24xf32>
    %cst_45 = arith.constant 0.000000e+00 : f32
    %208 = vector.broadcast %cst_45 : f32 to vector<16x24xf32>
    %209 = arith.cmpf oge, %207, %208 : vector<16x24xf32>
    %cst_46 = arith.constant 2.000000e-01 : f32
    %210 = vector.broadcast %cst_46 : f32 to vector<16x24xf32>
    %211 = arith.mulf %210, %207 : vector<16x24xf32>
    %212 = arith.select %209, %207, %211 : vector<16x24xi1>, vector<16x24xf32>
    %c13 = arith.constant 13 : index
    %213 = memref.load %arg6[%c13] : memref<32xf32, #tpu.memory_space<smem>>
    %214 = vector.broadcast %213 : f32 to vector<16x24xf32>
    %215 = arith.mulf %214, %212 : vector<16x24xf32>
    %216 = arith.addf %188, %215 : vector<16x24xf32>
    %217 = vector.extract_strided_slice %14 {offsets = [0, 14], sizes = [16, 1], strides = [1, 1]} : vector<16x32xf32> to vector<16x1xf32>
    %218 = vector.extract_strided_slice %15 {offsets = [14, 0], sizes = [1, 24], strides = [1, 1]} : vector<32x24xf32> to vector<1x24xf32>
    %219 = vector.broadcast %217 : vector<16x1xf32> to vector<16x24xf32>
    %220 = vector.broadcast %218 : vector<1x24xf32> to vector<16x24xf32>
    %221 = arith.addf %219, %220 : vector<16x24xf32>
    %cst_47 = arith.constant 0.000000e+00 : f32
    %222 = vector.broadcast %cst_47 : f32 to vector<16x24xf32>
    %223 = arith.cmpf oge, %221, %222 : vector<16x24xf32>
    %cst_48 = arith.constant 2.000000e-01 : f32
    %224 = vector.broadcast %cst_48 : f32 to vector<16x24xf32>
    %225 = arith.mulf %224, %221 : vector<16x24xf32>
    %226 = arith.select %223, %221, %225 : vector<16x24xi1>, vector<16x24xf32>
    %c14 = arith.constant 14 : index
    %227 = memref.load %arg6[%c14] : memref<32xf32, #tpu.memory_space<smem>>
    %228 = vector.broadcast %227 : f32 to vector<16x24xf32>
    %229 = arith.mulf %228, %226 : vector<16x24xf32>
    %230 = arith.addf %202, %229 : vector<16x24xf32>
    %231 = vector.extract_strided_slice %14 {offsets = [0, 15], sizes = [16, 1], strides = [1, 1]} : vector<16x32xf32> to vector<16x1xf32>
    %232 = vector.extract_strided_slice %15 {offsets = [15, 0], sizes = [1, 24], strides = [1, 1]} : vector<32x24xf32> to vector<1x24xf32>
    %233 = vector.broadcast %231 : vector<16x1xf32> to vector<16x24xf32>
    %234 = vector.broadcast %232 : vector<1x24xf32> to vector<16x24xf32>
    %235 = arith.addf %233, %234 : vector<16x24xf32>
    %cst_49 = arith.constant 0.000000e+00 : f32
    %236 = vector.broadcast %cst_49 : f32 to vector<16x24xf32>
    %237 = arith.cmpf oge, %235, %236 : vector<16x24xf32>
    %cst_50 = arith.constant 2.000000e-01 : f32
    %238 = vector.broadcast %cst_50 : f32 to vector<16x24xf32>
    %239 = arith.mulf %238, %235 : vector<16x24xf32>
    %240 = arith.select %237, %235, %239 : vector<16x24xi1>, vector<16x24xf32>
    %c15 = arith.constant 15 : index
    %241 = memref.load %arg6[%c15] : memref<32xf32, #tpu.memory_space<smem>>
    %242 = vector.broadcast %241 : f32 to vector<16x24xf32>
    %243 = arith.mulf %242, %240 : vector<16x24xf32>
    %244 = arith.addf %216, %243 : vector<16x24xf32>
    %245 = arith.addf %230, %244 : vector<16x24xf32>
    %cst_51 = arith.constant 0.000000e+00 : f32
    %246 = vector.broadcast %cst_51 : f32 to vector<16x24xf32>
    %cst_52 = arith.constant 0.000000e+00 : f32
    %247 = vector.broadcast %cst_52 : f32 to vector<16x24xf32>
    %248 = vector.extract_strided_slice %14 {offsets = [0, 16], sizes = [16, 1], strides = [1, 1]} : vector<16x32xf32> to vector<16x1xf32>
    %249 = vector.extract_strided_slice %15 {offsets = [16, 0], sizes = [1, 24], strides = [1, 1]} : vector<32x24xf32> to vector<1x24xf32>
    %250 = vector.broadcast %248 : vector<16x1xf32> to vector<16x24xf32>
    %251 = vector.broadcast %249 : vector<1x24xf32> to vector<16x24xf32>
    %252 = arith.addf %250, %251 : vector<16x24xf32>
    %cst_53 = arith.constant 0.000000e+00 : f32
    %253 = vector.broadcast %cst_53 : f32 to vector<16x24xf32>
    %254 = arith.cmpf oge, %252, %253 : vector<16x24xf32>
    %cst_54 = arith.constant 2.000000e-01 : f32
    %255 = vector.broadcast %cst_54 : f32 to vector<16x24xf32>
    %256 = arith.mulf %255, %252 : vector<16x24xf32>
    %257 = arith.select %254, %252, %256 : vector<16x24xi1>, vector<16x24xf32>
    %c16 = arith.constant 16 : index
    %258 = memref.load %arg6[%c16] : memref<32xf32, #tpu.memory_space<smem>>
    %259 = vector.broadcast %258 : f32 to vector<16x24xf32>
    %260 = arith.mulf %259, %257 : vector<16x24xf32>
    %261 = arith.addf %246, %260 : vector<16x24xf32>
    %262 = vector.extract_strided_slice %14 {offsets = [0, 17], sizes = [16, 1], strides = [1, 1]} : vector<16x32xf32> to vector<16x1xf32>
    %263 = vector.extract_strided_slice %15 {offsets = [17, 0], sizes = [1, 24], strides = [1, 1]} : vector<32x24xf32> to vector<1x24xf32>
    %264 = vector.broadcast %262 : vector<16x1xf32> to vector<16x24xf32>
    %265 = vector.broadcast %263 : vector<1x24xf32> to vector<16x24xf32>
    %266 = arith.addf %264, %265 : vector<16x24xf32>
    %cst_55 = arith.constant 0.000000e+00 : f32
    %267 = vector.broadcast %cst_55 : f32 to vector<16x24xf32>
    %268 = arith.cmpf oge, %266, %267 : vector<16x24xf32>
    %cst_56 = arith.constant 2.000000e-01 : f32
    %269 = vector.broadcast %cst_56 : f32 to vector<16x24xf32>
    %270 = arith.mulf %269, %266 : vector<16x24xf32>
    %271 = arith.select %268, %266, %270 : vector<16x24xi1>, vector<16x24xf32>
    %c17 = arith.constant 17 : index
    %272 = memref.load %arg6[%c17] : memref<32xf32, #tpu.memory_space<smem>>
    %273 = vector.broadcast %272 : f32 to vector<16x24xf32>
    %274 = arith.mulf %273, %271 : vector<16x24xf32>
    %275 = arith.addf %247, %274 : vector<16x24xf32>
    %276 = vector.extract_strided_slice %14 {offsets = [0, 18], sizes = [16, 1], strides = [1, 1]} : vector<16x32xf32> to vector<16x1xf32>
    %277 = vector.extract_strided_slice %15 {offsets = [18, 0], sizes = [1, 24], strides = [1, 1]} : vector<32x24xf32> to vector<1x24xf32>
    %278 = vector.broadcast %276 : vector<16x1xf32> to vector<16x24xf32>
    %279 = vector.broadcast %277 : vector<1x24xf32> to vector<16x24xf32>
    %280 = arith.addf %278, %279 : vector<16x24xf32>
    %cst_57 = arith.constant 0.000000e+00 : f32
    %281 = vector.broadcast %cst_57 : f32 to vector<16x24xf32>
    %282 = arith.cmpf oge, %280, %281 : vector<16x24xf32>
    %cst_58 = arith.constant 2.000000e-01 : f32
    %283 = vector.broadcast %cst_58 : f32 to vector<16x24xf32>
    %284 = arith.mulf %283, %280 : vector<16x24xf32>
    %285 = arith.select %282, %280, %284 : vector<16x24xi1>, vector<16x24xf32>
    %c18 = arith.constant 18 : index
    %286 = memref.load %arg6[%c18] : memref<32xf32, #tpu.memory_space<smem>>
    %287 = vector.broadcast %286 : f32 to vector<16x24xf32>
    %288 = arith.mulf %287, %285 : vector<16x24xf32>
    %289 = arith.addf %261, %288 : vector<16x24xf32>
    %290 = vector.extract_strided_slice %14 {offsets = [0, 19], sizes = [16, 1], strides = [1, 1]} : vector<16x32xf32> to vector<16x1xf32>
    %291 = vector.extract_strided_slice %15 {offsets = [19, 0], sizes = [1, 24], strides = [1, 1]} : vector<32x24xf32> to vector<1x24xf32>
    %292 = vector.broadcast %290 : vector<16x1xf32> to vector<16x24xf32>
    %293 = vector.broadcast %291 : vector<1x24xf32> to vector<16x24xf32>
    %294 = arith.addf %292, %293 : vector<16x24xf32>
    %cst_59 = arith.constant 0.000000e+00 : f32
    %295 = vector.broadcast %cst_59 : f32 to vector<16x24xf32>
    %296 = arith.cmpf oge, %294, %295 : vector<16x24xf32>
    %cst_60 = arith.constant 2.000000e-01 : f32
    %297 = vector.broadcast %cst_60 : f32 to vector<16x24xf32>
    %298 = arith.mulf %297, %294 : vector<16x24xf32>
    %299 = arith.select %296, %294, %298 : vector<16x24xi1>, vector<16x24xf32>
    %c19 = arith.constant 19 : index
    %300 = memref.load %arg6[%c19] : memref<32xf32, #tpu.memory_space<smem>>
    %301 = vector.broadcast %300 : f32 to vector<16x24xf32>
    %302 = arith.mulf %301, %299 : vector<16x24xf32>
    %303 = arith.addf %275, %302 : vector<16x24xf32>
    %304 = vector.extract_strided_slice %14 {offsets = [0, 20], sizes = [16, 1], strides = [1, 1]} : vector<16x32xf32> to vector<16x1xf32>
    %305 = vector.extract_strided_slice %15 {offsets = [20, 0], sizes = [1, 24], strides = [1, 1]} : vector<32x24xf32> to vector<1x24xf32>
    %306 = vector.broadcast %304 : vector<16x1xf32> to vector<16x24xf32>
    %307 = vector.broadcast %305 : vector<1x24xf32> to vector<16x24xf32>
    %308 = arith.addf %306, %307 : vector<16x24xf32>
    %cst_61 = arith.constant 0.000000e+00 : f32
    %309 = vector.broadcast %cst_61 : f32 to vector<16x24xf32>
    %310 = arith.cmpf oge, %308, %309 : vector<16x24xf32>
    %cst_62 = arith.constant 2.000000e-01 : f32
    %311 = vector.broadcast %cst_62 : f32 to vector<16x24xf32>
    %312 = arith.mulf %311, %308 : vector<16x24xf32>
    %313 = arith.select %310, %308, %312 : vector<16x24xi1>, vector<16x24xf32>
    %c20 = arith.constant 20 : index
    %314 = memref.load %arg6[%c20] : memref<32xf32, #tpu.memory_space<smem>>
    %315 = vector.broadcast %314 : f32 to vector<16x24xf32>
    %316 = arith.mulf %315, %313 : vector<16x24xf32>
    %317 = arith.addf %289, %316 : vector<16x24xf32>
    %318 = vector.extract_strided_slice %14 {offsets = [0, 21], sizes = [16, 1], strides = [1, 1]} : vector<16x32xf32> to vector<16x1xf32>
    %319 = vector.extract_strided_slice %15 {offsets = [21, 0], sizes = [1, 24], strides = [1, 1]} : vector<32x24xf32> to vector<1x24xf32>
    %320 = vector.broadcast %318 : vector<16x1xf32> to vector<16x24xf32>
    %321 = vector.broadcast %319 : vector<1x24xf32> to vector<16x24xf32>
    %322 = arith.addf %320, %321 : vector<16x24xf32>
    %cst_63 = arith.constant 0.000000e+00 : f32
    %323 = vector.broadcast %cst_63 : f32 to vector<16x24xf32>
    %324 = arith.cmpf oge, %322, %323 : vector<16x24xf32>
    %cst_64 = arith.constant 2.000000e-01 : f32
    %325 = vector.broadcast %cst_64 : f32 to vector<16x24xf32>
    %326 = arith.mulf %325, %322 : vector<16x24xf32>
    %327 = arith.select %324, %322, %326 : vector<16x24xi1>, vector<16x24xf32>
    %c21 = arith.constant 21 : index
    %328 = memref.load %arg6[%c21] : memref<32xf32, #tpu.memory_space<smem>>
    %329 = vector.broadcast %328 : f32 to vector<16x24xf32>
    %330 = arith.mulf %329, %327 : vector<16x24xf32>
    %331 = arith.addf %303, %330 : vector<16x24xf32>
    %332 = vector.extract_strided_slice %14 {offsets = [0, 22], sizes = [16, 1], strides = [1, 1]} : vector<16x32xf32> to vector<16x1xf32>
    %333 = vector.extract_strided_slice %15 {offsets = [22, 0], sizes = [1, 24], strides = [1, 1]} : vector<32x24xf32> to vector<1x24xf32>
    %334 = vector.broadcast %332 : vector<16x1xf32> to vector<16x24xf32>
    %335 = vector.broadcast %333 : vector<1x24xf32> to vector<16x24xf32>
    %336 = arith.addf %334, %335 : vector<16x24xf32>
    %cst_65 = arith.constant 0.000000e+00 : f32
    %337 = vector.broadcast %cst_65 : f32 to vector<16x24xf32>
    %338 = arith.cmpf oge, %336, %337 : vector<16x24xf32>
    %cst_66 = arith.constant 2.000000e-01 : f32
    %339 = vector.broadcast %cst_66 : f32 to vector<16x24xf32>
    %340 = arith.mulf %339, %336 : vector<16x24xf32>
    %341 = arith.select %338, %336, %340 : vector<16x24xi1>, vector<16x24xf32>
    %c22 = arith.constant 22 : index
    %342 = memref.load %arg6[%c22] : memref<32xf32, #tpu.memory_space<smem>>
    %343 = vector.broadcast %342 : f32 to vector<16x24xf32>
    %344 = arith.mulf %343, %341 : vector<16x24xf32>
    %345 = arith.addf %317, %344 : vector<16x24xf32>
    %346 = vector.extract_strided_slice %14 {offsets = [0, 23], sizes = [16, 1], strides = [1, 1]} : vector<16x32xf32> to vector<16x1xf32>
    %347 = vector.extract_strided_slice %15 {offsets = [23, 0], sizes = [1, 24], strides = [1, 1]} : vector<32x24xf32> to vector<1x24xf32>
    %348 = vector.broadcast %346 : vector<16x1xf32> to vector<16x24xf32>
    %349 = vector.broadcast %347 : vector<1x24xf32> to vector<16x24xf32>
    %350 = arith.addf %348, %349 : vector<16x24xf32>
    %cst_67 = arith.constant 0.000000e+00 : f32
    %351 = vector.broadcast %cst_67 : f32 to vector<16x24xf32>
    %352 = arith.cmpf oge, %350, %351 : vector<16x24xf32>
    %cst_68 = arith.constant 2.000000e-01 : f32
    %353 = vector.broadcast %cst_68 : f32 to vector<16x24xf32>
    %354 = arith.mulf %353, %350 : vector<16x24xf32>
    %355 = arith.select %352, %350, %354 : vector<16x24xi1>, vector<16x24xf32>
    %c23 = arith.constant 23 : index
    %356 = memref.load %arg6[%c23] : memref<32xf32, #tpu.memory_space<smem>>
    %357 = vector.broadcast %356 : f32 to vector<16x24xf32>
    %358 = arith.mulf %357, %355 : vector<16x24xf32>
    %359 = arith.addf %331, %358 : vector<16x24xf32>
    %360 = arith.addf %345, %359 : vector<16x24xf32>
    %cst_69 = arith.constant 0.000000e+00 : f32
    %361 = vector.broadcast %cst_69 : f32 to vector<16x24xf32>
    %cst_70 = arith.constant 0.000000e+00 : f32
    %362 = vector.broadcast %cst_70 : f32 to vector<16x24xf32>
    %363 = vector.extract_strided_slice %14 {offsets = [0, 24], sizes = [16, 1], strides = [1, 1]} : vector<16x32xf32> to vector<16x1xf32>
    %364 = vector.extract_strided_slice %15 {offsets = [24, 0], sizes = [1, 24], strides = [1, 1]} : vector<32x24xf32> to vector<1x24xf32>
    %365 = vector.broadcast %363 : vector<16x1xf32> to vector<16x24xf32>
    %366 = vector.broadcast %364 : vector<1x24xf32> to vector<16x24xf32>
    %367 = arith.addf %365, %366 : vector<16x24xf32>
    %cst_71 = arith.constant 0.000000e+00 : f32
    %368 = vector.broadcast %cst_71 : f32 to vector<16x24xf32>
    %369 = arith.cmpf oge, %367, %368 : vector<16x24xf32>
    %cst_72 = arith.constant 2.000000e-01 : f32
    %370 = vector.broadcast %cst_72 : f32 to vector<16x24xf32>
    %371 = arith.mulf %370, %367 : vector<16x24xf32>
    %372 = arith.select %369, %367, %371 : vector<16x24xi1>, vector<16x24xf32>
    %c24 = arith.constant 24 : index
    %373 = memref.load %arg6[%c24] : memref<32xf32, #tpu.memory_space<smem>>
    %374 = vector.broadcast %373 : f32 to vector<16x24xf32>
    %375 = arith.mulf %374, %372 : vector<16x24xf32>
    %376 = arith.addf %361, %375 : vector<16x24xf32>
    %377 = vector.extract_strided_slice %14 {offsets = [0, 25], sizes = [16, 1], strides = [1, 1]} : vector<16x32xf32> to vector<16x1xf32>
    %378 = vector.extract_strided_slice %15 {offsets = [25, 0], sizes = [1, 24], strides = [1, 1]} : vector<32x24xf32> to vector<1x24xf32>
    %379 = vector.broadcast %377 : vector<16x1xf32> to vector<16x24xf32>
    %380 = vector.broadcast %378 : vector<1x24xf32> to vector<16x24xf32>
    %381 = arith.addf %379, %380 : vector<16x24xf32>
    %cst_73 = arith.constant 0.000000e+00 : f32
    %382 = vector.broadcast %cst_73 : f32 to vector<16x24xf32>
    %383 = arith.cmpf oge, %381, %382 : vector<16x24xf32>
    %cst_74 = arith.constant 2.000000e-01 : f32
    %384 = vector.broadcast %cst_74 : f32 to vector<16x24xf32>
    %385 = arith.mulf %384, %381 : vector<16x24xf32>
    %386 = arith.select %383, %381, %385 : vector<16x24xi1>, vector<16x24xf32>
    %c25 = arith.constant 25 : index
    %387 = memref.load %arg6[%c25] : memref<32xf32, #tpu.memory_space<smem>>
    %388 = vector.broadcast %387 : f32 to vector<16x24xf32>
    %389 = arith.mulf %388, %386 : vector<16x24xf32>
    %390 = arith.addf %362, %389 : vector<16x24xf32>
    %391 = vector.extract_strided_slice %14 {offsets = [0, 26], sizes = [16, 1], strides = [1, 1]} : vector<16x32xf32> to vector<16x1xf32>
    %392 = vector.extract_strided_slice %15 {offsets = [26, 0], sizes = [1, 24], strides = [1, 1]} : vector<32x24xf32> to vector<1x24xf32>
    %393 = vector.broadcast %391 : vector<16x1xf32> to vector<16x24xf32>
    %394 = vector.broadcast %392 : vector<1x24xf32> to vector<16x24xf32>
    %395 = arith.addf %393, %394 : vector<16x24xf32>
    %cst_75 = arith.constant 0.000000e+00 : f32
    %396 = vector.broadcast %cst_75 : f32 to vector<16x24xf32>
    %397 = arith.cmpf oge, %395, %396 : vector<16x24xf32>
    %cst_76 = arith.constant 2.000000e-01 : f32
    %398 = vector.broadcast %cst_76 : f32 to vector<16x24xf32>
    %399 = arith.mulf %398, %395 : vector<16x24xf32>
    %400 = arith.select %397, %395, %399 : vector<16x24xi1>, vector<16x24xf32>
    %c26 = arith.constant 26 : index
    %401 = memref.load %arg6[%c26] : memref<32xf32, #tpu.memory_space<smem>>
    %402 = vector.broadcast %401 : f32 to vector<16x24xf32>
    %403 = arith.mulf %402, %400 : vector<16x24xf32>
    %404 = arith.addf %376, %403 : vector<16x24xf32>
    %405 = vector.extract_strided_slice %14 {offsets = [0, 27], sizes = [16, 1], strides = [1, 1]} : vector<16x32xf32> to vector<16x1xf32>
    %406 = vector.extract_strided_slice %15 {offsets = [27, 0], sizes = [1, 24], strides = [1, 1]} : vector<32x24xf32> to vector<1x24xf32>
    %407 = vector.broadcast %405 : vector<16x1xf32> to vector<16x24xf32>
    %408 = vector.broadcast %406 : vector<1x24xf32> to vector<16x24xf32>
    %409 = arith.addf %407, %408 : vector<16x24xf32>
    %cst_77 = arith.constant 0.000000e+00 : f32
    %410 = vector.broadcast %cst_77 : f32 to vector<16x24xf32>
    %411 = arith.cmpf oge, %409, %410 : vector<16x24xf32>
    %cst_78 = arith.constant 2.000000e-01 : f32
    %412 = vector.broadcast %cst_78 : f32 to vector<16x24xf32>
    %413 = arith.mulf %412, %409 : vector<16x24xf32>
    %414 = arith.select %411, %409, %413 : vector<16x24xi1>, vector<16x24xf32>
    %c27 = arith.constant 27 : index
    %415 = memref.load %arg6[%c27] : memref<32xf32, #tpu.memory_space<smem>>
    %416 = vector.broadcast %415 : f32 to vector<16x24xf32>
    %417 = arith.mulf %416, %414 : vector<16x24xf32>
    %418 = arith.addf %390, %417 : vector<16x24xf32>
    %419 = vector.extract_strided_slice %14 {offsets = [0, 28], sizes = [16, 1], strides = [1, 1]} : vector<16x32xf32> to vector<16x1xf32>
    %420 = vector.extract_strided_slice %15 {offsets = [28, 0], sizes = [1, 24], strides = [1, 1]} : vector<32x24xf32> to vector<1x24xf32>
    %421 = vector.broadcast %419 : vector<16x1xf32> to vector<16x24xf32>
    %422 = vector.broadcast %420 : vector<1x24xf32> to vector<16x24xf32>
    %423 = arith.addf %421, %422 : vector<16x24xf32>
    %cst_79 = arith.constant 0.000000e+00 : f32
    %424 = vector.broadcast %cst_79 : f32 to vector<16x24xf32>
    %425 = arith.cmpf oge, %423, %424 : vector<16x24xf32>
    %cst_80 = arith.constant 2.000000e-01 : f32
    %426 = vector.broadcast %cst_80 : f32 to vector<16x24xf32>
    %427 = arith.mulf %426, %423 : vector<16x24xf32>
    %428 = arith.select %425, %423, %427 : vector<16x24xi1>, vector<16x24xf32>
    %c28 = arith.constant 28 : index
    %429 = memref.load %arg6[%c28] : memref<32xf32, #tpu.memory_space<smem>>
    %430 = vector.broadcast %429 : f32 to vector<16x24xf32>
    %431 = arith.mulf %430, %428 : vector<16x24xf32>
    %432 = arith.addf %404, %431 : vector<16x24xf32>
    %433 = vector.extract_strided_slice %14 {offsets = [0, 29], sizes = [16, 1], strides = [1, 1]} : vector<16x32xf32> to vector<16x1xf32>
    %434 = vector.extract_strided_slice %15 {offsets = [29, 0], sizes = [1, 24], strides = [1, 1]} : vector<32x24xf32> to vector<1x24xf32>
    %435 = vector.broadcast %433 : vector<16x1xf32> to vector<16x24xf32>
    %436 = vector.broadcast %434 : vector<1x24xf32> to vector<16x24xf32>
    %437 = arith.addf %435, %436 : vector<16x24xf32>
    %cst_81 = arith.constant 0.000000e+00 : f32
    %438 = vector.broadcast %cst_81 : f32 to vector<16x24xf32>
    %439 = arith.cmpf oge, %437, %438 : vector<16x24xf32>
    %cst_82 = arith.constant 2.000000e-01 : f32
    %440 = vector.broadcast %cst_82 : f32 to vector<16x24xf32>
    %441 = arith.mulf %440, %437 : vector<16x24xf32>
    %442 = arith.select %439, %437, %441 : vector<16x24xi1>, vector<16x24xf32>
    %c29 = arith.constant 29 : index
    %443 = memref.load %arg6[%c29] : memref<32xf32, #tpu.memory_space<smem>>
    %444 = vector.broadcast %443 : f32 to vector<16x24xf32>
    %445 = arith.mulf %444, %442 : vector<16x24xf32>
    %446 = arith.addf %418, %445 : vector<16x24xf32>
    %447 = vector.extract_strided_slice %14 {offsets = [0, 30], sizes = [16, 1], strides = [1, 1]} : vector<16x32xf32> to vector<16x1xf32>
    %448 = vector.extract_strided_slice %15 {offsets = [30, 0], sizes = [1, 24], strides = [1, 1]} : vector<32x24xf32> to vector<1x24xf32>
    %449 = vector.broadcast %447 : vector<16x1xf32> to vector<16x24xf32>
    %450 = vector.broadcast %448 : vector<1x24xf32> to vector<16x24xf32>
    %451 = arith.addf %449, %450 : vector<16x24xf32>
    %cst_83 = arith.constant 0.000000e+00 : f32
    %452 = vector.broadcast %cst_83 : f32 to vector<16x24xf32>
    %453 = arith.cmpf oge, %451, %452 : vector<16x24xf32>
    %cst_84 = arith.constant 2.000000e-01 : f32
    %454 = vector.broadcast %cst_84 : f32 to vector<16x24xf32>
    %455 = arith.mulf %454, %451 : vector<16x24xf32>
    %456 = arith.select %453, %451, %455 : vector<16x24xi1>, vector<16x24xf32>
    %c30 = arith.constant 30 : index
    %457 = memref.load %arg6[%c30] : memref<32xf32, #tpu.memory_space<smem>>
    %458 = vector.broadcast %457 : f32 to vector<16x24xf32>
    %459 = arith.mulf %458, %456 : vector<16x24xf32>
    %460 = arith.addf %432, %459 : vector<16x24xf32>
    %461 = vector.extract_strided_slice %14 {offsets = [0, 31], sizes = [16, 1], strides = [1, 1]} : vector<16x32xf32> to vector<16x1xf32>
    %462 = vector.extract_strided_slice %15 {offsets = [31, 0], sizes = [1, 24], strides = [1, 1]} : vector<32x24xf32> to vector<1x24xf32>
    %463 = vector.broadcast %461 : vector<16x1xf32> to vector<16x24xf32>
    %464 = vector.broadcast %462 : vector<1x24xf32> to vector<16x24xf32>
    %465 = arith.addf %463, %464 : vector<16x24xf32>
    %cst_85 = arith.constant 0.000000e+00 : f32
    %466 = vector.broadcast %cst_85 : f32 to vector<16x24xf32>
    %467 = arith.cmpf oge, %465, %466 : vector<16x24xf32>
    %cst_86 = arith.constant 2.000000e-01 : f32
    %468 = vector.broadcast %cst_86 : f32 to vector<16x24xf32>
    %469 = arith.mulf %468, %465 : vector<16x24xf32>
    %470 = arith.select %467, %465, %469 : vector<16x24xi1>, vector<16x24xf32>
    %c31 = arith.constant 31 : index
    %471 = memref.load %arg6[%c31] : memref<32xf32, #tpu.memory_space<smem>>
    %472 = vector.broadcast %471 : f32 to vector<16x24xf32>
    %473 = arith.mulf %472, %470 : vector<16x24xf32>
    %474 = arith.addf %446, %473 : vector<16x24xf32>
    %475 = arith.addf %460, %474 : vector<16x24xf32>
    %476 = tpu.concatenate %130, %245, %360, %475 in 1 : vector<16x24xf32>, vector<16x24xf32>, vector<16x24xf32>, vector<16x24xf32> -> vector<16x96xf32>
    %c0_87 = arith.constant 0 : index
    %c0_88 = arith.constant 0 : index
    %477 = vector.load %arg10[%c0_87, %c0_88] : memref<16x96xf32, #tpu.memory_space<vmem>>, vector<16x96xf32>
    %478 = arith.addf %476, %477 : vector<16x96xf32>
    %cst_89 = arith.constant dense<0xFF800000> : vector<16xf32>
    %479 = vector.multi_reduction <maximumf>, %478, %cst_89 [1] : vector<16x96xf32> to vector<16xf32>
    %480 = vector.shape_cast %479 : vector<16xf32> to vector<16x1xf32>
    %481 = vector.broadcast %480 : vector<16x1xf32> to vector<16x96xf32>
    %482 = arith.subf %478, %481 : vector<16x96xf32>
    %483 = math.exp %482 : vector<16x96xf32>
    %c0_90 = arith.constant 0 : index
    %c0_91 = arith.constant 0 : index
    %484 = vector.load %arg12[%c0_90, %c0_91] : memref<96x4xf32, #tpu.memory_space<vmem>>, vector<96x4xf32>
    %cst_92 = arith.constant dense<0.000000e+00> : vector<16x4xf32>
    %485 = tpu.matmul %483, %484, %cst_92 {dimension_numbers = #tpu.dot_dimension_numbers<[1], [0], [0], [1], [0, 0, 1, 1], [], []>} : vector<16x96xf32>, vector<96x4xf32>, vector<16x4xf32> -> vector<16x4xf32>
    %c0_93 = arith.constant 0 : index
    %c0_94 = arith.constant 0 : index
    %486 = vector.load %arg11[%c0_93, %c0_94] : memref<96x32xf32, #tpu.memory_space<vmem>>, vector<96x32xf32>
    %487 = tpu.concatenate %7, %7, %7, %7 in 0 : vector<24x32xf32>, vector<24x32xf32>, vector<24x32xf32>, vector<24x32xf32> -> vector<96x32xf32>
    %488 = arith.mulf %486, %487 : vector<96x32xf32>
    %cst_95 = arith.constant dense<0.000000e+00> : vector<16x32xf32>
    %489 = tpu.matmul %483, %488, %cst_95 {dimension_numbers = #tpu.dot_dimension_numbers<[1], [0], [0], [1], [0, 0, 1, 1], [], []>} : vector<16x96xf32>, vector<96x32xf32>, vector<16x32xf32> -> vector<16x32xf32>
    %cst_96 = arith.constant dense<0.000000e+00> : vector<16x32xf32>
    %490 = tpu.matmul %485, %0, %cst_96 {dimension_numbers = #tpu.dot_dimension_numbers<[1], [0], [0], [1], [0, 0, 1, 1], [], []>} : vector<16x4xf32>, vector<4x32xf32>, vector<16x32xf32> -> vector<16x32xf32>
    %491 = tpu.reciprocal %490 {approx = true} : vector<16x32xf32> -> vector<16x32xf32>
    %492 = arith.mulf %489, %491 : vector<16x32xf32>
    %c0_97 = arith.constant 0 : index
    %c0_98 = arith.constant 0 : index
    %493 = vector.load %arg9[%c0_97, %c0_98] : memref<1x32xf32, #tpu.memory_space<vmem>>, vector<1x32xf32>
    %494 = vector.broadcast %493 : vector<1x32xf32> to vector<16x32xf32>
    %495 = arith.addf %492, %494 : vector<16x32xf32>
    %496 = arith.addf %495, %13 : vector<16x32xf32>
    %cst_99 = arith.constant 0.000000e+00 : f32
    %497 = vector.broadcast %cst_99 : f32 to vector<16x32xf32>
    %498 = arith.cmpf ogt, %496, %497 : vector<16x32xf32>
    %499 = math.exp %496 : vector<16x32xf32>
    %cst_100 = arith.constant 1.000000e+00 : f32
    %500 = vector.broadcast %cst_100 : f32 to vector<16x32xf32>
    %501 = arith.subf %499, %500 : vector<16x32xf32>
    %502 = arith.select %498, %496, %501 : vector<16x32xi1>, vector<16x32xf32>
    %c0_101 = arith.constant 0 : index
    %c0_102 = arith.constant 0 : index
    %503 = vector.load %arg13[%c0_101, %c0_102] : memref<32x32xf32, #tpu.memory_space<vmem>>, vector<32x32xf32>
    %cst_103 = arith.constant dense<0.000000e+00> : vector<16x32xf32>
    %504 = tpu.matmul %502, %503, %cst_103 {dimension_numbers = #tpu.dot_dimension_numbers<[1], [0], [0], [1], [0, 0, 1, 1], [], []>} : vector<16x32xf32>, vector<32x32xf32>, vector<16x32xf32> -> vector<16x32xf32>
    %c0_104 = arith.constant 0 : index
    %c0_105 = arith.constant 0 : index
    %505 = vector.load %arg14[%c0_104, %c0_105] : memref<1x32xf32, #tpu.memory_space<vmem>>, vector<1x32xf32>
    %506 = vector.broadcast %505 : vector<1x32xf32> to vector<16x32xf32>
    %507 = arith.addf %504, %506 : vector<16x32xf32>
    %508 = vector.extract_strided_slice %502 {offsets = [0, 0], sizes = [8, 32], strides = [1, 1]} : vector<16x32xf32> to vector<8x32xf32>
    %c0_106 = arith.constant 0 : index
    %c0_107 = arith.constant 0 : index
    %509 = vector.load %arg16[%c0_106, %c0_107] : memref<32x8xf32, #tpu.memory_space<vmem>>, vector<32x8xf32>
    %cst_108 = arith.constant dense<0.000000e+00> : vector<8x8xf32>
    %510 = tpu.matmul %508, %509, %cst_108 {dimension_numbers = #tpu.dot_dimension_numbers<[1], [0], [0], [1], [0, 0, 1, 1], [], []>} : vector<8x32xf32>, vector<32x8xf32>, vector<8x8xf32> -> vector<8x8xf32>
    %c0_109 = arith.constant 0 : index
    %c0_110 = arith.constant 0 : index
    %511 = vector.load %arg17[%c0_109, %c0_110] : memref<1x8xf32, #tpu.memory_space<vmem>>, vector<1x8xf32>
    %512 = vector.broadcast %511 : vector<1x8xf32> to vector<8x8xf32>
    %513 = arith.addf %510, %512 : vector<8x8xf32>
    %514 = vector.extract_strided_slice %507 {offsets = [0, 0], sizes = [8, 32], strides = [1, 1]} : vector<16x32xf32> to vector<8x32xf32>
    %515 = tpu.transpose %507, [1, 0] : vector<16x32xf32> -> vector<32x16xf32>
    %cst_111 = arith.constant 0.000000e+00 : f32
    %516 = vector.broadcast %cst_111 : f32 to vector<8x16xf32>
    %cst_112 = arith.constant 0.000000e+00 : f32
    %517 = vector.broadcast %cst_112 : f32 to vector<8x16xf32>
    %518 = vector.extract_strided_slice %514 {offsets = [0, 0], sizes = [8, 1], strides = [1, 1]} : vector<8x32xf32> to vector<8x1xf32>
    %519 = vector.extract_strided_slice %515 {offsets = [0, 0], sizes = [1, 16], strides = [1, 1]} : vector<32x16xf32> to vector<1x16xf32>
    %520 = vector.broadcast %518 : vector<8x1xf32> to vector<8x16xf32>
    %521 = vector.broadcast %519 : vector<1x16xf32> to vector<8x16xf32>
    %522 = arith.addf %520, %521 : vector<8x16xf32>
    %cst_113 = arith.constant 0.000000e+00 : f32
    %523 = vector.broadcast %cst_113 : f32 to vector<8x16xf32>
    %524 = arith.cmpf oge, %522, %523 : vector<8x16xf32>
    %cst_114 = arith.constant 2.000000e-01 : f32
    %525 = vector.broadcast %cst_114 : f32 to vector<8x16xf32>
    %526 = arith.mulf %525, %522 : vector<8x16xf32>
    %527 = arith.select %524, %522, %526 : vector<8x16xi1>, vector<8x16xf32>
    %c0_115 = arith.constant 0 : index
    %528 = memref.load %arg15[%c0_115] : memref<32xf32, #tpu.memory_space<smem>>
    %529 = vector.broadcast %528 : f32 to vector<8x16xf32>
    %530 = arith.mulf %529, %527 : vector<8x16xf32>
    %531 = arith.addf %516, %530 : vector<8x16xf32>
    %532 = vector.extract_strided_slice %514 {offsets = [0, 1], sizes = [8, 1], strides = [1, 1]} : vector<8x32xf32> to vector<8x1xf32>
    %533 = vector.extract_strided_slice %515 {offsets = [1, 0], sizes = [1, 16], strides = [1, 1]} : vector<32x16xf32> to vector<1x16xf32>
    %534 = vector.broadcast %532 : vector<8x1xf32> to vector<8x16xf32>
    %535 = vector.broadcast %533 : vector<1x16xf32> to vector<8x16xf32>
    %536 = arith.addf %534, %535 : vector<8x16xf32>
    %cst_116 = arith.constant 0.000000e+00 : f32
    %537 = vector.broadcast %cst_116 : f32 to vector<8x16xf32>
    %538 = arith.cmpf oge, %536, %537 : vector<8x16xf32>
    %cst_117 = arith.constant 2.000000e-01 : f32
    %539 = vector.broadcast %cst_117 : f32 to vector<8x16xf32>
    %540 = arith.mulf %539, %536 : vector<8x16xf32>
    %541 = arith.select %538, %536, %540 : vector<8x16xi1>, vector<8x16xf32>
    %c1_118 = arith.constant 1 : index
    %542 = memref.load %arg15[%c1_118] : memref<32xf32, #tpu.memory_space<smem>>
    %543 = vector.broadcast %542 : f32 to vector<8x16xf32>
    %544 = arith.mulf %543, %541 : vector<8x16xf32>
    %545 = arith.addf %517, %544 : vector<8x16xf32>
    %546 = vector.extract_strided_slice %514 {offsets = [0, 2], sizes = [8, 1], strides = [1, 1]} : vector<8x32xf32> to vector<8x1xf32>
    %547 = vector.extract_strided_slice %515 {offsets = [2, 0], sizes = [1, 16], strides = [1, 1]} : vector<32x16xf32> to vector<1x16xf32>
    %548 = vector.broadcast %546 : vector<8x1xf32> to vector<8x16xf32>
    %549 = vector.broadcast %547 : vector<1x16xf32> to vector<8x16xf32>
    %550 = arith.addf %548, %549 : vector<8x16xf32>
    %cst_119 = arith.constant 0.000000e+00 : f32
    %551 = vector.broadcast %cst_119 : f32 to vector<8x16xf32>
    %552 = arith.cmpf oge, %550, %551 : vector<8x16xf32>
    %cst_120 = arith.constant 2.000000e-01 : f32
    %553 = vector.broadcast %cst_120 : f32 to vector<8x16xf32>
    %554 = arith.mulf %553, %550 : vector<8x16xf32>
    %555 = arith.select %552, %550, %554 : vector<8x16xi1>, vector<8x16xf32>
    %c2_121 = arith.constant 2 : index
    %556 = memref.load %arg15[%c2_121] : memref<32xf32, #tpu.memory_space<smem>>
    %557 = vector.broadcast %556 : f32 to vector<8x16xf32>
    %558 = arith.mulf %557, %555 : vector<8x16xf32>
    %559 = arith.addf %531, %558 : vector<8x16xf32>
    %560 = vector.extract_strided_slice %514 {offsets = [0, 3], sizes = [8, 1], strides = [1, 1]} : vector<8x32xf32> to vector<8x1xf32>
    %561 = vector.extract_strided_slice %515 {offsets = [3, 0], sizes = [1, 16], strides = [1, 1]} : vector<32x16xf32> to vector<1x16xf32>
    %562 = vector.broadcast %560 : vector<8x1xf32> to vector<8x16xf32>
    %563 = vector.broadcast %561 : vector<1x16xf32> to vector<8x16xf32>
    %564 = arith.addf %562, %563 : vector<8x16xf32>
    %cst_122 = arith.constant 0.000000e+00 : f32
    %565 = vector.broadcast %cst_122 : f32 to vector<8x16xf32>
    %566 = arith.cmpf oge, %564, %565 : vector<8x16xf32>
    %cst_123 = arith.constant 2.000000e-01 : f32
    %567 = vector.broadcast %cst_123 : f32 to vector<8x16xf32>
    %568 = arith.mulf %567, %564 : vector<8x16xf32>
    %569 = arith.select %566, %564, %568 : vector<8x16xi1>, vector<8x16xf32>
    %c3_124 = arith.constant 3 : index
    %570 = memref.load %arg15[%c3_124] : memref<32xf32, #tpu.memory_space<smem>>
    %571 = vector.broadcast %570 : f32 to vector<8x16xf32>
    %572 = arith.mulf %571, %569 : vector<8x16xf32>
    %573 = arith.addf %545, %572 : vector<8x16xf32>
    %574 = vector.extract_strided_slice %514 {offsets = [0, 4], sizes = [8, 1], strides = [1, 1]} : vector<8x32xf32> to vector<8x1xf32>
    %575 = vector.extract_strided_slice %515 {offsets = [4, 0], sizes = [1, 16], strides = [1, 1]} : vector<32x16xf32> to vector<1x16xf32>
    %576 = vector.broadcast %574 : vector<8x1xf32> to vector<8x16xf32>
    %577 = vector.broadcast %575 : vector<1x16xf32> to vector<8x16xf32>
    %578 = arith.addf %576, %577 : vector<8x16xf32>
    %cst_125 = arith.constant 0.000000e+00 : f32
    %579 = vector.broadcast %cst_125 : f32 to vector<8x16xf32>
    %580 = arith.cmpf oge, %578, %579 : vector<8x16xf32>
    %cst_126 = arith.constant 2.000000e-01 : f32
    %581 = vector.broadcast %cst_126 : f32 to vector<8x16xf32>
    %582 = arith.mulf %581, %578 : vector<8x16xf32>
    %583 = arith.select %580, %578, %582 : vector<8x16xi1>, vector<8x16xf32>
    %c4_127 = arith.constant 4 : index
    %584 = memref.load %arg15[%c4_127] : memref<32xf32, #tpu.memory_space<smem>>
    %585 = vector.broadcast %584 : f32 to vector<8x16xf32>
    %586 = arith.mulf %585, %583 : vector<8x16xf32>
    %587 = arith.addf %559, %586 : vector<8x16xf32>
    %588 = vector.extract_strided_slice %514 {offsets = [0, 5], sizes = [8, 1], strides = [1, 1]} : vector<8x32xf32> to vector<8x1xf32>
    %589 = vector.extract_strided_slice %515 {offsets = [5, 0], sizes = [1, 16], strides = [1, 1]} : vector<32x16xf32> to vector<1x16xf32>
    %590 = vector.broadcast %588 : vector<8x1xf32> to vector<8x16xf32>
    %591 = vector.broadcast %589 : vector<1x16xf32> to vector<8x16xf32>
    %592 = arith.addf %590, %591 : vector<8x16xf32>
    %cst_128 = arith.constant 0.000000e+00 : f32
    %593 = vector.broadcast %cst_128 : f32 to vector<8x16xf32>
    %594 = arith.cmpf oge, %592, %593 : vector<8x16xf32>
    %cst_129 = arith.constant 2.000000e-01 : f32
    %595 = vector.broadcast %cst_129 : f32 to vector<8x16xf32>
    %596 = arith.mulf %595, %592 : vector<8x16xf32>
    %597 = arith.select %594, %592, %596 : vector<8x16xi1>, vector<8x16xf32>
    %c5_130 = arith.constant 5 : index
    %598 = memref.load %arg15[%c5_130] : memref<32xf32, #tpu.memory_space<smem>>
    %599 = vector.broadcast %598 : f32 to vector<8x16xf32>
    %600 = arith.mulf %599, %597 : vector<8x16xf32>
    %601 = arith.addf %573, %600 : vector<8x16xf32>
    %602 = vector.extract_strided_slice %514 {offsets = [0, 6], sizes = [8, 1], strides = [1, 1]} : vector<8x32xf32> to vector<8x1xf32>
    %603 = vector.extract_strided_slice %515 {offsets = [6, 0], sizes = [1, 16], strides = [1, 1]} : vector<32x16xf32> to vector<1x16xf32>
    %604 = vector.broadcast %602 : vector<8x1xf32> to vector<8x16xf32>
    %605 = vector.broadcast %603 : vector<1x16xf32> to vector<8x16xf32>
    %606 = arith.addf %604, %605 : vector<8x16xf32>
    %cst_131 = arith.constant 0.000000e+00 : f32
    %607 = vector.broadcast %cst_131 : f32 to vector<8x16xf32>
    %608 = arith.cmpf oge, %606, %607 : vector<8x16xf32>
    %cst_132 = arith.constant 2.000000e-01 : f32
    %609 = vector.broadcast %cst_132 : f32 to vector<8x16xf32>
    %610 = arith.mulf %609, %606 : vector<8x16xf32>
    %611 = arith.select %608, %606, %610 : vector<8x16xi1>, vector<8x16xf32>
    %c6_133 = arith.constant 6 : index
    %612 = memref.load %arg15[%c6_133] : memref<32xf32, #tpu.memory_space<smem>>
    %613 = vector.broadcast %612 : f32 to vector<8x16xf32>
    %614 = arith.mulf %613, %611 : vector<8x16xf32>
    %615 = arith.addf %587, %614 : vector<8x16xf32>
    %616 = vector.extract_strided_slice %514 {offsets = [0, 7], sizes = [8, 1], strides = [1, 1]} : vector<8x32xf32> to vector<8x1xf32>
    %617 = vector.extract_strided_slice %515 {offsets = [7, 0], sizes = [1, 16], strides = [1, 1]} : vector<32x16xf32> to vector<1x16xf32>
    %618 = vector.broadcast %616 : vector<8x1xf32> to vector<8x16xf32>
    %619 = vector.broadcast %617 : vector<1x16xf32> to vector<8x16xf32>
    %620 = arith.addf %618, %619 : vector<8x16xf32>
    %cst_134 = arith.constant 0.000000e+00 : f32
    %621 = vector.broadcast %cst_134 : f32 to vector<8x16xf32>
    %622 = arith.cmpf oge, %620, %621 : vector<8x16xf32>
    %cst_135 = arith.constant 2.000000e-01 : f32
    %623 = vector.broadcast %cst_135 : f32 to vector<8x16xf32>
    %624 = arith.mulf %623, %620 : vector<8x16xf32>
    %625 = arith.select %622, %620, %624 : vector<8x16xi1>, vector<8x16xf32>
    %c7_136 = arith.constant 7 : index
    %626 = memref.load %arg15[%c7_136] : memref<32xf32, #tpu.memory_space<smem>>
    %627 = vector.broadcast %626 : f32 to vector<8x16xf32>
    %628 = arith.mulf %627, %625 : vector<8x16xf32>
    %629 = arith.addf %601, %628 : vector<8x16xf32>
    %630 = arith.addf %615, %629 : vector<8x16xf32>
    %cst_137 = arith.constant 0.000000e+00 : f32
    %631 = vector.broadcast %cst_137 : f32 to vector<8x16xf32>
    %cst_138 = arith.constant 0.000000e+00 : f32
    %632 = vector.broadcast %cst_138 : f32 to vector<8x16xf32>
    %633 = vector.extract_strided_slice %514 {offsets = [0, 8], sizes = [8, 1], strides = [1, 1]} : vector<8x32xf32> to vector<8x1xf32>
    %634 = vector.extract_strided_slice %515 {offsets = [8, 0], sizes = [1, 16], strides = [1, 1]} : vector<32x16xf32> to vector<1x16xf32>
    %635 = vector.broadcast %633 : vector<8x1xf32> to vector<8x16xf32>
    %636 = vector.broadcast %634 : vector<1x16xf32> to vector<8x16xf32>
    %637 = arith.addf %635, %636 : vector<8x16xf32>
    %cst_139 = arith.constant 0.000000e+00 : f32
    %638 = vector.broadcast %cst_139 : f32 to vector<8x16xf32>
    %639 = arith.cmpf oge, %637, %638 : vector<8x16xf32>
    %cst_140 = arith.constant 2.000000e-01 : f32
    %640 = vector.broadcast %cst_140 : f32 to vector<8x16xf32>
    %641 = arith.mulf %640, %637 : vector<8x16xf32>
    %642 = arith.select %639, %637, %641 : vector<8x16xi1>, vector<8x16xf32>
    %c8_141 = arith.constant 8 : index
    %643 = memref.load %arg15[%c8_141] : memref<32xf32, #tpu.memory_space<smem>>
    %644 = vector.broadcast %643 : f32 to vector<8x16xf32>
    %645 = arith.mulf %644, %642 : vector<8x16xf32>
    %646 = arith.addf %631, %645 : vector<8x16xf32>
    %647 = vector.extract_strided_slice %514 {offsets = [0, 9], sizes = [8, 1], strides = [1, 1]} : vector<8x32xf32> to vector<8x1xf32>
    %648 = vector.extract_strided_slice %515 {offsets = [9, 0], sizes = [1, 16], strides = [1, 1]} : vector<32x16xf32> to vector<1x16xf32>
    %649 = vector.broadcast %647 : vector<8x1xf32> to vector<8x16xf32>
    %650 = vector.broadcast %648 : vector<1x16xf32> to vector<8x16xf32>
    %651 = arith.addf %649, %650 : vector<8x16xf32>
    %cst_142 = arith.constant 0.000000e+00 : f32
    %652 = vector.broadcast %cst_142 : f32 to vector<8x16xf32>
    %653 = arith.cmpf oge, %651, %652 : vector<8x16xf32>
    %cst_143 = arith.constant 2.000000e-01 : f32
    %654 = vector.broadcast %cst_143 : f32 to vector<8x16xf32>
    %655 = arith.mulf %654, %651 : vector<8x16xf32>
    %656 = arith.select %653, %651, %655 : vector<8x16xi1>, vector<8x16xf32>
    %c9_144 = arith.constant 9 : index
    %657 = memref.load %arg15[%c9_144] : memref<32xf32, #tpu.memory_space<smem>>
    %658 = vector.broadcast %657 : f32 to vector<8x16xf32>
    %659 = arith.mulf %658, %656 : vector<8x16xf32>
    %660 = arith.addf %632, %659 : vector<8x16xf32>
    %661 = vector.extract_strided_slice %514 {offsets = [0, 10], sizes = [8, 1], strides = [1, 1]} : vector<8x32xf32> to vector<8x1xf32>
    %662 = vector.extract_strided_slice %515 {offsets = [10, 0], sizes = [1, 16], strides = [1, 1]} : vector<32x16xf32> to vector<1x16xf32>
    %663 = vector.broadcast %661 : vector<8x1xf32> to vector<8x16xf32>
    %664 = vector.broadcast %662 : vector<1x16xf32> to vector<8x16xf32>
    %665 = arith.addf %663, %664 : vector<8x16xf32>
    %cst_145 = arith.constant 0.000000e+00 : f32
    %666 = vector.broadcast %cst_145 : f32 to vector<8x16xf32>
    %667 = arith.cmpf oge, %665, %666 : vector<8x16xf32>
    %cst_146 = arith.constant 2.000000e-01 : f32
    %668 = vector.broadcast %cst_146 : f32 to vector<8x16xf32>
    %669 = arith.mulf %668, %665 : vector<8x16xf32>
    %670 = arith.select %667, %665, %669 : vector<8x16xi1>, vector<8x16xf32>
    %c10_147 = arith.constant 10 : index
    %671 = memref.load %arg15[%c10_147] : memref<32xf32, #tpu.memory_space<smem>>
    %672 = vector.broadcast %671 : f32 to vector<8x16xf32>
    %673 = arith.mulf %672, %670 : vector<8x16xf32>
    %674 = arith.addf %646, %673 : vector<8x16xf32>
    %675 = vector.extract_strided_slice %514 {offsets = [0, 11], sizes = [8, 1], strides = [1, 1]} : vector<8x32xf32> to vector<8x1xf32>
    %676 = vector.extract_strided_slice %515 {offsets = [11, 0], sizes = [1, 16], strides = [1, 1]} : vector<32x16xf32> to vector<1x16xf32>
    %677 = vector.broadcast %675 : vector<8x1xf32> to vector<8x16xf32>
    %678 = vector.broadcast %676 : vector<1x16xf32> to vector<8x16xf32>
    %679 = arith.addf %677, %678 : vector<8x16xf32>
    %cst_148 = arith.constant 0.000000e+00 : f32
    %680 = vector.broadcast %cst_148 : f32 to vector<8x16xf32>
    %681 = arith.cmpf oge, %679, %680 : vector<8x16xf32>
    %cst_149 = arith.constant 2.000000e-01 : f32
    %682 = vector.broadcast %cst_149 : f32 to vector<8x16xf32>
    %683 = arith.mulf %682, %679 : vector<8x16xf32>
    %684 = arith.select %681, %679, %683 : vector<8x16xi1>, vector<8x16xf32>
    %c11_150 = arith.constant 11 : index
    %685 = memref.load %arg15[%c11_150] : memref<32xf32, #tpu.memory_space<smem>>
    %686 = vector.broadcast %685 : f32 to vector<8x16xf32>
    %687 = arith.mulf %686, %684 : vector<8x16xf32>
    %688 = arith.addf %660, %687 : vector<8x16xf32>
    %689 = vector.extract_strided_slice %514 {offsets = [0, 12], sizes = [8, 1], strides = [1, 1]} : vector<8x32xf32> to vector<8x1xf32>
    %690 = vector.extract_strided_slice %515 {offsets = [12, 0], sizes = [1, 16], strides = [1, 1]} : vector<32x16xf32> to vector<1x16xf32>
    %691 = vector.broadcast %689 : vector<8x1xf32> to vector<8x16xf32>
    %692 = vector.broadcast %690 : vector<1x16xf32> to vector<8x16xf32>
    %693 = arith.addf %691, %692 : vector<8x16xf32>
    %cst_151 = arith.constant 0.000000e+00 : f32
    %694 = vector.broadcast %cst_151 : f32 to vector<8x16xf32>
    %695 = arith.cmpf oge, %693, %694 : vector<8x16xf32>
    %cst_152 = arith.constant 2.000000e-01 : f32
    %696 = vector.broadcast %cst_152 : f32 to vector<8x16xf32>
    %697 = arith.mulf %696, %693 : vector<8x16xf32>
    %698 = arith.select %695, %693, %697 : vector<8x16xi1>, vector<8x16xf32>
    %c12_153 = arith.constant 12 : index
    %699 = memref.load %arg15[%c12_153] : memref<32xf32, #tpu.memory_space<smem>>
    %700 = vector.broadcast %699 : f32 to vector<8x16xf32>
    %701 = arith.mulf %700, %698 : vector<8x16xf32>
    %702 = arith.addf %674, %701 : vector<8x16xf32>
    %703 = vector.extract_strided_slice %514 {offsets = [0, 13], sizes = [8, 1], strides = [1, 1]} : vector<8x32xf32> to vector<8x1xf32>
    %704 = vector.extract_strided_slice %515 {offsets = [13, 0], sizes = [1, 16], strides = [1, 1]} : vector<32x16xf32> to vector<1x16xf32>
    %705 = vector.broadcast %703 : vector<8x1xf32> to vector<8x16xf32>
    %706 = vector.broadcast %704 : vector<1x16xf32> to vector<8x16xf32>
    %707 = arith.addf %705, %706 : vector<8x16xf32>
    %cst_154 = arith.constant 0.000000e+00 : f32
    %708 = vector.broadcast %cst_154 : f32 to vector<8x16xf32>
    %709 = arith.cmpf oge, %707, %708 : vector<8x16xf32>
    %cst_155 = arith.constant 2.000000e-01 : f32
    %710 = vector.broadcast %cst_155 : f32 to vector<8x16xf32>
    %711 = arith.mulf %710, %707 : vector<8x16xf32>
    %712 = arith.select %709, %707, %711 : vector<8x16xi1>, vector<8x16xf32>
    %c13_156 = arith.constant 13 : index
    %713 = memref.load %arg15[%c13_156] : memref<32xf32, #tpu.memory_space<smem>>
    %714 = vector.broadcast %713 : f32 to vector<8x16xf32>
    %715 = arith.mulf %714, %712 : vector<8x16xf32>
    %716 = arith.addf %688, %715 : vector<8x16xf32>
    %717 = vector.extract_strided_slice %514 {offsets = [0, 14], sizes = [8, 1], strides = [1, 1]} : vector<8x32xf32> to vector<8x1xf32>
    %718 = vector.extract_strided_slice %515 {offsets = [14, 0], sizes = [1, 16], strides = [1, 1]} : vector<32x16xf32> to vector<1x16xf32>
    %719 = vector.broadcast %717 : vector<8x1xf32> to vector<8x16xf32>
    %720 = vector.broadcast %718 : vector<1x16xf32> to vector<8x16xf32>
    %721 = arith.addf %719, %720 : vector<8x16xf32>
    %cst_157 = arith.constant 0.000000e+00 : f32
    %722 = vector.broadcast %cst_157 : f32 to vector<8x16xf32>
    %723 = arith.cmpf oge, %721, %722 : vector<8x16xf32>
    %cst_158 = arith.constant 2.000000e-01 : f32
    %724 = vector.broadcast %cst_158 : f32 to vector<8x16xf32>
    %725 = arith.mulf %724, %721 : vector<8x16xf32>
    %726 = arith.select %723, %721, %725 : vector<8x16xi1>, vector<8x16xf32>
    %c14_159 = arith.constant 14 : index
    %727 = memref.load %arg15[%c14_159] : memref<32xf32, #tpu.memory_space<smem>>
    %728 = vector.broadcast %727 : f32 to vector<8x16xf32>
    %729 = arith.mulf %728, %726 : vector<8x16xf32>
    %730 = arith.addf %702, %729 : vector<8x16xf32>
    %731 = vector.extract_strided_slice %514 {offsets = [0, 15], sizes = [8, 1], strides = [1, 1]} : vector<8x32xf32> to vector<8x1xf32>
    %732 = vector.extract_strided_slice %515 {offsets = [15, 0], sizes = [1, 16], strides = [1, 1]} : vector<32x16xf32> to vector<1x16xf32>
    %733 = vector.broadcast %731 : vector<8x1xf32> to vector<8x16xf32>
    %734 = vector.broadcast %732 : vector<1x16xf32> to vector<8x16xf32>
    %735 = arith.addf %733, %734 : vector<8x16xf32>
    %cst_160 = arith.constant 0.000000e+00 : f32
    %736 = vector.broadcast %cst_160 : f32 to vector<8x16xf32>
    %737 = arith.cmpf oge, %735, %736 : vector<8x16xf32>
    %cst_161 = arith.constant 2.000000e-01 : f32
    %738 = vector.broadcast %cst_161 : f32 to vector<8x16xf32>
    %739 = arith.mulf %738, %735 : vector<8x16xf32>
    %740 = arith.select %737, %735, %739 : vector<8x16xi1>, vector<8x16xf32>
    %c15_162 = arith.constant 15 : index
    %741 = memref.load %arg15[%c15_162] : memref<32xf32, #tpu.memory_space<smem>>
    %742 = vector.broadcast %741 : f32 to vector<8x16xf32>
    %743 = arith.mulf %742, %740 : vector<8x16xf32>
    %744 = arith.addf %716, %743 : vector<8x16xf32>
    %745 = arith.addf %730, %744 : vector<8x16xf32>
    %cst_163 = arith.constant 0.000000e+00 : f32
    %746 = vector.broadcast %cst_163 : f32 to vector<8x16xf32>
    %cst_164 = arith.constant 0.000000e+00 : f32
    %747 = vector.broadcast %cst_164 : f32 to vector<8x16xf32>
    %748 = vector.extract_strided_slice %514 {offsets = [0, 16], sizes = [8, 1], strides = [1, 1]} : vector<8x32xf32> to vector<8x1xf32>
    %749 = vector.extract_strided_slice %515 {offsets = [16, 0], sizes = [1, 16], strides = [1, 1]} : vector<32x16xf32> to vector<1x16xf32>
    %750 = vector.broadcast %748 : vector<8x1xf32> to vector<8x16xf32>
    %751 = vector.broadcast %749 : vector<1x16xf32> to vector<8x16xf32>
    %752 = arith.addf %750, %751 : vector<8x16xf32>
    %cst_165 = arith.constant 0.000000e+00 : f32
    %753 = vector.broadcast %cst_165 : f32 to vector<8x16xf32>
    %754 = arith.cmpf oge, %752, %753 : vector<8x16xf32>
    %cst_166 = arith.constant 2.000000e-01 : f32
    %755 = vector.broadcast %cst_166 : f32 to vector<8x16xf32>
    %756 = arith.mulf %755, %752 : vector<8x16xf32>
    %757 = arith.select %754, %752, %756 : vector<8x16xi1>, vector<8x16xf32>
    %c16_167 = arith.constant 16 : index
    %758 = memref.load %arg15[%c16_167] : memref<32xf32, #tpu.memory_space<smem>>
    %759 = vector.broadcast %758 : f32 to vector<8x16xf32>
    %760 = arith.mulf %759, %757 : vector<8x16xf32>
    %761 = arith.addf %746, %760 : vector<8x16xf32>
    %762 = vector.extract_strided_slice %514 {offsets = [0, 17], sizes = [8, 1], strides = [1, 1]} : vector<8x32xf32> to vector<8x1xf32>
    %763 = vector.extract_strided_slice %515 {offsets = [17, 0], sizes = [1, 16], strides = [1, 1]} : vector<32x16xf32> to vector<1x16xf32>
    %764 = vector.broadcast %762 : vector<8x1xf32> to vector<8x16xf32>
    %765 = vector.broadcast %763 : vector<1x16xf32> to vector<8x16xf32>
    %766 = arith.addf %764, %765 : vector<8x16xf32>
    %cst_168 = arith.constant 0.000000e+00 : f32
    %767 = vector.broadcast %cst_168 : f32 to vector<8x16xf32>
    %768 = arith.cmpf oge, %766, %767 : vector<8x16xf32>
    %cst_169 = arith.constant 2.000000e-01 : f32
    %769 = vector.broadcast %cst_169 : f32 to vector<8x16xf32>
    %770 = arith.mulf %769, %766 : vector<8x16xf32>
    %771 = arith.select %768, %766, %770 : vector<8x16xi1>, vector<8x16xf32>
    %c17_170 = arith.constant 17 : index
    %772 = memref.load %arg15[%c17_170] : memref<32xf32, #tpu.memory_space<smem>>
    %773 = vector.broadcast %772 : f32 to vector<8x16xf32>
    %774 = arith.mulf %773, %771 : vector<8x16xf32>
    %775 = arith.addf %747, %774 : vector<8x16xf32>
    %776 = vector.extract_strided_slice %514 {offsets = [0, 18], sizes = [8, 1], strides = [1, 1]} : vector<8x32xf32> to vector<8x1xf32>
    %777 = vector.extract_strided_slice %515 {offsets = [18, 0], sizes = [1, 16], strides = [1, 1]} : vector<32x16xf32> to vector<1x16xf32>
    %778 = vector.broadcast %776 : vector<8x1xf32> to vector<8x16xf32>
    %779 = vector.broadcast %777 : vector<1x16xf32> to vector<8x16xf32>
    %780 = arith.addf %778, %779 : vector<8x16xf32>
    %cst_171 = arith.constant 0.000000e+00 : f32
    %781 = vector.broadcast %cst_171 : f32 to vector<8x16xf32>
    %782 = arith.cmpf oge, %780, %781 : vector<8x16xf32>
    %cst_172 = arith.constant 2.000000e-01 : f32
    %783 = vector.broadcast %cst_172 : f32 to vector<8x16xf32>
    %784 = arith.mulf %783, %780 : vector<8x16xf32>
    %785 = arith.select %782, %780, %784 : vector<8x16xi1>, vector<8x16xf32>
    %c18_173 = arith.constant 18 : index
    %786 = memref.load %arg15[%c18_173] : memref<32xf32, #tpu.memory_space<smem>>
    %787 = vector.broadcast %786 : f32 to vector<8x16xf32>
    %788 = arith.mulf %787, %785 : vector<8x16xf32>
    %789 = arith.addf %761, %788 : vector<8x16xf32>
    %790 = vector.extract_strided_slice %514 {offsets = [0, 19], sizes = [8, 1], strides = [1, 1]} : vector<8x32xf32> to vector<8x1xf32>
    %791 = vector.extract_strided_slice %515 {offsets = [19, 0], sizes = [1, 16], strides = [1, 1]} : vector<32x16xf32> to vector<1x16xf32>
    %792 = vector.broadcast %790 : vector<8x1xf32> to vector<8x16xf32>
    %793 = vector.broadcast %791 : vector<1x16xf32> to vector<8x16xf32>
    %794 = arith.addf %792, %793 : vector<8x16xf32>
    %cst_174 = arith.constant 0.000000e+00 : f32
    %795 = vector.broadcast %cst_174 : f32 to vector<8x16xf32>
    %796 = arith.cmpf oge, %794, %795 : vector<8x16xf32>
    %cst_175 = arith.constant 2.000000e-01 : f32
    %797 = vector.broadcast %cst_175 : f32 to vector<8x16xf32>
    %798 = arith.mulf %797, %794 : vector<8x16xf32>
    %799 = arith.select %796, %794, %798 : vector<8x16xi1>, vector<8x16xf32>
    %c19_176 = arith.constant 19 : index
    %800 = memref.load %arg15[%c19_176] : memref<32xf32, #tpu.memory_space<smem>>
    %801 = vector.broadcast %800 : f32 to vector<8x16xf32>
    %802 = arith.mulf %801, %799 : vector<8x16xf32>
    %803 = arith.addf %775, %802 : vector<8x16xf32>
    %804 = vector.extract_strided_slice %514 {offsets = [0, 20], sizes = [8, 1], strides = [1, 1]} : vector<8x32xf32> to vector<8x1xf32>
    %805 = vector.extract_strided_slice %515 {offsets = [20, 0], sizes = [1, 16], strides = [1, 1]} : vector<32x16xf32> to vector<1x16xf32>
    %806 = vector.broadcast %804 : vector<8x1xf32> to vector<8x16xf32>
    %807 = vector.broadcast %805 : vector<1x16xf32> to vector<8x16xf32>
    %808 = arith.addf %806, %807 : vector<8x16xf32>
    %cst_177 = arith.constant 0.000000e+00 : f32
    %809 = vector.broadcast %cst_177 : f32 to vector<8x16xf32>
    %810 = arith.cmpf oge, %808, %809 : vector<8x16xf32>
    %cst_178 = arith.constant 2.000000e-01 : f32
    %811 = vector.broadcast %cst_178 : f32 to vector<8x16xf32>
    %812 = arith.mulf %811, %808 : vector<8x16xf32>
    %813 = arith.select %810, %808, %812 : vector<8x16xi1>, vector<8x16xf32>
    %c20_179 = arith.constant 20 : index
    %814 = memref.load %arg15[%c20_179] : memref<32xf32, #tpu.memory_space<smem>>
    %815 = vector.broadcast %814 : f32 to vector<8x16xf32>
    %816 = arith.mulf %815, %813 : vector<8x16xf32>
    %817 = arith.addf %789, %816 : vector<8x16xf32>
    %818 = vector.extract_strided_slice %514 {offsets = [0, 21], sizes = [8, 1], strides = [1, 1]} : vector<8x32xf32> to vector<8x1xf32>
    %819 = vector.extract_strided_slice %515 {offsets = [21, 0], sizes = [1, 16], strides = [1, 1]} : vector<32x16xf32> to vector<1x16xf32>
    %820 = vector.broadcast %818 : vector<8x1xf32> to vector<8x16xf32>
    %821 = vector.broadcast %819 : vector<1x16xf32> to vector<8x16xf32>
    %822 = arith.addf %820, %821 : vector<8x16xf32>
    %cst_180 = arith.constant 0.000000e+00 : f32
    %823 = vector.broadcast %cst_180 : f32 to vector<8x16xf32>
    %824 = arith.cmpf oge, %822, %823 : vector<8x16xf32>
    %cst_181 = arith.constant 2.000000e-01 : f32
    %825 = vector.broadcast %cst_181 : f32 to vector<8x16xf32>
    %826 = arith.mulf %825, %822 : vector<8x16xf32>
    %827 = arith.select %824, %822, %826 : vector<8x16xi1>, vector<8x16xf32>
    %c21_182 = arith.constant 21 : index
    %828 = memref.load %arg15[%c21_182] : memref<32xf32, #tpu.memory_space<smem>>
    %829 = vector.broadcast %828 : f32 to vector<8x16xf32>
    %830 = arith.mulf %829, %827 : vector<8x16xf32>
    %831 = arith.addf %803, %830 : vector<8x16xf32>
    %832 = vector.extract_strided_slice %514 {offsets = [0, 22], sizes = [8, 1], strides = [1, 1]} : vector<8x32xf32> to vector<8x1xf32>
    %833 = vector.extract_strided_slice %515 {offsets = [22, 0], sizes = [1, 16], strides = [1, 1]} : vector<32x16xf32> to vector<1x16xf32>
    %834 = vector.broadcast %832 : vector<8x1xf32> to vector<8x16xf32>
    %835 = vector.broadcast %833 : vector<1x16xf32> to vector<8x16xf32>
    %836 = arith.addf %834, %835 : vector<8x16xf32>
    %cst_183 = arith.constant 0.000000e+00 : f32
    %837 = vector.broadcast %cst_183 : f32 to vector<8x16xf32>
    %838 = arith.cmpf oge, %836, %837 : vector<8x16xf32>
    %cst_184 = arith.constant 2.000000e-01 : f32
    %839 = vector.broadcast %cst_184 : f32 to vector<8x16xf32>
    %840 = arith.mulf %839, %836 : vector<8x16xf32>
    %841 = arith.select %838, %836, %840 : vector<8x16xi1>, vector<8x16xf32>
    %c22_185 = arith.constant 22 : index
    %842 = memref.load %arg15[%c22_185] : memref<32xf32, #tpu.memory_space<smem>>
    %843 = vector.broadcast %842 : f32 to vector<8x16xf32>
    %844 = arith.mulf %843, %841 : vector<8x16xf32>
    %845 = arith.addf %817, %844 : vector<8x16xf32>
    %846 = vector.extract_strided_slice %514 {offsets = [0, 23], sizes = [8, 1], strides = [1, 1]} : vector<8x32xf32> to vector<8x1xf32>
    %847 = vector.extract_strided_slice %515 {offsets = [23, 0], sizes = [1, 16], strides = [1, 1]} : vector<32x16xf32> to vector<1x16xf32>
    %848 = vector.broadcast %846 : vector<8x1xf32> to vector<8x16xf32>
    %849 = vector.broadcast %847 : vector<1x16xf32> to vector<8x16xf32>
    %850 = arith.addf %848, %849 : vector<8x16xf32>
    %cst_186 = arith.constant 0.000000e+00 : f32
    %851 = vector.broadcast %cst_186 : f32 to vector<8x16xf32>
    %852 = arith.cmpf oge, %850, %851 : vector<8x16xf32>
    %cst_187 = arith.constant 2.000000e-01 : f32
    %853 = vector.broadcast %cst_187 : f32 to vector<8x16xf32>
    %854 = arith.mulf %853, %850 : vector<8x16xf32>
    %855 = arith.select %852, %850, %854 : vector<8x16xi1>, vector<8x16xf32>
    %c23_188 = arith.constant 23 : index
    %856 = memref.load %arg15[%c23_188] : memref<32xf32, #tpu.memory_space<smem>>
    %857 = vector.broadcast %856 : f32 to vector<8x16xf32>
    %858 = arith.mulf %857, %855 : vector<8x16xf32>
    %859 = arith.addf %831, %858 : vector<8x16xf32>
    %860 = arith.addf %845, %859 : vector<8x16xf32>
    %cst_189 = arith.constant 0.000000e+00 : f32
    %861 = vector.broadcast %cst_189 : f32 to vector<8x16xf32>
    %cst_190 = arith.constant 0.000000e+00 : f32
    %862 = vector.broadcast %cst_190 : f32 to vector<8x16xf32>
    %863 = vector.extract_strided_slice %514 {offsets = [0, 24], sizes = [8, 1], strides = [1, 1]} : vector<8x32xf32> to vector<8x1xf32>
    %864 = vector.extract_strided_slice %515 {offsets = [24, 0], sizes = [1, 16], strides = [1, 1]} : vector<32x16xf32> to vector<1x16xf32>
    %865 = vector.broadcast %863 : vector<8x1xf32> to vector<8x16xf32>
    %866 = vector.broadcast %864 : vector<1x16xf32> to vector<8x16xf32>
    %867 = arith.addf %865, %866 : vector<8x16xf32>
    %cst_191 = arith.constant 0.000000e+00 : f32
    %868 = vector.broadcast %cst_191 : f32 to vector<8x16xf32>
    %869 = arith.cmpf oge, %867, %868 : vector<8x16xf32>
    %cst_192 = arith.constant 2.000000e-01 : f32
    %870 = vector.broadcast %cst_192 : f32 to vector<8x16xf32>
    %871 = arith.mulf %870, %867 : vector<8x16xf32>
    %872 = arith.select %869, %867, %871 : vector<8x16xi1>, vector<8x16xf32>
    %c24_193 = arith.constant 24 : index
    %873 = memref.load %arg15[%c24_193] : memref<32xf32, #tpu.memory_space<smem>>
    %874 = vector.broadcast %873 : f32 to vector<8x16xf32>
    %875 = arith.mulf %874, %872 : vector<8x16xf32>
    %876 = arith.addf %861, %875 : vector<8x16xf32>
    %877 = vector.extract_strided_slice %514 {offsets = [0, 25], sizes = [8, 1], strides = [1, 1]} : vector<8x32xf32> to vector<8x1xf32>
    %878 = vector.extract_strided_slice %515 {offsets = [25, 0], sizes = [1, 16], strides = [1, 1]} : vector<32x16xf32> to vector<1x16xf32>
    %879 = vector.broadcast %877 : vector<8x1xf32> to vector<8x16xf32>
    %880 = vector.broadcast %878 : vector<1x16xf32> to vector<8x16xf32>
    %881 = arith.addf %879, %880 : vector<8x16xf32>
    %cst_194 = arith.constant 0.000000e+00 : f32
    %882 = vector.broadcast %cst_194 : f32 to vector<8x16xf32>
    %883 = arith.cmpf oge, %881, %882 : vector<8x16xf32>
    %cst_195 = arith.constant 2.000000e-01 : f32
    %884 = vector.broadcast %cst_195 : f32 to vector<8x16xf32>
    %885 = arith.mulf %884, %881 : vector<8x16xf32>
    %886 = arith.select %883, %881, %885 : vector<8x16xi1>, vector<8x16xf32>
    %c25_196 = arith.constant 25 : index
    %887 = memref.load %arg15[%c25_196] : memref<32xf32, #tpu.memory_space<smem>>
    %888 = vector.broadcast %887 : f32 to vector<8x16xf32>
    %889 = arith.mulf %888, %886 : vector<8x16xf32>
    %890 = arith.addf %862, %889 : vector<8x16xf32>
    %891 = vector.extract_strided_slice %514 {offsets = [0, 26], sizes = [8, 1], strides = [1, 1]} : vector<8x32xf32> to vector<8x1xf32>
    %892 = vector.extract_strided_slice %515 {offsets = [26, 0], sizes = [1, 16], strides = [1, 1]} : vector<32x16xf32> to vector<1x16xf32>
    %893 = vector.broadcast %891 : vector<8x1xf32> to vector<8x16xf32>
    %894 = vector.broadcast %892 : vector<1x16xf32> to vector<8x16xf32>
    %895 = arith.addf %893, %894 : vector<8x16xf32>
    %cst_197 = arith.constant 0.000000e+00 : f32
    %896 = vector.broadcast %cst_197 : f32 to vector<8x16xf32>
    %897 = arith.cmpf oge, %895, %896 : vector<8x16xf32>
    %cst_198 = arith.constant 2.000000e-01 : f32
    %898 = vector.broadcast %cst_198 : f32 to vector<8x16xf32>
    %899 = arith.mulf %898, %895 : vector<8x16xf32>
    %900 = arith.select %897, %895, %899 : vector<8x16xi1>, vector<8x16xf32>
    %c26_199 = arith.constant 26 : index
    %901 = memref.load %arg15[%c26_199] : memref<32xf32, #tpu.memory_space<smem>>
    %902 = vector.broadcast %901 : f32 to vector<8x16xf32>
    %903 = arith.mulf %902, %900 : vector<8x16xf32>
    %904 = arith.addf %876, %903 : vector<8x16xf32>
    %905 = vector.extract_strided_slice %514 {offsets = [0, 27], sizes = [8, 1], strides = [1, 1]} : vector<8x32xf32> to vector<8x1xf32>
    %906 = vector.extract_strided_slice %515 {offsets = [27, 0], sizes = [1, 16], strides = [1, 1]} : vector<32x16xf32> to vector<1x16xf32>
    %907 = vector.broadcast %905 : vector<8x1xf32> to vector<8x16xf32>
    %908 = vector.broadcast %906 : vector<1x16xf32> to vector<8x16xf32>
    %909 = arith.addf %907, %908 : vector<8x16xf32>
    %cst_200 = arith.constant 0.000000e+00 : f32
    %910 = vector.broadcast %cst_200 : f32 to vector<8x16xf32>
    %911 = arith.cmpf oge, %909, %910 : vector<8x16xf32>
    %cst_201 = arith.constant 2.000000e-01 : f32
    %912 = vector.broadcast %cst_201 : f32 to vector<8x16xf32>
    %913 = arith.mulf %912, %909 : vector<8x16xf32>
    %914 = arith.select %911, %909, %913 : vector<8x16xi1>, vector<8x16xf32>
    %c27_202 = arith.constant 27 : index
    %915 = memref.load %arg15[%c27_202] : memref<32xf32, #tpu.memory_space<smem>>
    %916 = vector.broadcast %915 : f32 to vector<8x16xf32>
    %917 = arith.mulf %916, %914 : vector<8x16xf32>
    %918 = arith.addf %890, %917 : vector<8x16xf32>
    %919 = vector.extract_strided_slice %514 {offsets = [0, 28], sizes = [8, 1], strides = [1, 1]} : vector<8x32xf32> to vector<8x1xf32>
    %920 = vector.extract_strided_slice %515 {offsets = [28, 0], sizes = [1, 16], strides = [1, 1]} : vector<32x16xf32> to vector<1x16xf32>
    %921 = vector.broadcast %919 : vector<8x1xf32> to vector<8x16xf32>
    %922 = vector.broadcast %920 : vector<1x16xf32> to vector<8x16xf32>
    %923 = arith.addf %921, %922 : vector<8x16xf32>
    %cst_203 = arith.constant 0.000000e+00 : f32
    %924 = vector.broadcast %cst_203 : f32 to vector<8x16xf32>
    %925 = arith.cmpf oge, %923, %924 : vector<8x16xf32>
    %cst_204 = arith.constant 2.000000e-01 : f32
    %926 = vector.broadcast %cst_204 : f32 to vector<8x16xf32>
    %927 = arith.mulf %926, %923 : vector<8x16xf32>
    %928 = arith.select %925, %923, %927 : vector<8x16xi1>, vector<8x16xf32>
    %c28_205 = arith.constant 28 : index
    %929 = memref.load %arg15[%c28_205] : memref<32xf32, #tpu.memory_space<smem>>
    %930 = vector.broadcast %929 : f32 to vector<8x16xf32>
    %931 = arith.mulf %930, %928 : vector<8x16xf32>
    %932 = arith.addf %904, %931 : vector<8x16xf32>
    %933 = vector.extract_strided_slice %514 {offsets = [0, 29], sizes = [8, 1], strides = [1, 1]} : vector<8x32xf32> to vector<8x1xf32>
    %934 = vector.extract_strided_slice %515 {offsets = [29, 0], sizes = [1, 16], strides = [1, 1]} : vector<32x16xf32> to vector<1x16xf32>
    %935 = vector.broadcast %933 : vector<8x1xf32> to vector<8x16xf32>
    %936 = vector.broadcast %934 : vector<1x16xf32> to vector<8x16xf32>
    %937 = arith.addf %935, %936 : vector<8x16xf32>
    %cst_206 = arith.constant 0.000000e+00 : f32
    %938 = vector.broadcast %cst_206 : f32 to vector<8x16xf32>
    %939 = arith.cmpf oge, %937, %938 : vector<8x16xf32>
    %cst_207 = arith.constant 2.000000e-01 : f32
    %940 = vector.broadcast %cst_207 : f32 to vector<8x16xf32>
    %941 = arith.mulf %940, %937 : vector<8x16xf32>
    %942 = arith.select %939, %937, %941 : vector<8x16xi1>, vector<8x16xf32>
    %c29_208 = arith.constant 29 : index
    %943 = memref.load %arg15[%c29_208] : memref<32xf32, #tpu.memory_space<smem>>
    %944 = vector.broadcast %943 : f32 to vector<8x16xf32>
    %945 = arith.mulf %944, %942 : vector<8x16xf32>
    %946 = arith.addf %918, %945 : vector<8x16xf32>
    %947 = vector.extract_strided_slice %514 {offsets = [0, 30], sizes = [8, 1], strides = [1, 1]} : vector<8x32xf32> to vector<8x1xf32>
    %948 = vector.extract_strided_slice %515 {offsets = [30, 0], sizes = [1, 16], strides = [1, 1]} : vector<32x16xf32> to vector<1x16xf32>
    %949 = vector.broadcast %947 : vector<8x1xf32> to vector<8x16xf32>
    %950 = vector.broadcast %948 : vector<1x16xf32> to vector<8x16xf32>
    %951 = arith.addf %949, %950 : vector<8x16xf32>
    %cst_209 = arith.constant 0.000000e+00 : f32
    %952 = vector.broadcast %cst_209 : f32 to vector<8x16xf32>
    %953 = arith.cmpf oge, %951, %952 : vector<8x16xf32>
    %cst_210 = arith.constant 2.000000e-01 : f32
    %954 = vector.broadcast %cst_210 : f32 to vector<8x16xf32>
    %955 = arith.mulf %954, %951 : vector<8x16xf32>
    %956 = arith.select %953, %951, %955 : vector<8x16xi1>, vector<8x16xf32>
    %c30_211 = arith.constant 30 : index
    %957 = memref.load %arg15[%c30_211] : memref<32xf32, #tpu.memory_space<smem>>
    %958 = vector.broadcast %957 : f32 to vector<8x16xf32>
    %959 = arith.mulf %958, %956 : vector<8x16xf32>
    %960 = arith.addf %932, %959 : vector<8x16xf32>
    %961 = vector.extract_strided_slice %514 {offsets = [0, 31], sizes = [8, 1], strides = [1, 1]} : vector<8x32xf32> to vector<8x1xf32>
    %962 = vector.extract_strided_slice %515 {offsets = [31, 0], sizes = [1, 16], strides = [1, 1]} : vector<32x16xf32> to vector<1x16xf32>
    %963 = vector.broadcast %961 : vector<8x1xf32> to vector<8x16xf32>
    %964 = vector.broadcast %962 : vector<1x16xf32> to vector<8x16xf32>
    %965 = arith.addf %963, %964 : vector<8x16xf32>
    %cst_212 = arith.constant 0.000000e+00 : f32
    %966 = vector.broadcast %cst_212 : f32 to vector<8x16xf32>
    %967 = arith.cmpf oge, %965, %966 : vector<8x16xf32>
    %cst_213 = arith.constant 2.000000e-01 : f32
    %968 = vector.broadcast %cst_213 : f32 to vector<8x16xf32>
    %969 = arith.mulf %968, %965 : vector<8x16xf32>
    %970 = arith.select %967, %965, %969 : vector<8x16xi1>, vector<8x16xf32>
    %c31_214 = arith.constant 31 : index
    %971 = memref.load %arg15[%c31_214] : memref<32xf32, #tpu.memory_space<smem>>
    %972 = vector.broadcast %971 : f32 to vector<8x16xf32>
    %973 = arith.mulf %972, %970 : vector<8x16xf32>
    %974 = arith.addf %946, %973 : vector<8x16xf32>
    %975 = arith.addf %960, %974 : vector<8x16xf32>
    %976 = tpu.concatenate %630, %745, %860, %975 in 1 : vector<8x16xf32>, vector<8x16xf32>, vector<8x16xf32>, vector<8x16xf32> -> vector<8x64xf32>
    %c0_215 = arith.constant 0 : index
    %c0_216 = arith.constant 0 : index
    %977 = vector.load %arg19[%c0_215, %c0_216] : memref<8x64xf32, #tpu.memory_space<vmem>>, vector<8x64xf32>
    %978 = arith.addf %976, %977 : vector<8x64xf32>
    %cst_217 = arith.constant dense<0xFF800000> : vector<8xf32>
    %979 = vector.multi_reduction <maximumf>, %978, %cst_217 [1] : vector<8x64xf32> to vector<8xf32>
    %980 = vector.shape_cast %979 : vector<8xf32> to vector<8x1xf32>
    %981 = vector.broadcast %980 : vector<8x1xf32> to vector<8x64xf32>
    %982 = arith.subf %978, %981 : vector<8x64xf32>
    %983 = math.exp %982 : vector<8x64xf32>
    %c0_218 = arith.constant 0 : index
    %c0_219 = arith.constant 0 : index
    %984 = vector.load %arg21[%c0_218, %c0_219] : memref<64x4xf32, #tpu.memory_space<vmem>>, vector<64x4xf32>
    %cst_220 = arith.constant dense<0.000000e+00> : vector<8x4xf32>
    %985 = tpu.matmul %983, %984, %cst_220 {dimension_numbers = #tpu.dot_dimension_numbers<[1], [0], [0], [1], [0, 0, 1, 1], [], []>} : vector<8x64xf32>, vector<64x4xf32>, vector<8x4xf32> -> vector<8x4xf32>
    %c0_221 = arith.constant 0 : index
    %c0_222 = arith.constant 0 : index
    %986 = vector.load %arg20[%c0_221, %c0_222] : memref<64x32xf32, #tpu.memory_space<vmem>>, vector<64x32xf32>
    %987 = tpu.concatenate %507, %507, %507, %507 in 0 : vector<16x32xf32>, vector<16x32xf32>, vector<16x32xf32>, vector<16x32xf32> -> vector<64x32xf32>
    %988 = arith.mulf %986, %987 : vector<64x32xf32>
    %cst_223 = arith.constant dense<0.000000e+00> : vector<8x32xf32>
    %989 = tpu.matmul %983, %988, %cst_223 {dimension_numbers = #tpu.dot_dimension_numbers<[1], [0], [0], [1], [0, 0, 1, 1], [], []>} : vector<8x64xf32>, vector<64x32xf32>, vector<8x32xf32> -> vector<8x32xf32>
    %cst_224 = arith.constant dense<0.000000e+00> : vector<8x32xf32>
    %990 = tpu.matmul %985, %0, %cst_224 {dimension_numbers = #tpu.dot_dimension_numbers<[1], [0], [0], [1], [0, 0, 1, 1], [], []>} : vector<8x4xf32>, vector<4x32xf32>, vector<8x32xf32> -> vector<8x32xf32>
    %991 = tpu.reciprocal %990 {approx = true} : vector<8x32xf32> -> vector<8x32xf32>
    %992 = arith.mulf %989, %991 : vector<8x32xf32>
    %cst_225 = arith.constant dense<0.000000e+00> : vector<8x8xf32>
    %993 = tpu.matmul %992, %1, %cst_225 {dimension_numbers = #tpu.dot_dimension_numbers<[1], [0], [0], [1], [0, 0, 1, 1], [], []>} : vector<8x32xf32>, vector<32x8xf32>, vector<8x8xf32> -> vector<8x8xf32>
    %cst_226 = arith.constant 2.500000e-01 : f32
    %994 = vector.broadcast %cst_226 : f32 to vector<8x8xf32>
    %995 = arith.mulf %993, %994 : vector<8x8xf32>
    %c0_227 = arith.constant 0 : index
    %c0_228 = arith.constant 0 : index
    %996 = vector.load %arg18[%c0_227, %c0_228] : memref<1x8xf32, #tpu.memory_space<vmem>>, vector<1x8xf32>
    %997 = vector.broadcast %996 : vector<1x8xf32> to vector<8x8xf32>
    %998 = arith.addf %995, %997 : vector<8x8xf32>
    %999 = arith.addf %998, %513 : vector<8x8xf32>
    %c0_229 = arith.constant 0 : index
    %c0_230 = arith.constant 0 : index
    %1000 = vector.load %arg22[%c0_229, %c0_230] : memref<8x8xf32, #tpu.memory_space<vmem>>, vector<8x8xf32>
    tpu.vector_store %arg22[%c0_229, %c0_230], %999 {strides = array<i32>} : memref<8x8xf32, #tpu.memory_space<vmem>>, vector<8x8xf32>,
    return
  }
  func.func @transform_0(%arg0: i32) -> (i32, i32) {
    %c0_i32 = arith.constant 0 : i32
    %c0_i32_0 = arith.constant 0 : i32
    %c0_i32_1 = arith.constant 0 : i32
    return %c0_i32, %c0_i32_0 : i32, i32
  }
  func.func @transform_1(%arg0: i32) -> (i32, i32) {
    %c0_i32 = arith.constant 0 : i32
    %c0_i32_0 = arith.constant 0 : i32
    %c0_i32_1 = arith.constant 0 : i32
    return %c0_i32, %c0_i32_0 : i32, i32
  }
  func.func @transform_2(%arg0: i32) -> (i32, i32) {
    %c0_i32 = arith.constant 0 : i32
    %c0_i32_0 = arith.constant 0 : i32
    %c0_i32_1 = arith.constant 0 : i32
    return %c0_i32, %c0_i32_0 : i32, i32
  }
  func.func @transform_3(%arg0: i32) -> (i32, i32) {
    %c0_i32 = arith.constant 0 : i32
    %c0_i32_0 = arith.constant 0 : i32
    %c0_i32_1 = arith.constant 0 : i32
    return %c0_i32, %c0_i32_0 : i32, i32
  }
  func.func @transform_4(%arg0: i32) -> (i32, i32) {
    %c0_i32 = arith.constant 0 : i32
    %c0_i32_0 = arith.constant 0 : i32
    %c0_i32_1 = arith.constant 0 : i32
    return %c0_i32, %c0_i32_0 : i32, i32
  }
  func.func @transform_5(%arg0: i32) -> i32 {
    %c0_i32 = arith.constant 0 : i32
    %c0_i32_0 = arith.constant 0 : i32
    return %c0_i32 : i32
  }
  func.func @transform_6(%arg0: i32) -> (i32, i32) {
    %c0_i32 = arith.constant 0 : i32
    %c0_i32_0 = arith.constant 0 : i32
    %c0_i32_1 = arith.constant 0 : i32
    return %c0_i32, %c0_i32_0 : i32, i32
  }
  func.func @transform_7(%arg0: i32) -> (i32, i32) {
    %c0_i32 = arith.constant 0 : i32
    %c0_i32_0 = arith.constant 0 : i32
    %c0_i32_1 = arith.constant 0 : i32
    return %c0_i32, %c0_i32_0 : i32, i32
  }
  func.func @transform_8(%arg0: i32) -> (i32, i32) {
    %c0_i32 = arith.constant 0 : i32
    %c0_i32_0 = arith.constant 0 : i32
    %c0_i32_1 = arith.constant 0 : i32
    return %c0_i32, %c0_i32_0 : i32, i32
  }
  func.func @transform_9(%arg0: i32) -> (i32, i32) {
    %c0_i32 = arith.constant 0 : i32
    %c0_i32_0 = arith.constant 0 : i32
    %c0_i32_1 = arith.constant 0 : i32
    return %c0_i32, %c0_i32_0 : i32, i32
  }
  func.func @transform_10(%arg0: i32) -> (i32, i32) {
    %c0_i32 = arith.constant 0 : i32
    %c0_i32_0 = arith.constant 0 : i32
    %c0_i32_1 = arith.constant 0 : i32
    return %c0_i32, %c0_i32_0 : i32, i32
  }
  func.func @transform_11(%arg0: i32) -> (i32, i32) {
    %c0_i32 = arith.constant 0 : i32
    %c0_i32_0 = arith.constant 0 : i32
    %c0_i32_1 = arith.constant 0 : i32
    return %c0_i32, %c0_i32_0 : i32, i32
  }
  func.func @transform_12(%arg0: i32) -> (i32, i32) {
    %c0_i32 = arith.constant 0 : i32
    %c0_i32_0 = arith.constant 0 : i32
    %c0_i32_1 = arith.constant 0 : i32
    return %c0_i32, %c0_i32_0 : i32, i32
  }
  func.func @transform_13(%arg0: i32) -> (i32, i32) {
    %c0_i32 = arith.constant 0 : i32
    %c0_i32_0 = arith.constant 0 : i32
    %c0_i32_1 = arith.constant 0 : i32
    return %c0_i32, %c0_i32_0 : i32, i32
  }
  func.func @transform_14(%arg0: i32) -> i32 {
    %c0_i32 = arith.constant 0 : i32
    %c0_i32_0 = arith.constant 0 : i32
    return %c0_i32 : i32
  }
  func.func @transform_15(%arg0: i32) -> (i32, i32) {
    %c0_i32 = arith.constant 0 : i32
    %c0_i32_0 = arith.constant 0 : i32
    %c0_i32_1 = arith.constant 0 : i32
    return %c0_i32, %c0_i32_0 : i32, i32
  }
  func.func @transform_16(%arg0: i32) -> (i32, i32) {
    %c0_i32 = arith.constant 0 : i32
    %c0_i32_0 = arith.constant 0 : i32
    %c0_i32_1 = arith.constant 0 : i32
    return %c0_i32, %c0_i32_0 : i32, i32
  }
  func.func @transform_17(%arg0: i32) -> (i32, i32) {
    %c0_i32 = arith.constant 0 : i32
    %c0_i32_0 = arith.constant 0 : i32
    %c0_i32_1 = arith.constant 0 : i32
    return %c0_i32, %c0_i32_0 : i32, i32
  }
  func.func @transform_18(%arg0: i32) -> (i32, i32) {
    %c0_i32 = arith.constant 0 : i32
    %c0_i32_0 = arith.constant 0 : i32
    %c0_i32_1 = arith.constant 0 : i32
    return %c0_i32, %c0_i32_0 : i32, i32
  }
  func.func @transform_19(%arg0: i32) -> (i32, i32) {
    %c0_i32 = arith.constant 0 : i32
    %c0_i32_0 = arith.constant 0 : i32
    %c0_i32_1 = arith.constant 0 : i32
    return %c0_i32, %c0_i32_0 : i32, i32
  }
  func.func @transform_20(%arg0: i32) -> (i32, i32) {
    %c0_i32 = arith.constant 0 : i32
    %c0_i32_0 = arith.constant 0 : i32
    %c0_i32_1 = arith.constant 0 : i32
    return %c0_i32, %c0_i32_0 : i32, i32
  }
  func.func @transform_21(%arg0: i32) -> (i32, i32) {
    %c0_i32 = arith.constant 0 : i32
    %c0_i32_0 = arith.constant 0 : i32
    %c0_i32_1 = arith.constant 0 : i32
    return %c0_i32, %c0_i32_0 : i32, i32
  }
}

</mosaic_0001>

<bundles_post_ra>
// kernel: tile.14
= control target key start
LH: loop header
LB: loop body
LE: loop exit
PB: predicated region body
PF: predicated region fallthrough
CT: control target
= control target key end

     0   :  { %vm68_vm0 = vcmask 1047556   ;;  %s167_s9 = smov 48   ;;  %s168_s10 = smov 24   ;;  %vm70_vm1 = vcmask 195584   ;;  %vm89_vm2 = vcmask 785984   ;;  %vm110_vm3 = vcmask 589184   ;;  %s259_s0 = inlined_call_operand.vmem [shape: f32[16,4,24], index: 0, kind: input, shape index: {}]   ;;  %s260_s1 = inlined_call_operand.vmem [shape: f32[16,96], index: 1, kind: output, shape index: {}]  }
   0x1   :  { %v152_v0 = vld [vmem:[%s259_s0 + $0x1c] sm:$0xf]  ;;  %v153_v1 = vld [vmem:[%s259_s0 + $0x18] sm:$0xf]  ;;  %v154_v2 = vld [vmem:[%s259_s0 + $0x14] sm:$0xf] }
   0x2   :  { %39 = vst [vmem:[#allocation0 + $0x38] sm:$0xf] %v152_v0  ;;  %v155_v3 = vld [vmem:[%s259_s0 + $0x10] sm:$0xf]  ;;  %v156_v4 = vld [vmem:[%s259_s0 + $0xc] sm:$0xf] }
   0x3   :  { %43 = vst [vmem:[#allocation0 + $0x30] sm:$0xf] %v153_v1  ;;  %v157_v5 = vld [vmem:[%s259_s0 + $0x8] sm:$0xf]  ;;  %v158_v6 = vld [vmem:[%s259_s0 + $0x4] sm:$0xf] }
   0x4   :  { %47 = vst [vmem:[#allocation0 + $0x28] sm:$0xf] %v154_v2  ;;  %v64_v7 = vld [vmem:[%s259_s0] sm:$0xf]  ;;  %v144_v8 = vld [vmem:[%s259_s0 + $0x3c] sm:$0xf] }
   0x5   :  { %51 = vst [vmem:[#allocation0 + $0x20] sm:$0xf] %v155_v3  ;;  %v145_v9 = vld [vmem:[%s259_s0 + $0x38] sm:$0xf]  ;;  %v146_v10 = vld [vmem:[%s259_s0 + $0x34] sm:$0xf] }
   0x6   :  { %55 = vst [vmem:[#allocation0 + $0x18] sm:$0xf] %v156_v4  ;;  %v147_v11 = vld [vmem:[%s259_s0 + $0x30] sm:$0xf]  ;;  %v148_v12 = vld [vmem:[%s259_s0 + $0x2c] sm:$0xf] }
   0x7   :  { %59 = vst [vmem:[#allocation0 + $0x10] sm:$0xf] %v157_v5  ;;  %v149_v13 = vld [vmem:[%s259_s0 + $0x28] sm:$0xf]  ;;  %v150_v15 = vld [vmem:[%s259_s0 + $0x24] sm:$0xf] }
   0x8   :  { %63 = vst [vmem:[#allocation0 + $0x8] sm:$0xf] %v158_v6  ;;  %v151_v17 = vld [vmem:[%s259_s0 + $0x20] sm:$0xf]  ;;  %s166_s0 = smov 72   ;;  %vm131_vm4 = vcmask 392384  }
   0x9   :  { %65 = vst [vmem:[#allocation0] sm:$0xf] %v64_v7 }
   0xa   :  { %7 = vst [vmem:[#allocation0 + $0x78] sm:$0xf] %v144_v8 }
   0xb   :  { %11 = vst [vmem:[#allocation0 + $0x70] sm:$0xf] %v145_v9 }
   0xc   :  { %v84_v14 = vld [vmem:[#allocation0 + $0x3] ss:$8 sm:$0xf0]   ;;  %15 = vst [vmem:[#allocation0 + $0x68] sm:$0xf] %v146_v10 }
   0xd   :  { %v105_v16 = vld [vmem:[#allocation0 + $0x2] ss:$8 sm:$0xf0]   ;;  %19 = vst [vmem:[#allocation0 + $0x60] sm:$0xf] %v147_v11 }
   0xe   :  { %23 = vst [vmem:[#allocation0 + $0x58] sm:$0xf] %v148_v12  ;;  %v126_v18 = vld [vmem:[#allocation0 + $0x1] ss:$8 sm:$0xf0]  }
   0xf   :  { %27 = vst [vmem:[#allocation0 + $0x50] sm:$0xf] %v149_v13  ;;  %v67_v35 = vld [vmem:[#allocation0] ss:$8 sm:$0xf0]  }
  0x10   :  { %v82_v19 = vld [vmem:[#allocation0 + $0x3] ss:$8 sm:$0xf]   ;;  %v103_v20 = vld [vmem:[#allocation0 + $0x2] ss:$8 sm:$0xf]  }
  0x11   :  { %v86_v21 = vsel %vm68_vm0, %v84_v14, %v82_v19  ;;  %v107_v22 = vsel %vm68_vm0, %v105_v16, %v103_v20  ;;  %v124_v23 = vld [vmem:[#allocation0 + $0x1] ss:$8 sm:$0xf]   ;;  %31 = vst [vmem:[#allocation0 + $0x48] sm:$0xf] %v150_v15 }
  0x12   :  { %87 = vrot.lane.b32.xlu0 %v86_v21, %s166_s0  ;;  %108 = vrot.lane.b32.xlu1 %v107_v22, %s167_s9  ;;  %v128_v24 = vsel %vm68_vm0, %v126_v18, %v124_v23  ;;  %35 = vst [vmem:[#allocation0 + $0x40] sm:$0xf] %v151_v17  ;;  %v66_v34 = vld [vmem:[#allocation0] ss:$8 sm:$0xf]  }
  0x13   :  { %129 = vrot.lane.b32.xlu2 %v128_v24, %s168_s10  ;;  %v69_v36 = vsel %vm68_vm0, %v67_v35, %v66_v34 }
  0x14   :  { %v94_v25 = vld [vmem:[#allocation0 + $0x43] ss:$8 sm:$0xf0]   ;;  %v115_v26 = vld [vmem:[#allocation0 + $0x42] ss:$8 sm:$0xf0]  }
  0x15   :  { %v136_v27 = vld [vmem:[#allocation0 + $0x41] ss:$8 sm:$0xf0]   ;;  %71 = vst.msk [vmem:[%s260_s1] sm:$0xff] %vm70_vm1, %v69_v36  }
  0x16   :  { %v75_v38 = vld [vmem:[#allocation0 + $0x40] ss:$8 sm:$0xf0]  }
  0x19   :  { %v92_v28 = vld [vmem:[#allocation0 + $0x43] ss:$8 sm:$0xf]   ;;  %v113_v29 = vld [vmem:[#allocation0 + $0x42] ss:$8 sm:$0xf]  }
  0x1a   :  { %v96_v30 = vsel %vm68_vm0, %v94_v25, %v92_v28  ;;  %v117_v31 = vsel %vm68_vm0, %v115_v26, %v113_v29  ;;  %v134_v32 = vld [vmem:[#allocation0 + $0x41] ss:$8 sm:$0xf]   ;;  %v73_v37 = vld [vmem:[#allocation0 + $0x40] ss:$8 sm:$0xf]  }
  0x1b   :  { %97 = vrot.lane.b32.xlu0 %v96_v30, %s166_s0  ;;  %118 = vrot.lane.b32.xlu1 %v117_v31, %s167_s9  ;;  %v138_v33 = vsel %vm68_vm0, %v136_v27, %v134_v32  ;;  %v77_v40 = vsel %vm68_vm0, %v75_v38, %v73_v37 }
  0x1c   :  { %139 = vrot.lane.b32.xlu2 %v138_v33, %s168_s10  ;;  %159 = vst.msk [vmem:[%s260_s1 + $0x8] sm:$0xff] %vm70_vm1, %v77_v40  }
  0x6d   :  { %v130_v39 = vpop.permute.xlu2 %129  }
  0x76   :  { %v140_v41 = vpop.permute.xlu2 %139  }
  0x84   :  { %v88_v42 = vpop.permute.xlu0 %87   ;;  %v109_v43 = vpop.permute.xlu1 %108  }
  0x85   :  { %90 = vst.msk [vmem:[%s260_s1] sm:$0xff] %vm89_vm2, %v88_v42  }
  0x86   :  { %111 = vst.msk [vmem:[%s260_s1] sm:$0xff] %vm110_vm3, %v109_v43  }
  0x87   :  { %132 = vst.msk [vmem:[%s260_s1] sm:$0xff] %vm131_vm4, %v130_v39  }
  0x8d   :  { %v98_v44 = vpop.permute.xlu0 %97   ;;  %v119_v45 = vpop.permute.xlu1 %118  }
  0x8e   :  { %160 = vst.msk [vmem:[%s260_s1 + $0x8] sm:$0xff] %vm89_vm2, %v98_v44  }
  0x8f   :  { %161 = vst.msk [vmem:[%s260_s1 + $0x8] sm:$0xff] %vm110_vm3, %v119_v45  }
  0x90   :  { %162 = vst.msk [vmem:[%s260_s1 + $0x8] sm:$0xff] %vm131_vm4, %v140_v41  }

// kernel: tile.19
= control target key start
LH: loop header
LB: loop body
LE: loop exit
PB: predicated region body
PF: predicated region fallthrough
CT: control target
= control target key end

     0   :  { %vm36_vm0 = vcmask 1047556   ;;  %s81_s22 = smov 16   ;;  %s82_s23 = smov 32   ;;  %vm38_vm1 = vcmask 130048   ;;  %vm48_vm2 = vcmask 523648   ;;  %vm58_vm3 = vcmask 392448   ;;  %s133_s0 = inlined_call_operand.vmem [shape: f32[8,4,16], index: 0, kind: input, shape index: {}]   ;;  %s134_s1 = inlined_call_operand.vmem [shape: f32[8,64], index: 1, kind: output, shape index: {}]  }
   0x1   :  { %v70_v0 = vld [vmem:[%s133_s0 + $0x1c] sm:$0xf]  ;;  %v71_v1 = vld [vmem:[%s133_s0 + $0x18] sm:$0xf]  ;;  %v72_v2 = vld [vmem:[%s133_s0 + $0x14] sm:$0xf] }
   0x2   :  { %7 = vst [vmem:[#allocation0 + $0x38] sm:$0xf] %v70_v0  ;;  %v73_v3 = vld [vmem:[%s133_s0 + $0x10] sm:$0xf]  ;;  %v74_v4 = vld [vmem:[%s133_s0 + $0xc] sm:$0xf] }
   0x3   :  { %11 = vst [vmem:[#allocation0 + $0x30] sm:$0xf] %v71_v1  ;;  %v75_v5 = vld [vmem:[%s133_s0 + $0x8] sm:$0xf]  ;;  %v76_v6 = vld [vmem:[%s133_s0 + $0x4] sm:$0xf] }
   0x4   :  { %15 = vst [vmem:[#allocation0 + $0x28] sm:$0xf] %v72_v2  ;;  %v32_v7 = vld [vmem:[%s133_s0] sm:$0xf]  ;;  %s80_s0 = smov 48   ;;  %vm68_vm4 = vcmask 261248  }
   0x5   :  { %19 = vst [vmem:[#allocation0 + $0x20] sm:$0xf] %v73_v3 }
   0x6   :  { %23 = vst [vmem:[#allocation0 + $0x18] sm:$0xf] %v74_v4 }
   0x7   :  { %27 = vst [vmem:[#allocation0 + $0x10] sm:$0xf] %v75_v5 }
   0x8   :  { %31 = vst [vmem:[#allocation0 + $0x8] sm:$0xf] %v76_v6 }
   0x9   :  { %33 = vst [vmem:[#allocation0] sm:$0xf] %v32_v7 }
   0xc   :  { %v43_v8 = vld [vmem:[#allocation0 + $0x3] ss:$8 sm:$0xf0]   ;;  %v63_v9 = vld [vmem:[#allocation0 + $0x1] ss:$8 sm:$0xf0]  }
   0xd   :  { %v53_v15 = vld [vmem:[#allocation0 + $0x2] ss:$8 sm:$0xf0]   ;;  %v35_v18 = vld [vmem:[#allocation0] ss:$8 sm:$0xf0]  }
  0x10   :  { %v41_v10 = vld [vmem:[#allocation0 + $0x3] ss:$8 sm:$0xf]   ;;  %v61_v12 = vld [vmem:[#allocation0 + $0x1] ss:$8 sm:$0xf]  }
  0x11   :  { %v45_v11 = vsel %vm36_vm0, %v43_v8, %v41_v10  ;;  %v65_v13 = vsel %vm36_vm0, %v63_v9, %v61_v12  ;;  %v51_v14 = vld [vmem:[#allocation0 + $0x2] ss:$8 sm:$0xf]   ;;  %v34_v17 = vld [vmem:[#allocation0] ss:$8 sm:$0xf]  }
  0x12   :  { %46 = vrot.lane.b32.xlu0 %v45_v11, %s80_s0  ;;  %66 = vrot.lane.b32.xlu1 %v65_v13, %s81_s22  ;;  %v55_v16 = vsel %vm36_vm0, %v53_v15, %v51_v14  ;;  %v37_v19 = vsel %vm36_vm0, %v35_v18, %v34_v17 }
  0x13   :  { %39 = vst.msk [vmem:[%s134_s1] sm:$0xff] %vm38_vm1, %v37_v19  }
  0x1a   :  { %56 = vrot.lane.b32.xlu0 %v55_v16, %s82_s23 }
  0x84   :  { %v47_v20 = vpop.permute.xlu0 %46   ;;  %v67_v21 = vpop.permute.xlu1 %66  }
  0x85   :  { %49 = vst.msk [vmem:[%s134_s1] sm:$0xff] %vm48_vm2, %v47_v20  }
  0x8c   :  { %v57_v22 = vpop.permute.xlu0 %56  }
  0x8d   :  { %59 = vst.msk [vmem:[%s134_s1] sm:$0xff] %vm58_vm3, %v57_v22  }
  0x8e   :  { %69 = vst.msk [vmem:[%s134_s1] sm:$0xff] %vm68_vm4, %v67_v21  }

// kernel: encoder_forward.1
= control target key start
LH: loop header
LB: loop body
LE: loop exit
PB: predicated region body
PF: predicated region fallthrough
CT: control target
= control target key end

     0   :  { %s3785_s0 = inlined_call_operand.vmem [shape: f32[24,16], index: 0, kind: input, shape index: {}]   ;;  %s3786_s1 = inlined_call_operand.hbm [shape: f32[4,32], index: 1, kind: input, shape index: {}]   ;;  %s3787_s2 = inlined_call_operand.vmem [shape: f32[32,8], index: 2, kind: input, shape index: {}]   ;;  %s3788_s3 = inlined_call_operand.hbm [shape: f32[16,32], index: 3, kind: input, shape index: {}]   ;;  %s3789_s4 = inlined_call_operand.vmem [shape: f32[1,32], index: 4, kind: input, shape index: {}]   ;;  %s3790_s5 = inlined_call_operand.vmem [shape: f32[32], index: 5, kind: input, shape index: {}]   ;;  %s3791_s6 = inlined_call_operand.hbm [shape: f32[16,32], index: 6, kind: input, shape index: {}]   ;;  %s3792_s7 = inlined_call_operand.vmem [shape: f32[1,32], index: 7, kind: input, shape index: {}]   ;;  %s3793_s8 = inlined_call_operand.hbm [shape: f32[1,32], index: 8, kind: input, shape index: {}]   ;;  %s3794_s9 = inlined_call_operand.vmem [shape: f32[16,96], index: 9, kind: input, shape index: {}]   ;;  %s3795_s10 = inlined_call_operand.vmem [shape: f32[96,32], index: 10, kind: input, shape index: {}]   ;;  %s3796_s11 = inlined_call_operand.vmem [shape: f32[96,4], index: 11, kind: input, shape index: {}]   ;;  %s3797_s12 = inlined_call_operand.hbm [shape: f32[32,32], index: 12, kind: input, shape index: {}]   ;;  %s3798_s13 = inlined_call_operand.hbm [shape: f32[1,32], index: 13, kind: input, shape index: {}]   ;;  %s3799_s14 = inlined_call_operand.hbm [shape: f32[32], index: 14, kind: input, shape index: {}]   ;;  %s3800_s15 = inlined_call_operand.vmem [shape: f32[32,8], index: 15, kind: input, shape index: {}]   ;;  %s3801_s16 = inlined_call_operand.hbm [shape: f32[1,8], index: 16, kind: input, shape index: {}]   ;;  %s3802_s17 = inlined_call_operand.hbm [shape: f32[1,8], index: 17, kind: input, shape index: {}]   ;;  %s3803_s18 = inlined_call_operand.vmem [shape: f32[8,64], index: 18, kind: input, shape index: {}]   ;;  %s3804_s19 = inlined_call_operand.vmem [shape: f32[64,32], index: 19, kind: input, shape index: {}]   ;;  %s3805_s20 = inlined_call_operand.vmem [shape: f32[64,4], index: 20, kind: input, shape index: {}]   ;;  %s3806_s21 = inlined_call_operand.hbm [shape: f32[8,8], index: 21, kind: output, shape index: {}]  }
   0x1   :  { %3870 = sst [smem:[#allocation31_spill]] %s3785_s0 }
   0x2   :  { %3871 = sst [smem:[#allocation32_spill]] %s3786_s1 }
   0x3   :  { %3872 = sst [smem:[#allocation33_spill]] %s3787_s2 }
   0x4   :  { %3873 = sst [smem:[#allocation34_spill]] %s3788_s3 }
   0x5   :  { %3874 = sst [smem:[#allocation35_spill]] %s3789_s4 }
   0x6   :  { %3875 = sst [smem:[#allocation36_spill]] %s3790_s5 }
   0x7   :  { %3876 = sst [smem:[#allocation37_spill]] %s3803_s18 }
   0x8   :  { %3877 = sst [smem:[#allocation38_spill]] %s3805_s20 }
   0x9   :  { %3878 = sst [smem:[#allocation39_spill]] %s3806_s21 }
   0xa   :  { %26 = vsyncpa [#allocation3], 0 }
   0xb   :  { %27 = vsyncpa [#allocation8], 0 }
   0xc   :  { %28 = vsyncpa [#allocation6], 0 }
   0xd   :  { %29 = vsyncpa [#allocation12], 0 }
   0xe   :  { %30 = vsyncpa [#allocation15], 0 }
   0xf   :  { %31 = vsyncpa [#allocation5], 0 }
  0x10   :  { %32 = vsyncpa [#allocation19], 0  ;;  %s3879_s26 = sld [smem:[#allocation34_spill]] }
  0x16   :  { %s53_s27 = sshll.u32 %s3879_s26, 4  ;;  %s54_s27 = int_to_ptr.hbm [resolvable:$true] %s53_s27 }
  0x17   :  { %33 = vsyncpa [#allocation4], 0  ;;  %s2464_s3 = smov [#allocation7]   ;;  %s93_s4 = sshll.u32 %s3793_s8, 4  ;;  %s94_s4 = int_to_ptr.hbm [resolvable:$true] %s93_s4 }
  0x18   :  { %s55_s28 = sshll.u32 %s2464_s3, 4  ;;  %s3809_s30 = smov 128   ;;  %s56_s28 = int_to_ptr.vmem [resolvable:$true] %s55_s28 }
  0x19   :  { %s3811_s5 = smov 8   ;;  %s2467_s22 = smov [#allocation11]  }
  0x1a   :  { %61 = dma.hbm_to_vmem [thread:$0]  %s54_s27, 256, %s56_s28, [#allocation8], %s3809_s30, %s3809_s30, %s3811_s5  }
  0x1b   :  { %s95_s23 = sshll.u32 %s2467_s22, 4  ;;  %s123_s2 = sshll.u32 %s3798_s13, 4  ;;  %s96_s23 = int_to_ptr.vmem [resolvable:$true] %s95_s23  ;;  %s124_s2 = int_to_ptr.hbm [resolvable:$true] %s123_s2 }
  0x1c   :  { %98 = dma.hbm_to_vmem [thread:$0]  %s94_s4, 16, %s96_s23, [#allocation12]  }
  0x1d   :  { %s3880_s3 = sld [smem:[#allocation32_spill]]  ;;  %s2468_s29 = smov [#allocation14]  }
  0x1e   :  { %s125_s0 = sshll.u32 %s2468_s29, 4  ;;  %s2469_s27 = smov [#allocation2]   ;;  %s126_s0 = int_to_ptr.vmem [resolvable:$true] %s125_s0 }
  0x1f   :  { %128 = dma.hbm_to_vmem [thread:$0]  %s124_s2, 16, %s126_s0, [#allocation15]  }
  0x20   :  { %s43_s28 = sshll.u32 %s2469_s27, 4  ;;  %s3881_s5 = sld [smem:[#allocation36_spill]]  ;;  %s44_s28 = int_to_ptr.vmem [resolvable:$true] %s43_s28 }
  0x21   :  { %s77_s23 = sshll.u32 %s3791_s6, 4  ;;  %s2470_s1 = smov [#allocation9]   ;;  %s78_s23 = int_to_ptr.hbm [resolvable:$true] %s77_s23 }
  0x22   :  { %s2471_s24 = smov [#allocation10]   ;;  %s3882_s30 = smov 8  }
  0x23   :  { %s41_s8 = sshll.u32 %s3880_s3, 4  ;;  %s79_s25 = sshll.u32 %s2471_s24, 4  ;;  %s42_s8 = int_to_ptr.hbm [resolvable:$true] %s41_s8  ;;  %s80_s25 = int_to_ptr.vmem [resolvable:$true] %s79_s25 }
  0x24   :  { %46 = dma.hbm_to_vmem [thread:$0]  %s42_s8, 64, %s44_s28, [#allocation3]  }
  0x25   :  { %s109_s3 = sshll.u32 %s3797_s12, 4  ;;  %s134_s0 = sshll.u32 %s3799_s14, 4  ;;  %s110_s3 = int_to_ptr.hbm [resolvable:$true] %s109_s3  ;;  %s135_s0 = int_to_ptr.hbm [resolvable:$true] %s134_s0 }
  0x26   :  { %s69_s21 = sshll.u32 %s3881_s5, 4  ;;  %s3883_s5 = smov 128   ;;  %s70_s21 = int_to_ptr.vmem [resolvable:$true] %s69_s21 }
  0x27   :  { %72 = dma.vmem_to_smem %s70_s21, 16, %s2470_s1, [#allocation6]  }
  0x28   :  { %85 = dma.hbm_to_vmem [thread:$0]  %s78_s23, 256, %s80_s25, [#allocation8], %s3883_s5, %s3883_s5, %s3882_s30  }
  0x29   :  { %s2472_s6 = smov [#allocation13]   ;;  %s2473_s21 = smov [#allocation16]  }
  0x2a   :  { %s111_s27 = sshll.u32 %s2472_s6, 4  ;;  %s145_s22 = sshll.u32 %s3801_s16, 4  ;;  %s112_s27 = int_to_ptr.vmem [resolvable:$true] %s111_s27  ;;  %s146_s22 = int_to_ptr.hbm [resolvable:$true] %s145_s22 }
  0x2b   :  { %117 = dma.hbm_to_vmem [thread:$0]  %s110_s3, 512, %s112_s27, [#allocation12], %s3883_s5, %s3883_s5, %s3882_s30  }
  0x2c   :  { %137 = dma.hbm_to_smem %s135_s0, 16, %s2473_s21, [#allocation5]  }
  0x2d   :  { %s2474_s13 = smov [#allocation17]   ;;  %s156_s1 = sshll.u32 %s3802_s17, 4  ;;  %s157_s1 = int_to_ptr.hbm [resolvable:$true] %s156_s1 }
  0x2e   :  { %s147_s4 = sshll.u32 %s2474_s13, 4  ;;  %s2475_s24 = smov [#allocation18]   ;;  %s148_s4 = int_to_ptr.vmem [resolvable:$true] %s147_s4 }
  0x2f   :  { %150 = dma.hbm_to_vmem [thread:$0]  %s146_s22, 16, %s148_s4, [#allocation15]  }
  0x30   :  { %s158_s25 = sshll.u32 %s2475_s24, 4  ;;  %s159_s25 = int_to_ptr.vmem [resolvable:$true] %s158_s25 }
  0x31   :  { %161 = dma.hbm_to_vmem [thread:$0]  %s157_s1, 16, %s159_s25, [#allocation19]  }
  0x32   :  { %2444 = dma.done.wait [#allocation3], 64  }
  0x33   :  { %2445 = vsyncadd [#allocation3], 4294967232 }
  0x34   :  { %2446 = dma.done.wait [#allocation8], 256  }
  0x35   :  { %2447 = vsyncadd [#allocation8], 4294967040 }
  0x36   :  { %2448 = dma.done.wait [#allocation6], 16  }
  0x37   :  { %2449 = vsyncadd [#allocation6], 4294967280 }
  0x38   :  { %2450 = dma.done.wait [#allocation8], 256  }
  0x39   :  { %2451 = vsyncadd [#allocation8], 4294967040 }
  0x3a   :  { %2452 = dma.done.wait [#allocation12], 528  }
  0x3b   :  { %2453 = vsyncadd [#allocation12], 4294966768 }
  0x3c   :  { %2454 = dma.done.wait [#allocation15], 16  }
  0x3d   :  { %2455 = vsyncadd [#allocation15], 4294967280 }
  0x3e   :  { %2456 = dma.done.wait [#allocation5], 16  }
  0x3f   :  { %2457 = vsyncadd [#allocation5], 4294967280 }
  0x40   :  { %2458 = dma.done.wait [#allocation15], 16  }
  0x41   :  { %2459 = vsyncadd [#allocation15], 4294967280 }
  0x42   :  { %2460 = dma.done.wait [#allocation19], 16  }
  0x43   :  { %2461 = vsyncadd [#allocation19], 4294967280 }
  0x44   :  { %208 = sfence }
  0x45   :  { %v218_v0 = vld [vmem:[#allocation7 + $0x8] sm:$0xff]  ;;  %v217_v1 = vld [vmem:[#allocation7] sm:$0xff]  ;;  %s3884_s26 = sld [smem:[#allocation31_spill]]  ;;  %vm223_vm0 = vcmask 130048   ;;  %v3831_v5 = vmov 16   ;;  %v3837_v6 = vmov 10  }
  0x46   :  { %247 = vmatpush.msra.mxu0 %v218_v0  ;;  %2089 = vset.pattern.permute.xlu2 %v3831_v5  ;;  %v2478_v7 = vmov 8   ;;  %s3885_s0 = sld [smem:[#allocation35_spill]]  ;;  %v2479_v12 = vmov 17   ;;  %v3834_v13 = vmov 11   ;;  %v3840_v14 = vmov 9   ;;  %v1168_v17 = vld [vmem:[%s3795_s10 + $0x58] sm:$0xff] }
  0x47   :  { %2087 = vset.pattern.permute.xlu1 %v3837_v6  ;;  %2085 = vset.pattern.permute.xlu0 %v2478_v7  ;;  %v1167_v19 = vld [vmem:[%s3795_s10 + $0x50] sm:$0xff]  ;;  %v3828_v21 = vmov 19   ;;  %v2483_v23 = vmov 18   ;;  %v3824_v24 = vmov 12   ;;  %v1166_v25 = vld [vmem:[%s3795_s10 + $0x48] sm:$0xff]  ;;  %v1165_v26 = vld [vmem:[%s3795_s10 + $0x40] sm:$0xff] }
  0x48   :  { %248 = vmatpush.msra.mxu0 %v217_v1  ;;  %v1164_v27 = vld [vmem:[%s3795_s10 + $0x38] sm:$0xff]  ;;  %v1163_v31 = vld [vmem:[%s3795_s10 + $0x30] sm:$0xff]  ;;  %v1162_v32 = vld [vmem:[%s3795_s10 + $0x28] sm:$0xff]  ;;  %v3841_v33 = vmov 24   ;;  %v3823_v35 = vmov 13   ;;  %v3821_v36 = vmov 27  }
  0x49   :  { %v1161_v34 = vld [vmem:[%s3795_s10 + $0x20] sm:$0xff]  ;;  %v1160_v40 = vld [vmem:[%s3795_s10 + $0x18] sm:$0xff]  ;;  %v1159_v41 = vld [vmem:[%s3795_s10 + $0x10] sm:$0xff]  ;;  %v3838_v45 = vmov 26   ;;  %v3822_v46 = vmov 25   ;;  %v3826_v47 = vmov 31  }
  0x4a   :  { %v1158_v43 = vld [vmem:[%s3795_s10 + $0x8] sm:$0xff]  ;;  %v1157_v49 = vld [vmem:[%s3795_s10] sm:$0xff]  ;;  %v3842_v51 = vmov 21   ;;  %v3835_v52 = vmov 20   ;;  %v3832_v53 = vmov 15   ;;  %v3820_v54 = vmov 14  }
  0x4b   :  { %v214_v2 = vld [vmem:[%s3884_s26] sm:$0xff]  ;;  %v215_v3 = vld [vmem:[%s3884_s26 + $0x8] sm:$0xff]  ;;  %v216_v4 = vld [vmem:[%s3884_s26 + $0x10] sm:$0xff]  ;;  %v3839_v55 = vmov 22   ;;  %v3829_v56 = vmov 29   ;;  %v3825_v57 = vmov 30  }
  0x4c   :  { %1950 = vmatmul.msk.f32.vlgmr.msra.gmra.mxu0 %vm223_vm0, %v214_v2  ;;  %v2180_v8 = vld [vmem:[%s3885_s0] ss:$0 sm:$0xff]  ;;  %v3818_v58 = vmov 23   ;;  %v3819_v59 = vmov 28   ;;  %v3836_v60 = vmov 0   ;;  %v3830_v61 = vmov 6  }
  0x4d   :  { %v3833_v63 = vmov 3   ;;  %s2915_s10 = sld [smem:[#allocation9 + $0x8]]  ;;  %s3856_s30 = smov 24  }
  0x4e   :  { %s2919_s21 = sld [smem:[#allocation9 + $0x9]]  ;;  %s2509_s20 = smov 48  }
  0x4f   :  { %s2921_s12 = sld [smem:[#allocation9 + $0xa]] }
  0x50   :  { %s2923_s28 = sld [smem:[#allocation9 + $0xb]] }
  0x51   :  { %s2925_s22 = sld [smem:[#allocation9 + $0xc]] }
  0x52   :  { %s2927_s13 = sld [smem:[#allocation9 + $0xd]] }
  0x53   :  { %s2929_s4 = sld [smem:[#allocation9 + $0xe]] }
  0x54   :  { %1951 = vmatmul.msk.f32.gmra.mxu0 %vm223_vm0, %v215_v3  ;;  %s2932_s23 = sld [smem:[#allocation9 + $0xf]] }
  0x55   :  { %s2938_s14 = sld [smem:[#allocation9 + $0x10]] }
  0x56   :  { %s2991_s1 = sld [smem:[#allocation9 + $0x11]] }
  0x57   :  { %s2999_s24 = sld [smem:[#allocation9 + $0x12]] }
  0x58   :  { %s3003_s25 = sld [smem:[#allocation9 + $0x13]] }
  0x59   :  { %s3026_s16 = sld [smem:[#allocation9 + $0x14]] }
  0x5a   :  { %s3037_s17 = sld [smem:[#allocation9 + $0x15]] }
  0x5b   :  { %s3042_s2 = sld [smem:[#allocation9 + $0x16]] }
  0x5c   :  { %1952 = vmatmul.msk.f32.gmra.mxu0 %vm223_vm0, %v216_v4  ;;  %s3046_s3 = sld [smem:[#allocation9 + $0x17]] }
  0x5d   :  { %s3059_s5 = sld [smem:[#allocation9 + $0x18]] }
  0x5e   :  { %s3070_s8 = sld [smem:[#allocation9 + $0x19]] }
  0x5f   :  { %s3077_s29 = sld [smem:[#allocation9 + $0x1a]] }
  0x60   :  { %s3082_s0 = sld [smem:[#allocation9 + $0x1b]] }
  0x61   :  { %s3088_s6 = sld [smem:[#allocation9 + $0x1c]] }
  0x62   :  { %s3100_s27 = sld [smem:[#allocation9 + $0x1d]] }
  0x63   :  { %s3114_s18 = sld [smem:[#allocation9 + $0x1f]] }
  0xc9   :  { %v250_v9 = vpop.f32.mrf.mxu0 }
  0xca   :  { %v2681_v10 = vadd.f32 %v2180_v8, %v250_v9 }
  0xcc   :  { %695 = vperm.xlu2 %2089, %v2681_v10   ;;  %555 = vperm.xlu1 %2087, %v2681_v10   ;;  %v1178_v28 = vmul.f32 %v1166_v25, %v2681_v10  ;;  %v1175_v37 = vmul.f32 %v1163_v31, %v2681_v10  ;;  %v1172_v42 = vmul.f32 %v1160_v40, %v2681_v10  ;;  %v3816_v25 = vmov 2  }
  0xcd   :  { %509 = vperm.xlu0 %2085, %v2681_v10   ;;  %v1169_v50 = vmul.f32 %v1157_v49, %v2681_v10 }
  0xd1   :  { %v253_v11 = vpop.f32.mrf.mxu0 }
  0xd2   :  { %v2692_v15 = vadd.f32 %v2180_v8, %v253_v11 }
  0xd4   :  { %2090 = vset.pattern.permute.xlu2 %v2479_v12  ;;  %2088 = vset.pattern.permute.xlu1 %v3834_v13  ;;  %v1179_v22 = vmul.f32 %v1167_v19, %v2692_v15  ;;  %v1176_v30 = vmul.f32 %v1164_v27, %v2692_v15  ;;  %v1173_v39 = vmul.f32 %v1161_v34, %v2692_v15  ;;  %v3814_v34 = vmov 5  }
  0xd5   :  { %2086 = vset.pattern.permute.xlu0 %v3840_v14  ;;  %718 = vperm.xlu2 %2090, %v2681_v10   ;;  %v1170_v48 = vmul.f32 %v1158_v43, %v2692_v15 }
  0xd6   :  { %578 = vperm.xlu1 %2088, %v2681_v10   ;;  %532 = vperm.xlu0 %2086, %v2681_v10  }
  0xd9   :  { %v256_v16 = vpop.f32.mrf.mxu0 }
  0xda   :  { %v2697_v18 = vadd.f32 %v2180_v8, %v256_v16 }
  0xdc   :  { %v1180_v20 = vmul.f32 %v1168_v17, %v2697_v18  ;;  %v1177_v29 = vmul.f32 %v1165_v26, %v2697_v18  ;;  %v1174_v38 = vmul.f32 %v1162_v32, %v2697_v18  ;;  %v1171_v44 = vmul.f32 %v1159_v41, %v2697_v18 }
  0xdd   :  { %2092 = vset.pattern.permute.xlu2 %v3828_v21 }
  0xde   :  { %2091 = vset.pattern.permute.xlu1 %v2483_v23  ;;  %2093 = vset.pattern.permute.xlu0 %v3824_v24 }
  0xdf   :  { %1185 = vmatpush.msra.mxu3 %v1180_v20  ;;  %764 = vperm.xlu2 %2092, %v2681_v10   ;;  %v3817_v20 = vmov 1  }
  0xe0   :  { %741 = vperm.xlu1 %2091, %v2681_v10   ;;  %601 = vperm.xlu0 %2093, %v2681_v10  }
  0xe1   :  { %1186 = vmatpush.msra.mxu3 %v1179_v22 }
  0xe3   :  { %1187 = vmatpush.msra.mxu3 %v1178_v28 }
  0xe5   :  { %1188 = vmatpush.msra.mxu3 %v1177_v29  ;;  %v3815_v29 = vmov 4  }
  0xe7   :  { %2095 = vset.pattern.permute.xlu2 %v3841_v33  ;;  %1189 = vmatpush.msra.mxu3 %v1176_v30 }
  0xe8   :  { %2094 = vset.pattern.permute.xlu1 %v3823_v35  ;;  %2098 = vset.pattern.permute.xlu0 %v3821_v36 }
  0xe9   :  { %881 = vperm.xlu2 %2095, %v2681_v10   ;;  %624 = vperm.xlu1 %2094, %v2681_v10  }
  0xea   :  { %950 = vperm.xlu0 %2098, %v2681_v10   ;;  %1190 = vmatpush.msra.mxu3 %v1175_v37 }
  0xec   :  { %1191 = vmatpush.msra.mxu3 %v1174_v38 }
  0xee   :  { %1192 = vmatpush.msra.mxu3 %v1173_v39  ;;  %v3813_v39 = vmov 7  }
  0xf0   :  { %1193 = vmatpush.msra.mxu3 %v1172_v42 }
  0xf1   :  { %2097 = vset.pattern.permute.xlu2 %v3838_v45  ;;  %2096 = vset.pattern.permute.xlu1 %v3822_v46 }
  0xf2   :  { %2107 = vset.pattern.permute.xlu0 %v3826_v47  ;;  %927 = vperm.xlu2 %2097, %v2681_v10  }
  0xf3   :  { %904 = vperm.xlu1 %2096, %v2681_v10   ;;  %1042 = vperm.xlu0 %2107, %v2681_v10  }
  0xf4   :  { %1194 = vmatpush.msra.mxu3 %v1171_v44 }
  0xf6   :  { %1195 = vmatpush.msra.mxu3 %v1170_v48 }
  0xf8   :  { %1196 = vmatpush.msra.mxu3 %v1169_v50 }
  0xfa   :  { %2100 = vset.pattern.permute.xlu2 %v3842_v51 }
  0xfb   :  { %2099 = vset.pattern.permute.xlu1 %v3835_v52  ;;  %2110 = vset.pattern.permute.xlu0 %v3837_v6 }
  0xfc   :  { %810 = vperm.xlu2 %2100, %v2681_v10   ;;  %787 = vperm.xlu1 %2099, %v2681_v10  }
  0xfd   :  { %559 = vperm.xlu0 %2110, %v2692_v15  }
 0x104   :  { %2102 = vset.pattern.permute.xlu2 %v3832_v53  ;;  %2101 = vset.pattern.permute.xlu1 %v3820_v54 }
 0x105   :  { %2113 = vset.pattern.permute.xlu0 %v2479_v12  ;;  %670 = vperm.xlu2 %2102, %v2681_v10  }
 0x106   :  { %647 = vperm.xlu1 %2101, %v2681_v10   ;;  %722 = vperm.xlu0 %2113, %v2692_v15  }
 0x10d   :  { %2104 = vset.pattern.permute.xlu2 %v3839_v55 }
 0x10e   :  { %2103 = vset.pattern.permute.xlu1 %v3829_v56  ;;  %2116 = vset.pattern.permute.xlu0 %v3824_v24  ;;  %v712_v24 = vstv %s2938_s14  ;;  %s2510_s14 = smov 72  }
 0x10f   :  { %833 = vperm.xlu2 %2104, %v2681_v10   ;;  %996 = vperm.xlu1 %2103, %v2681_v10  }
 0x110   :  { %605 = vperm.xlu0 %2116, %v2692_v15  }
 0x117   :  { %2106 = vset.pattern.permute.xlu2 %v3825_v57  ;;  %2105 = vset.pattern.permute.xlu1 %v3818_v58 }
 0x118   :  { %2119 = vset.pattern.permute.xlu0 %v3822_v46  ;;  %1019 = vperm.xlu2 %2106, %v2681_v10   ;;  %v3852_v46 = vstv %s2929_s4 }
 0x119   :  { %856 = vperm.xlu1 %2105, %v2681_v10   ;;  %908 = vperm.xlu0 %2119, %v2692_v15  }
 0x120   :  { %2108 = vset.pattern.permute.xlu2 %v2478_v7 }
 0x121   :  { %2123 = vset.pattern.permute.xlu0 %v3842_v51  ;;  %513 = vperm.xlu2 %2108, %v2692_v15  }
 0x122   :  { %814 = vperm.xlu0 %2123, %v2692_v15  }
 0x126   :  { %v2810_v62 = vpop.permute.xlu2 %695 }
 0x129   :  { %2109 = vset.pattern.permute.xlu2 %v3840_v14 }
 0x12a   :  { %2124 = vset.pattern.permute.xlu0 %v3819_v59  ;;  %536 = vperm.xlu2 %2109, %v2692_v15   ;;  %v3854_v59 = vstv %s2925_s22 }
 0x12b   :  { %973 = vperm.xlu0 %2124, %v2681_v10  }
 0x12f   :  { %v2817_v0 = vpop.permute.xlu2 %718 }
 0x132   :  { %2111 = vset.pattern.permute.xlu2 %v3834_v13 }
 0x133   :  { %977 = vperm.xlu0 %2124, %v2692_v15   ;;  %582 = vperm.xlu2 %2111, %v2692_v15  }
 0x139   :  { %v2824_v1 = vpop.permute.xlu2 %764 }
 0x13b   :  { %2129 = vset.pattern.permute.xlu0 %v3818_v58  ;;  %2112 = vset.pattern.permute.xlu2 %v3831_v5  ;;  %v3855_v58 = vstv %s2923_s28 }
 0x13c   :  { %860 = vperm.xlu0 %2129, %v2692_v15   ;;  %699 = vperm.xlu2 %2112, %v2692_v15  }
 0x13e   :  { %v2846_v9 = vpop.permute.xlu1 %555 }
 0x13f   :  { %v2870_v26 = vpop.permute.xlu0 %509 }
 0x143   :  { %v2828_v2 = vpop.permute.xlu2 %881 }
 0x144   :  { %2132 = vset.pattern.permute.xlu0 %v3836_v60  ;;  %2114 = vset.pattern.permute.xlu2 %v2483_v23 }
 0x145   :  { %322 = vperm.xlu0 %2132, %v2681_v10   ;;  %745 = vperm.xlu2 %2114, %v2692_v15  }
 0x148   :  { %v2852_v16 = vpop.permute.xlu1 %578  ;;  %v2880_v30 = vpop.permute.xlu0 %532 }
 0x14c   :  { %v2833_v3 = vpop.permute.xlu2 %927 }
 0x14d   :  { %2137 = vset.pattern.permute.xlu0 %v3830_v61  ;;  %2115 = vset.pattern.permute.xlu2 %v3828_v21 }
 0x14e   :  { %288 = vxpose.xlu1.b32.start [1/3] (short) (narrow) %v2681_v10, 32  ;;  %461 = vperm.xlu0 %2137, %v2681_v10  }
 0x14f   :  { %768 = vperm.xlu2 %2115, %v2692_v15  }
 0x152   :  { %v2860_v19 = vpop.permute.xlu1 %741  ;;  %v602_v37 = vpop.permute.xlu0 %601 }
 0x156   :  { %289 = vxpose.xlu1.b32.cont [2/3] (short) (narrow) %v2692_v15, 32  ;;  %2138 = vset.pattern.permute.xlu0 %v3833_v63  ;;  %v2838_v4 = vpop.permute.xlu2 %810 }
 0x157   :  { %2117 = vset.pattern.permute.xlu2 %v3823_v35  ;;  %392 = vperm.xlu0 %2138, %v2681_v10   ;;  %v3851_v35 = vstv %s2932_s23 }
 0x158   :  { %628 = vperm.xlu2 %2117, %v2692_v15  }
 0x15c   :  { %v2896_v41 = vpop.permute.xlu0 %950 }
 0x15e   :  { %290 = vxpose.xlu1.b32.end [3/3] (short) (narrow) %v2697_v18, 32 }
 0x15f   :  { %396 = vperm.xlu0 %2138, %v2692_v15   ;;  %v2842_v8 = vpop.permute.xlu2 %670 }
 0x160   :  { %2118 = vset.pattern.permute.xlu2 %v3841_v33 }
 0x161   :  { %885 = vperm.xlu2 %2118, %v2692_v15  }
 0x165   :  { %v2906_v44 = vpop.permute.xlu0 %1042 }
 0x167   :  { %2153 = vset.pattern.permute.xlu0 %v2483_v23  ;;  %v2867_v23 = vpop.permute.xlu1 %624 }
 0x169   :  { %2120 = vset.pattern.permute.xlu2 %v3838_v45  ;;  %v2848_v11 = vpop.permute.xlu2 %833 }
 0x16a   :  { %931 = vperm.xlu2 %2120, %v2692_v15  }
 0x16f   :  { %v2876_v28 = vpop.permute.xlu1 %904  ;;  %v2917_v49 = vpop.permute.xlu0 %559 }
 0x172   :  { %2122 = vset.pattern.permute.xlu2 %v3835_v52  ;;  %v2854_v17 = vpop.permute.xlu2 %1019 }
 0x173   :  { %791 = vperm.xlu2 %2122, %v2692_v15  }
 0x177   :  { %v2886_v32 = vpop.permute.xlu1 %787 }
 0x17b   :  { %2125 = vset.pattern.permute.xlu2 %v3820_v54  ;;  %v2858_v18 = vpop.permute.xlu2 %513 }
 0x17c   :  { %651 = vperm.xlu2 %2125, %v2692_v15  }
 0x17f   :  { %v648_v40 = vpop.permute.xlu1 %647 }
 0x184   :  { %2126 = vset.pattern.permute.xlu2 %v3832_v53  ;;  %v2865_v22 = vpop.permute.xlu2 %536 }
 0x185   :  { %674 = vperm.xlu2 %2126, %v2692_v15  }
 0x187   :  { %v2904_v43 = vpop.permute.xlu1 %996 }
 0x18d   :  { %2127 = vset.pattern.permute.xlu2 %v3829_v56  ;;  %v2873_v27 = vpop.permute.xlu2 %582 }
 0x18e   :  { %1000 = vperm.xlu2 %2127, %v2692_v15  }
 0x18f   :  { %v2913_v48 = vpop.permute.xlu1 %856 }
 0x196   :  { %2128 = vset.pattern.permute.xlu2 %v3839_v55  ;;  %v2884_v31 = vpop.permute.xlu2 %699 }
 0x197   :  { %837 = vperm.xlu2 %2128, %v2692_v15  }
 0x19f   :  { %2130 = vset.pattern.permute.xlu2 %v3825_v57  ;;  %v2892_v38 = vpop.permute.xlu2 %745 }
 0x1a0   :  { %1023 = vperm.xlu2 %2130, %v2692_v15  }
 0x1a8   :  { %2131 = vset.pattern.permute.xlu2 %v3826_v47 }
 0x1a9   :  { %1046 = vperm.xlu2 %2131, %v2692_v15   ;;  %v2900_v42 = vpop.permute.xlu2 %768 }
 0x1b1   :  { %2133 = vset.pattern.permute.xlu2 %v3817_v20  ;;  %2121 = vset.pattern.permute.xlu1 %v3821_v36  ;;  %v3853_v36 = vstv %s2927_s13 }
 0x1b2   :  { %346 = vperm.xlu2 %2133, %v2681_v10  }
 0x1ba   :  { %2134 = vset.pattern.permute.xlu2 %v3816_v25 }
 0x1bb   :  { %369 = vperm.xlu2 %2134, %v2681_v10  }
 0x1c0   :  { %954 = vperm.xlu1 %2121, %v2692_v15  }
 0x1c3   :  { %2135 = vset.pattern.permute.xlu2 %v3815_v29 }
 0x1c4   :  { %415 = vperm.xlu2 %2135, %v2681_v10  }
 0x1c8   :  { %2140 = vset.pattern.permute.xlu1 %v3836_v60 }
 0x1c9   :  { %327 = vperm.xlu1 %2140, %v2692_v15  }
 0x1cc   :  { %2136 = vset.pattern.permute.xlu2 %v3814_v34 }
 0x1cd   :  { %438 = vperm.xlu2 %2136, %v2681_v10  }
 0x1d1   :  { %2142 = vset.pattern.permute.xlu1 %v3816_v25  ;;  %v3859_v25 = vstv %s2919_s21 }
 0x1d2   :  { %373 = vperm.xlu1 %2142, %v2692_v15  }
 0x1d5   :  { %2139 = vset.pattern.permute.xlu2 %v3813_v39 }
 0x1d6   :  { %484 = vperm.xlu2 %2139, %v2681_v10   ;;  %v2910_v10 = vpop.permute.xlu2 %628 }
 0x1da   :  { %2143 = vset.pattern.permute.xlu1 %v3815_v29  ;;  %v3861_v29 = vstv %s2915_s10 }
 0x1db   :  { %419 = vperm.xlu1 %2143, %v2692_v15  }
 0x1de   :  { %2141 = vset.pattern.permute.xlu2 %v3817_v20  ;;  %v2934_v50 = vpop.permute.xlu2 %885  ;;  %v3858_v20 = vstv %s2921_s12 }
 0x1df   :  { %350 = vperm.xlu2 %2141, %v2692_v15  }
 0x1e3   :  { %2146 = vset.pattern.permute.xlu1 %v3813_v39 }
 0x1e7   :  { %2144 = vset.pattern.permute.xlu2 %v3814_v34  ;;  %v2940_v34 = vpop.permute.xlu0 %722 }
 0x1e8   :  { %442 = vperm.xlu2 %2144, %v2692_v15  }
 0x1f0   :  { %2145 = vset.pattern.permute.xlu2 %v3830_v61  ;;  %v2957_v61 = vpop.permute.xlu2 %931 }
 0x1f2   :  { %v2936_v39 = vpop.trf.xlu1 }
 0x1fa   :  { %v2947_v54 = vpop.trf.xlu1 }
 0x1fb   :  { %v3850_v57 = vperm.slane %v2947_v54, 0  ;;  %v3849_v47 = vperm.slane %v2947_v54, 1  ;;  %v3848_v21 = vperm.slane %v2947_v54, 2  ;;  %v3847_v56 = vperm.slane %v2947_v54, 3 }
 0x1fc   :  { %v3846_v5 = vperm.slane %v2947_v54, 4  ;;  %v3844_v53 = vperm.slane %v2947_v54, 5  ;;  %v3843_v63 = vperm.slane %v2947_v54, 6  ;;  %v3845_v13 = vperm.slane %v2947_v54, 7 }
 0x1fd   :  { %v517_v52 = vadd.f32 %v3850_v57, %v2870_v26  ;;  %v540_v60 = vadd.f32 %v3849_v47, %v2880_v30  ;;  %v563_v6 = vadd.f32 %v3848_v21, %v2846_v9  ;;  %v586_v45 = vadd.f32 %v3847_v56, %v2852_v16  ;;  %v2985_v30 = vpop.permute.xlu0 %605 }
 0x1fe   :  { %v609_v55 = vadd.f32 %v3846_v5, %v602_v37  ;;  %v632_v14 = vadd.f32 %v3844_v53, %v2867_v23  ;;  %v655_v26 = vadd.f32 %v3843_v63, %v648_v40  ;;  %v678_v9 = vadd.f32 %v3845_v13, %v2842_v8 }
 0x1ff   :  { %vm519_vm1 = vcmp.ge.f32.partialorder %v517_v52, 0.0  ;;  %v521_v16 = vmul.f32 0.2, %v517_v52  ;;  %vm542_vm2 = vcmp.ge.f32.partialorder %v540_v60, 0.0  ;;  %v544_v37 = vmul.f32 0.2, %v540_v60 }
 0x200   :  { %vm565_vm3 = vcmp.ge.f32.partialorder %v563_v6, 0.0  ;;  %v567_v33 = vmul.f32 0.2, %v563_v6  ;;  %vm588_vm4 = vcmp.ge.f32.partialorder %v586_v45, 0.0  ;;  %v590_v23 = vmul.f32 0.2, %v586_v45 }
 0x201   :  { %v523_v51 = vsel %vm519_vm1, %v517_v52, %v521_v16  ;;  %v546_v40 = vsel %vm542_vm2, %v540_v60, %v544_v37  ;;  %vm611_vm5 = vcmp.ge.f32.partialorder %v609_v55, 0.0  ;;  %v613_v63 = vmul.f32 0.2, %v609_v55 }
 0x202   :  { %v527_v53 = vmul.f32 %v3861_v29, %v523_v51  ;;  %v550_v8 = vmul.f32 %v3859_v25, %v546_v40  ;;  %v569_v13 = vsel %vm565_vm3, %v563_v6, %v567_v33  ;;  %v592_v5 = vsel %vm588_vm4, %v586_v45, %v590_v23  ;;  %v2993_v56 = vpop.trf.xlu1 }
 0x203   :  { %v573_v21 = vmul.f32 %v3858_v20, %v569_v13  ;;  %v596_v47 = vmul.f32 %v3855_v58, %v592_v5  ;;  %v615_v57 = vsel %vm611_vm5, %v609_v55, %v613_v63  ;;  %vm634_vm6 = vcmp.ge.f32.partialorder %v632_v14, 0.0  ;;  %v3005_v13 = vpop.permute.xlu2 %791 }
 0x204   :  { %v619_v52 = vmul.f32 %v3854_v59, %v615_v57  ;;  %v636_v51 = vmul.f32 0.2, %v632_v14  ;;  %vm657_vm7 = vcmp.ge.f32.partialorder %v655_v26, 0.0  ;;  %v659_v6 = vmul.f32 0.2, %v655_v26 }
 0x205   :  { %v575_v33 = vadd.f32 %v573_v21, %v527_v53  ;;  %v598_v45 = vadd.f32 %v596_v47, %v550_v8  ;;  %vm680_vm8 = vcmp.ge.f32.partialorder %v678_v9, 0.0  ;;  %v682_v60 = vmul.f32 0.2, %v678_v9 }
 0x206   :  { %v638_v5 = vsel %vm634_vm6, %v632_v14, %v636_v51  ;;  %v661_v55 = vsel %vm657_vm7, %v655_v26, %v659_v6  ;;  %v702_v63 = vperm.slane %v2993_v56, 0  ;;  %v725_v16 = vperm.slane %v2993_v56, 1  ;;  %v3022_v26 = vpop.permute.xlu0 %908 }
 0x207   :  { %v621_v57 = vadd.f32 %v619_v52, %v575_v33  ;;  %v642_v37 = vmul.f32 %v3853_v36, %v638_v5  ;;  %v665_v23 = vmul.f32 %v3852_v46, %v661_v55  ;;  %v684_v40 = vsel %vm680_vm8, %v678_v9, %v682_v60 }
 0x208   :  { %v688_v21 = vmul.f32 %v3851_v35, %v684_v40  ;;  %v703_v47 = vadd.f32 %v702_v63, %v2810_v62  ;;  %v726_v14 = vadd.f32 %v725_v16, %v2817_v0  ;;  %v748_v53 = vperm.slane %v2993_v56, 2 }
 0x209   :  { %v644_v8 = vadd.f32 %v642_v37, %v598_v45  ;;  %v667_v52 = vadd.f32 %v665_v23, %v621_v57  ;;  %v771_v51 = vperm.slane %v2993_v56, 3  ;;  %v794_v9 = vperm.slane %v2993_v56, 4 }
 0x20a   :  { %vm705_vm9 = vcmp.ge.f32.partialorder %v703_v47, 0.0  ;;  %v707_v62 = vmul.f32 0.2, %v703_v47  ;;  %vm728_vm10 = vcmp.ge.f32.partialorder %v726_v14, 0.0  ;;  %v730_v6 = vmul.f32 0.2, %v726_v14 }
 0x20b   :  { %v690_v0 = vadd.f32 %v688_v21, %v644_v8  ;;  %v749_v33 = vadd.f32 %v748_v53, %v2860_v19  ;;  %v772_v45 = vadd.f32 %v771_v51, %v2824_v1  ;;  %v795_v60 = vadd.f32 %v794_v9, %v2886_v32 }
 0x20c   :  { %v709_v5 = vsel %vm705_vm9, %v703_v47, %v707_v62  ;;  %v735_v55 = vstv %s2991_s1  ;;  %v817_v57 = vperm.slane %v2993_v56, 5  ;;  %v840_v37 = vperm.slane %v2993_v56, 6  ;;  %s3706_s1 = sld [smem:[#allocation16 + $0x2]] }
 0x20d   :  { %v692_v19 = vadd.f32 %v690_v0, %v667_v52  ;;  %v732_v23 = vsel %vm728_vm10, %v726_v14, %v730_v6  ;;  %v758_v40 = vstv %s2999_s24  ;;  %v781_v21 = vstv %s3003_s25  ;;  %v3051_v14 = vpop.permute.xlu2 %651  ;;  %s3709_s24 = sld [smem:[#allocation16 + $0x1]] }
 0x20e   :  { %vm751_vm11 = vcmp.ge.f32.partialorder %v749_v33, 0.0  ;;  %v753_v1 = vmul.f32 0.2, %v749_v33  ;;  %vm774_vm12 = vcmp.ge.f32.partialorder %v772_v45, 0.0  ;;  %v776_v32 = vmul.f32 0.2, %v772_v45 }
 0x20f   :  { %1068 = vrot.lane.b32.xlu2 %v692_v19, %s3856_s30  ;;  %v713_v47 = vmul.f32 %v712_v24, %v709_v5  ;;  %vm797_vm13 = vcmp.ge.f32.partialorder %v795_v60, 0.0  ;;  %v799_v8 = vmul.f32 0.2, %v795_v60  ;;  %v818_v6 = vadd.f32 %v817_v57, %v2838_v4  ;;  %s3105_s30 = sld [smem:[#allocation9 + $0x1e]] }
 0x210   :  { %v755_v52 = vsel %vm751_vm11, %v749_v33, %v753_v1  ;;  %v778_v62 = vsel %vm774_vm12, %v772_v45, %v776_v32  ;;  %v841_v0 = vadd.f32 %v840_v37, %v2848_v11  ;;  %v736_v5 = vmul.f32 %v735_v55, %v732_v23  ;;  %v3067_v33 = vpop.trf.xlu1  ;;  %v3072_v11 = vpop.permute.xlu0 %814  ;;  %s3713_s25 = sld [smem:[#allocation16 + $0x3]] }
 0x211   :  { %v759_v19 = vmul.f32 %v758_v40, %v755_v52  ;;  %v782_v35 = vmul.f32 %v781_v21, %v778_v62  ;;  %v801_v45 = vsel %vm797_vm13, %v795_v60, %v799_v8  ;;  %v804_v1 = vstv %s3026_s16  ;;  %s3719_s16 = sld [smem:[#allocation16 + $0x4]] }
 0x212   :  { %vm820_vm14 = vcmp.ge.f32.partialorder %v818_v6, 0.0  ;;  %v822_v4 = vmul.f32 0.2, %v818_v6  ;;  %vm843_vm15 = vcmp.ge.f32.partialorder %v841_v0, 0.0  ;;  %v845_v23 = vmul.f32 0.2, %v841_v0 }
 0x213   :  { %v761_v32 = vadd.f32 %v759_v19, %v713_v47  ;;  %v827_v52 = vstv %s3037_s17  ;;  %v3862_v36 = vstv %s3042_s2  ;;  %v863_v62 = vperm.slane %v2993_v56, 7  ;;  %s3599_s17 = sld [smem:[#allocation16 + $0xa]] }
 0x214   :  { %v824_v46 = vsel %vm820_vm14, %v818_v6, %v822_v4  ;;  %v784_v60 = vadd.f32 %v782_v35, %v736_v5  ;;  %v805_v8 = vmul.f32 %v804_v1, %v801_v45  ;;  %v847_v59 = vsel %vm843_vm15, %v841_v0, %v845_v23 }
 0x215   :  { %v3857_v58 = vperm.slane %v3067_v33, 0  ;;  %v864_v47 = vadd.f32 %v863_v62, %v2913_v48  ;;  %v873_v6 = vstv %s3046_s3  ;;  %v828_v4 = vmul.f32 %v827_v52, %v824_v46  ;;  %s3611_s3 = sld [smem:[#allocation16 + $0xd]] }
 0x216   :  { %v807_v19 = vadd.f32 %v805_v8, %v761_v32  ;;  %v3860_v0 = vperm.slane %v3067_v33, 1  ;;  %v851_v5 = vmul.f32 %v3862_v36, %v847_v59  ;;  %v3863_v45 = vstv %s3059_s5 }
 0x217   :  { %465 = vperm.xlu2 %2145, %v2692_v15   ;;  %v889_v35 = vadd.f32 %v3857_v58, %v2828_v2  ;;  %vm866_vm1 = vcmp.ge.f32.partialorder %v864_v47, 0.0  ;;  %v868_v48 = vmul.f32 0.2, %v864_v47  ;;  %v830_v32 = vadd.f32 %v828_v4, %v784_v60  ;;  %v3107_v2 = vpop.permute.xlu2 %674 }
 0x218   :  { %v912_v23 = vadd.f32 %v3860_v0, %v2876_v28  ;;  %v3867_v8 = vstv %s3070_s8  ;;  %v3864_v58 = vperm.slane %v3067_v33, 2  ;;  %v957_v20 = vperm.slane %v3067_v33, 3  ;;  %v974_v29 = vpop.permute.xlu0 %973 }
 0x219   :  { %vm891_vm2 = vcmp.ge.f32.partialorder %v889_v35, 0.0  ;;  %v893_v46 = vmul.f32 0.2, %v889_v35  ;;  %v870_v59 = vsel %vm866_vm1, %v864_v47, %v868_v48  ;;  %v853_v25 = vadd.f32 %v851_v5, %v807_v19 }
 0x21a   :  { %v874_v60 = vmul.f32 %v873_v6, %v870_v59  ;;  %vm914_vm3 = vcmp.ge.f32.partialorder %v912_v23, 0.0  ;;  %v916_v0 = vmul.f32 0.2, %v912_v23  ;;  %v935_v47 = vadd.f32 %v3864_v58, %v2833_v3 }
 0x21b   :  { %v895_v4 = vsel %vm891_vm2, %v889_v35, %v893_v46  ;;  %v3866_v48 = vstv %s3077_s29  ;;  %v958_v19 = vadd.f32 %v957_v20, %v2896_v41  ;;  %v967_v35 = vstv %s3082_s0  ;;  %s3631_s0 = sld [smem:[#allocation16 + $0x11]] }
 0x21c   :  { %v899_v28 = vmul.f32 %v3863_v45, %v895_v4  ;;  %v876_v36 = vadd.f32 %v874_v60, %v830_v32  ;;  %v3868_v5 = vperm.slane %v3067_v33, 4  ;;  %v918_v46 = vsel %vm914_vm3, %v912_v23, %v916_v0 }
 0x21d   :  { %vm937_vm4 = vcmp.ge.f32.partialorder %v935_v47, 0.0  ;;  %v939_v59 = vmul.f32 0.2, %v935_v47  ;;  %v990_v4 = vstv %s3088_s6  ;;  %v922_v3 = vmul.f32 %v3867_v8, %v918_v46  ;;  %s3633_s6 = sld [smem:[#allocation16 + $0x13]] }
 0x21e   :  { %v878_v45 = vadd.f32 %v876_v36, %v853_v25  ;;  %vm960_vm5 = vcmp.ge.f32.partialorder %v958_v19, 0.0  ;;  %v962_v32 = vmul.f32 0.2, %v958_v19  ;;  %v981_v41 = vadd.f32 %v3868_v5, %v974_v29 }
 0x21f   :  { %2152 = vset.pattern.permute.xlu2 %v2479_v12  ;;  %v941_v60 = vsel %vm937_vm4, %v935_v47, %v939_v59  ;;  %v1003_v58 = vperm.slane %v3067_v33, 5  ;;  %v1013_v0 = vstv %s3100_s27  ;;  %v3869_v25 = vperm.slane %v3067_v33, 6  ;;  %s3637_s27 = sld [smem:[#allocation16 + $0x14]] }
 0x220   :  { %1076 = vrot.lane.b32.xlu1 %v878_v45, %s2509_s20  ;;  %v945_v23 = vmul.f32 %v3866_v48, %v941_v60  ;;  %v964_v36 = vsel %vm960_vm5, %v958_v19, %v962_v32  ;;  %v1036_v46 = vstv %s3105_s30  ;;  %vm983_vm6 = vcmp.ge.f32.partialorder %v981_v41, 0.0  ;;  %v3150_v32 = vpop.permute.xlu2 %1000  ;;  %v3152_v5 = vpop.permute.xlu0 %977  ;;  %s3613_s30 = sld [smem:[#allocation16 + $0xe]] }
 0x221   :  { %v968_v12 = vmul.f32 %v967_v35, %v964_v36  ;;  %v985_v47 = vmul.f32 0.2, %v981_v41  ;;  %v1004_v29 = vadd.f32 %v1003_v58, %v2904_v43  ;;  %v1027_v45 = vadd.f32 %v3869_v25, %v2854_v17 }
 0x222   :  { %v947_v59 = vadd.f32 %v945_v23, %v899_v28  ;;  %v1049_v60 = vperm.slane %v3067_v33, 7  ;;  %v1059_v19 = vstv %s3114_s18  ;;  %v704_v25 = vadd.f32 %v702_v63, %v2884_v31  ;;  %s3292_s18 = sld [smem:[#allocation9 + $0x1]] }
 0x223   :  { %v970_v48 = vadd.f32 %v968_v12, %v922_v3  ;;  %v987_v8 = vsel %vm983_vm6, %v981_v41, %v985_v47  ;;  %vm1006_vm7 = vcmp.ge.f32.partialorder %v1004_v29, 0.0  ;;  %v1008_v36 = vmul.f32 0.2, %v1004_v29 }
 0x224   :  { %v991_v43 = vmul.f32 %v990_v4, %v987_v8  ;;  %vm1029_vm8 = vcmp.ge.f32.partialorder %v1027_v45, 0.0  ;;  %v1031_v28 = vmul.f32 0.2, %v1027_v45  ;;  %v1050_v17 = vadd.f32 %v1049_v60, %v2906_v44 }
 0x225   :  { %v1010_v23 = vsel %vm1006_vm7, %v1004_v29, %v1008_v36  ;;  %v727_v3 = vadd.f32 %v725_v16, %v2940_v34  ;;  %v750_v41 = vadd.f32 %v748_v53, %v2892_v38  ;;  %vm706_vm10 = vcmp.ge.f32.partialorder %v704_v25, 0.0 }
 0x226   :  { %v993_v8 = vadd.f32 %v991_v43, %v947_v59  ;;  %v1014_v12 = vmul.f32 %v1013_v0, %v1010_v23  ;;  %v1033_v47 = vsel %vm1029_vm8, %v1027_v45, %v1031_v28  ;;  %vm1052_vm9 = vcmp.ge.f32.partialorder %v1050_v17, 0.0 }
 0x227   :  { %v1037_v44 = vmul.f32 %v1036_v46, %v1033_v47  ;;  %v1054_v29 = vmul.f32 0.2, %v1050_v17  ;;  %v708_v31 = vmul.f32 0.2, %v704_v25  ;;  %vm729_vm11 = vcmp.ge.f32.partialorder %v727_v3, 0.0 }
 0x228   :  { %488 = vperm.xlu1 %2146, %v2692_v15   ;;  %v1016_v34 = vadd.f32 %v1014_v12, %v970_v48  ;;  %v731_v63 = vmul.f32 0.2, %v727_v3  ;;  %vm752_vm12 = vcmp.ge.f32.partialorder %v750_v41, 0.0  ;;  %v754_v59 = vmul.f32 0.2, %v750_v41 }
 0x229   :  { %v1039_v38 = vadd.f32 %v1037_v44, %v993_v8  ;;  %v1056_v16 = vsel %vm1052_vm9, %v1050_v17, %v1054_v29  ;;  %v710_v53 = vsel %vm706_vm10, %v704_v25, %v708_v31  ;;  %v773_v28 = vadd.f32 %v771_v51, %v2900_v42  ;;  %v838_v8 = vpop.permute.xlu2 %837 }
 0x22a   :  { %v1060_v45 = vmul.f32 %v1059_v19, %v1056_v16  ;;  %v714_v36 = vmul.f32 %v712_v24, %v710_v53  ;;  %v733_v43 = vsel %vm729_vm11, %v727_v3, %v731_v63  ;;  %v756_v48 = vsel %vm752_vm12, %v750_v41, %v754_v59 }
 0x22b   :  { %v737_v15 = vmul.f32 %v735_v55, %v733_v43  ;;  %v796_v23 = vadd.f32 %v794_v9, %v3005_v13  ;;  %v819_v25 = vadd.f32 %v817_v57, %v3072_v11  ;;  %v760_v24 = vmul.f32 %v758_v40, %v756_v48  ;;  %v861_v55 = vpop.permute.xlu0 %860 }
 0x22c   :  { %v1062_v17 = vadd.f32 %v1060_v45, %v1016_v34  ;;  %vm775_vm13 = vcmp.ge.f32.partialorder %v773_v28, 0.0  ;;  %v777_v3 = vmul.f32 0.2, %v773_v28  ;;  %v842_v12 = vadd.f32 %v840_v37, %v838_v8 }
 0x22d   :  { %vm798_vm14 = vcmp.ge.f32.partialorder %v796_v23, 0.0  ;;  %v800_v42 = vmul.f32 0.2, %v796_v23  ;;  %vm821_vm15 = vcmp.ge.f32.partialorder %v819_v25, 0.0  ;;  %v823_v51 = vmul.f32 0.2, %v819_v25 }
 0x22e   :  { %v1064_v41 = vadd.f32 %v1062_v17, %v1039_v38  ;;  %v762_v13 = vadd.f32 %v760_v24, %v714_v36  ;;  %v779_v9 = vsel %vm775_vm13, %v773_v28, %v777_v3  ;;  %v865_v47 = vadd.f32 %v863_v62, %v861_v55 }
 0x22f   :  { %v783_v57 = vmul.f32 %v781_v21, %v779_v9  ;;  %v802_v11 = vsel %vm798_vm14, %v796_v23, %v800_v42  ;;  %v825_v40 = vsel %vm821_vm15, %v819_v25, %v823_v51  ;;  %vm844_vm1 = vcmp.ge.f32.partialorder %v842_v12, 0.0 }
 0x230   :  { %1084 = vrot.lane.b32.xlu0 %v1064_v41, %s2510_s14  ;;  %v806_v44 = vmul.f32 %v804_v1, %v802_v11  ;;  %v846_v29 = vmul.f32 0.2, %v842_v12  ;;  %2147 = vset.pattern.permute.xlu1 %v2478_v7  ;;  %v829_v37 = vmul.f32 %v827_v52, %v825_v40  ;;  %vm867_vm2 = vcmp.ge.f32.partialorder %v865_v47, 0.0 }
 0x231   :  { %v785_v31 = vadd.f32 %v783_v57, %v737_v15  ;;  %v869_v21 = vmul.f32 0.2, %v865_v47  ;;  %v3886_v56 = vperm.slane %v2947_v54, 0  ;;  %v3887_v16 = vstv %s3042_s2  ;;  %s3601_s2 = sld [smem:[#allocation16 + $0xb]] }
 0x232   :  { %v808_v34 = vadd.f32 %v806_v44, %v762_v13  ;;  %v848_v63 = vsel %vm844_vm1, %v842_v12, %v846_v29  ;;  %v3888_v59 = vperm.slane %v2947_v54, 1  ;;  %v3892_v8 = vstv %s2919_s21  ;;  %s3288_s21 = sld [smem:[#allocation9 + $0x3]] }
 0x233   :  { %v518_v62 = vadd.f32 %v3886_v56, %v2858_v18  ;;  %v831_v38 = vadd.f32 %v829_v37, %v785_v31  ;;  %v852_v53 = vmul.f32 %v3887_v16, %v848_v63  ;;  %v871_v1 = vsel %vm867_vm2, %v865_v47, %v869_v21 }
 0x234   :  { %v541_v7 = vadd.f32 %v3888_v59, %v2865_v22  ;;  %v875_v52 = vmul.f32 %v873_v6, %v871_v1  ;;  %v3889_v18 = vperm.slane %v2947_v54, 2  ;;  %v3890_v22 = vstv %s2915_s10  ;;  %s3904_s10 = smov 24  }
 0x235   :  { %vm520_vm3 = vcmp.ge.f32.partialorder %v518_v62, 0.0  ;;  %v522_v45 = vmul.f32 0.2, %v518_v62  ;;  %v854_v36 = vadd.f32 %v852_v53, %v808_v34  ;;  %v3891_v6 = vperm.slane %v2947_v54, 3 }
 0x236   :  { %vm543_vm4 = vcmp.ge.f32.partialorder %v541_v7, 0.0  ;;  %v545_v43 = vmul.f32 0.2, %v541_v7  ;;  %v564_v28 = vadd.f32 %v3889_v18, %v2917_v49  ;;  %v877_v15 = vadd.f32 %v875_v52, %v831_v38 }
 0x237   :  { %v524_v48 = vsel %vm520_vm3, %v518_v62, %v522_v45  ;;  %v587_v3 = vadd.f32 %v3891_v6, %v2873_v27  ;;  %v3893_v55 = vperm.slane %v2947_v54, 4  ;;  %v3894_v41 = vperm.slane %v2947_v54, 5 }
 0x238   :  { %v547_v23 = vsel %vm543_vm4, %v541_v7, %v545_v43  ;;  %vm566_vm5 = vcmp.ge.f32.partialorder %v564_v28, 0.0  ;;  %v568_v25 = vmul.f32 0.2, %v564_v28  ;;  %v879_v17 = vadd.f32 %v877_v15, %v854_v36  ;;  %v955_v15 = vpop.permute.xlu1 %954 }
 0x239   :  { %v528_v24 = vmul.f32 %v3890_v22, %v524_v48  ;;  %v551_v42 = vmul.f32 %v3892_v8, %v547_v23  ;;  %v610_v49 = vadd.f32 %v3893_v55, %v2985_v30  ;;  %v633_v13 = vadd.f32 %v3894_v41, %v2910_v10 }
 0x23a   :  { %v570_v51 = vsel %vm566_vm5, %v564_v28, %v568_v25  ;;  %1078 = vrot.lane.b32.xlu2 %v879_v17, %s2509_s20  ;;  %v3895_v9 = vstv %s2921_s12  ;;  %vm589_vm6 = vcmp.ge.f32.partialorder %v587_v3, 0.0  ;;  %v591_v57 = vmul.f32 0.2, %v587_v3  ;;  %s3298_s12 = sld [smem:[#allocation9 + $0x2]] }
 0x23b   :  { %v574_v12 = vmul.f32 %v3895_v9, %v570_v51  ;;  %v3896_v27 = vperm.slane %v2947_v54, 6  ;;  %vm612_vm7 = vcmp.ge.f32.partialorder %v610_v49, 0.0  ;;  %v614_v40 = vmul.f32 0.2, %v610_v49 }
 0x23c   :  { %vm635_vm8 = vcmp.ge.f32.partialorder %v633_v13, 0.0  ;;  %v637_v30 = vmul.f32 0.2, %v633_v13  ;;  %v593_v44 = vsel %vm589_vm6, %v587_v3, %v591_v57  ;;  %v3897_v29 = vstv %s2923_s28  ;;  %s3303_s28 = sld [smem:[#allocation9 + $0x4]] }
 0x23d   :  { %v656_v11 = vadd.f32 %v3896_v27, %v3051_v14  ;;  %v576_v47 = vadd.f32 %v574_v12, %v528_v24  ;;  %v597_v31 = vmul.f32 %v3897_v29, %v593_v44  ;;  %v616_v37 = vsel %vm612_vm7, %v610_v49, %v614_v40 }
 0x23e   :  { %v639_v21 = vsel %vm635_vm8, %v633_v13, %v637_v30  ;;  %v3898_v34 = vperm.slane %v2947_v54, 7  ;;  %v3899_v14 = vstv %s2925_s22  ;;  %v3900_v16 = vstv %s2927_s13  ;;  %s3310_s22 = sld [smem:[#allocation9 + $0x5]] }
 0x23f   :  { %vm658_vm9 = vcmp.ge.f32.partialorder %v656_v11, 0.0  ;;  %v660_v10 = vmul.f32 0.2, %v656_v11  ;;  %v620_v56 = vmul.f32 %v3899_v14, %v616_v37  ;;  %v599_v38 = vadd.f32 %v597_v31, %v551_v42  ;;  %s3315_s13 = sld [smem:[#allocation9]] }
 0x240   :  { %v679_v63 = vadd.f32 %v3898_v34, %v3107_v2  ;;  %v643_v53 = vmul.f32 %v3900_v16, %v639_v21  ;;  %v3901_v7 = vstv %s2929_s4  ;;  %v3902_v18 = vstv %s2932_s23  ;;  %v1024_v2 = vpop.permute.xlu2 %1023  ;;  %s3319_s4 = sld [smem:[#allocation9 + $0x7]] }
 0x241   :  { %v662_v62 = vsel %vm658_vm9, %v656_v11, %v660_v10  ;;  %v622_v59 = vadd.f32 %v620_v56, %v576_v47  ;;  %v959_v54 = vadd.f32 %v957_v20, %v955_v15  ;;  %v3903_v25 = vperm.slane %v3067_v33, 1  ;;  %s3332_s23 = sld [smem:[#allocation9 + $0x6]] }
 0x242   :  { %vm681_vm10 = vcmp.ge.f32.partialorder %v679_v63, 0.0  ;;  %v683_v1 = vmul.f32 0.2, %v679_v63  ;;  %v666_v52 = vmul.f32 %v3901_v7, %v662_v62  ;;  %v645_v45 = vadd.f32 %v643_v53, %v599_v38 }
 0x243   :  { %v913_v17 = vadd.f32 %v3903_v25, %v3022_v26  ;;  %v963_v22 = vmul.f32 0.2, %v959_v54  ;;  %vm961_vm11 = vcmp.ge.f32.partialorder %v959_v54, 0.0  ;;  %v3905_v6 = vperm.slane %v3067_v33, 0 }
 0x244   :  { %v685_v36 = vsel %vm681_vm10, %v679_v63, %v683_v1  ;;  %v668_v43 = vadd.f32 %v666_v52, %v622_v59  ;;  %v3906_v51 = vperm.slane %v3067_v33, 2  ;;  %v3907_v13 = vperm.slane %v3067_v33, 4 }
 0x245   :  { %v689_v28 = vmul.f32 %v3902_v18, %v685_v36  ;;  %v917_v24 = vmul.f32 0.2, %v913_v17  ;;  %vm915_vm12 = vcmp.ge.f32.partialorder %v913_v17, 0.0  ;;  %v890_v3 = vadd.f32 %v3905_v6, %v2934_v50  ;;  %v3286_v18 = vpop.permute.xlu1 %327 }
 0x246   :  { %v965_v8 = vsel %vm961_vm11, %v959_v54, %v963_v22  ;;  %v936_v26 = vadd.f32 %v3906_v51, %v2957_v61  ;;  %v982_v9 = vadd.f32 %v3907_v13, %v3152_v5  ;;  %v1005_v50 = vadd.f32 %v1003_v58, %v3150_v32 }
 0x247   :  { %v691_v48 = vadd.f32 %v689_v28, %v645_v45  ;;  %v919_v20 = vsel %vm915_vm12, %v913_v17, %v917_v24  ;;  %vm892_vm13 = vcmp.ge.f32.partialorder %v890_v3, 0.0  ;;  %v894_v42 = vmul.f32 0.2, %v890_v3  ;;  %v323_v45 = vpop.permute.xlu0 %322 }
 0x248   :  { %v1047_v55 = vpop.permute.xlu2 %1046  ;;  %v969_v49 = vmul.f32 %v967_v35, %v965_v8  ;;  %v3908_v12 = vstv %s3070_s8  ;;  %vm938_vm14 = vcmp.ge.f32.partialorder %v936_v26, 0.0  ;;  %v940_v27 = vmul.f32 0.2, %v936_v26  ;;  %s3622_s8 = sld [smem:[#allocation16 + $0x10]] }
 0x249   :  { %v693_v23 = vadd.f32 %v691_v48, %v668_v43  ;;  %v896_v41 = vsel %vm892_vm13, %v890_v3, %v894_v42  ;;  %v923_v57 = vmul.f32 %v3908_v12, %v919_v20  ;;  %vm984_vm15 = vcmp.ge.f32.partialorder %v982_v9, 0.0 }
 0x24a   :  { %v986_v61 = vmul.f32 0.2, %v982_v9  ;;  %vm1007_vm1 = vcmp.ge.f32.partialorder %v1005_v50, 0.0  ;;  %v3909_v11 = vstv %s3059_s5  ;;  %v1009_v40 = vmul.f32 0.2, %v1005_v50  ;;  %s3616_s5 = sld [smem:[#allocation16 + $0xf]] }
 0x24b   :  { %1070 = vrot.lane.b32.xlu0 %v693_v23, %s3904_s10  ;;  %v900_v35 = vmul.f32 %v3909_v11, %v896_v41  ;;  %v3910_v30 = vperm.slane %v3067_v33, 6  ;;  %v1051_v5 = vadd.f32 %v1049_v60, %v1047_v55  ;;  %v971_v44 = vadd.f32 %v969_v49, %v923_v57  ;;  %s2511_s10 = smov 16  }
 0x24c   :  { %v942_v58 = vsel %vm938_vm14, %v936_v26, %v940_v27  ;;  %v988_v32 = vsel %vm984_vm15, %v982_v9, %v986_v61  ;;  %v3911_v10 = vstv %s3077_s29  ;;  %v1011_v31 = vsel %vm1007_vm1, %v1005_v50, %v1009_v40  ;;  %s3628_s29 = sld [smem:[#allocation16 + $0x12]] }
 0x24d   :  { %v1028_v47 = vadd.f32 %v3910_v30, %v1024_v2  ;;  %v946_v29 = vmul.f32 %v3911_v10, %v942_v58  ;;  %v1015_v37 = vmul.f32 %v1013_v0, %v1011_v31  ;;  %vm1053_vm3 = vcmp.ge.f32.partialorder %v1051_v5, 0.0  ;;  %v3327_v13 = vpop.permute.xlu1 %373 }
 0x24e   :  { %v1055_v34 = vmul.f32 0.2, %v1051_v5  ;;  %v992_v14 = vmul.f32 %v990_v4, %v988_v32  ;;  %v376_v28 = vperm.slane %v2936_v39, 2  ;;  %v330_v15 = vperm.slane %v2936_v39, 0 }
 0x24f   :  { %vm1030_vm2 = vcmp.ge.f32.partialorder %v1028_v47, 0.0  ;;  %v1032_v21 = vmul.f32 0.2, %v1028_v47  ;;  %v948_v63 = vadd.f32 %v946_v29, %v900_v35  ;;  %v1017_v56 = vadd.f32 %v1015_v37, %v971_v44  ;;  %v462_v43 = vpop.permute.xlu0 %461 }
 0x250   :  { %v1057_v60 = vsel %vm1053_vm3, %v1051_v5, %v1055_v34  ;;  %v347_v53 = vpop.permute.xlu2 %346  ;;  %v422_v54 = vperm.slane %v2936_v39, 4  ;;  %v445_v25 = vperm.slane %v2936_v39, 5  ;;  %v491_v6 = vperm.slane %v2936_v39, 7 }
 0x251   :  { %v1034_v33 = vsel %vm1030_vm2, %v1028_v47, %v1032_v21  ;;  %v994_v62 = vadd.f32 %v992_v14, %v948_v63  ;;  %v1061_v16 = vmul.f32 %v1059_v19, %v1057_v60  ;;  %v399_v19 = vperm.slane %v2936_v39, 3 }
 0x252   :  { %v1038_v38 = vmul.f32 %v1036_v46, %v1034_v33  ;;  %v353_v46 = vperm.slane %v2936_v39, 1  ;;  %v331_v3 = vadd.f32 %v330_v15, %v323_v45  ;;  %v468_v26 = vperm.slane %v2936_v39, 6  ;;  %v1123_v39 = vld [vmem:[%s3796_s11 + $0x38] sm:$0xff] }
 0x253   :  { %v1063_v59 = vadd.f32 %v1061_v16, %v1017_v56  ;;  %v409_v55 = vstv %s3288_s21  ;;  %v363_v12 = vstv %s3292_s18  ;;  %v386_v27 = vstv %s3298_s12  ;;  %s3662_s21 = sld [smem:[#allocation16 + $0x18]] }
 0x254   :  { %v1040_v1 = vadd.f32 %v1038_v38, %v994_v62  ;;  %v354_v48 = vadd.f32 %v353_v46, %v347_v53  ;;  %v335_v50 = vmul.f32 0.2, %v331_v3  ;;  %vm333_vm9 = vcmp.ge.f32.partialorder %v331_v3, 0.0  ;;  %s3664_s18 = sld [smem:[#allocation16 + $0x19]] }
 0x255   :  { %v469_v35 = vadd.f32 %v468_v26, %v462_v43  ;;  %v432_v30 = vstv %s3303_s28  ;;  %v455_v5 = vstv %s3310_s22  ;;  %v340_v58 = vstv %s3315_s13  ;;  %v420_v16 = vpop.permute.xlu1 %419  ;;  %s3668_s12 = sld [smem:[#allocation16 + $0x1a]] }
 0x256   :  { %v1065_v7 = vadd.f32 %v1063_v59, %v1040_v1  ;;  %v358_v8 = vmul.f32 0.2, %v354_v48  ;;  %vm356_vm4 = vcmp.ge.f32.partialorder %v354_v48, 0.0  ;;  %v337_v32 = vsel %vm333_vm9, %v331_v3, %v335_v50  ;;  %s3672_s28 = sld [smem:[#allocation16 + $0x1b]] }
 0x257   :  { %v393_v2 = vpop.permute.xlu0 %392  ;;  %v501_v37 = vstv %s3319_s4  ;;  %v473_v34 = vmul.f32 0.2, %v469_v35  ;;  %v341_v56 = vmul.f32 %v340_v58, %v337_v32  ;;  %vm471_vm11 = vcmp.ge.f32.partialorder %v469_v35, 0.0  ;;  %s3677_s22 = sld [smem:[#allocation16 + $0x1c]] }
 0x258   :  { %1086 = vrot.lane.b32.xlu1 %v1065_v7, %s2510_s14  ;;  %v370_v0 = vpop.permute.xlu2 %369  ;;  %v400_v17 = vadd.f32 %v399_v19, %v393_v2  ;;  %v360_v57 = vsel %vm356_vm4, %v354_v48, %v358_v8  ;;  %v478_v53 = vstv %s3332_s23  ;;  %vm1090_vm12 = vcmask 195584   ;;  %s3643_s14 = sld [smem:[#allocation16 + $0x15]]  ;;  %s2512_s23 = smov 32  }
 0x259   :  { %v377_v23 = vadd.f32 %v376_v28, %v370_v0  ;;  %v364_v10 = vmul.f32 %v363_v12, %v360_v57  ;;  %v475_v1 = vsel %vm471_vm11, %v469_v35, %v473_v34  ;;  %vm1093_vm13 = vcmask 392192   ;;  %v1127_v57 = vld [vmem:[%s3796_s11 + $0x58] sm:$0xff]  ;;  %s3688_s13 = sld [smem:[#allocation16 + $0x1e]] }
 0x25a   :  { %v404_v49 = vmul.f32 0.2, %v400_v17  ;;  %vm402_vm6 = vcmp.ge.f32.partialorder %v400_v17, 0.0  ;;  %v479_v45 = vmul.f32 %v478_v53, %v475_v1  ;;  %vm1096_vm14 = vcmask 588800   ;;  %1138 = vmatpush.msra.mxu2 %v1127_v57  ;;  %v2202_v57 = vld [vmem:[%s3884_s26] sm:$0xff]  ;;  %s3692_s4 = sld [smem:[#allocation16 + $0x1f]] }
 0x25b   :  { %v381_v20 = vmul.f32 0.2, %v377_v23  ;;  %vm379_vm5 = vcmp.ge.f32.partialorder %v377_v23, 0.0  ;;  %vm1103_vm15 = vcmask 785408   ;;  %vm1211_vm9 = vcmask 1043456  }
 0x25c   :  { %v406_v40 = vsel %vm402_vm6, %v400_v17, %v404_v49  ;;  %vm1268_vm11 = vcmask 261120  }
 0x25d   :  { %v383_v61 = vsel %vm379_vm5, %v377_v23, %v381_v20  ;;  %v410_v31 = vmul.f32 %v409_v55, %v406_v40  ;;  %v1099_v23 = vld [vmem:[%s3794_s9] sm:$0xff] }
 0x25e   :  { %v387_v29 = vmul.f32 %v386_v27, %v383_v61 }
 0x25f   :  { %v412_v60 = vadd.f32 %v410_v31, %v364_v10  ;;  %v397_v0 = vpop.permute.xlu0 %396  ;;  %v1122_v31 = vld [vmem:[%s3796_s11 + $0x30] sm:$0xff] }
 0x260   :  { %v416_v52 = vpop.permute.xlu2 %415  ;;  %v389_v38 = vadd.f32 %v387_v29, %v341_v56  ;;  %v401_v49 = vadd.f32 %v399_v19, %v397_v0  ;;  %v332_v19 = vadd.f32 %v330_v15, %v3286_v18  ;;  %v1124_v18 = vld [vmem:[%s3796_s11 + $0x40] sm:$0xff] }
 0x261   :  { %v423_v22 = vadd.f32 %v422_v54, %v416_v52 }
 0x262   :  { %v405_v61 = vmul.f32 0.2, %v401_v49  ;;  %vm403_vm2 = vcmp.ge.f32.partialorder %v401_v49, 0.0  ;;  %vm334_vm5 = vcmp.ge.f32.partialorder %v332_v19, 0.0 }
 0x263   :  { %v427_v41 = vmul.f32 0.2, %v423_v22  ;;  %vm425_vm7 = vcmp.ge.f32.partialorder %v423_v22, 0.0 }
 0x265   :  { %v429_v47 = vsel %vm425_vm7, %v423_v22, %v427_v41 }
 0x266   :  { %v433_v63 = vmul.f32 %v432_v30, %v429_v47 }
 0x268   :  { %v439_v36 = vpop.permute.xlu2 %438  ;;  %v435_v7 = vadd.f32 %v433_v63, %v389_v38 }
 0x269   :  { %v446_v24 = vadd.f32 %v445_v25, %v439_v36 }
 0x26a   :  { %v481_v36 = vadd.f32 %v479_v45, %v435_v7 }
 0x26b   :  { %v450_v9 = vmul.f32 0.2, %v446_v24  ;;  %vm448_vm8 = vcmp.ge.f32.partialorder %v446_v24, 0.0 }
 0x26d   :  { %v452_v44 = vsel %vm448_vm8, %v446_v24, %v450_v9  ;;  %v378_v9 = vadd.f32 %v376_v28, %v3327_v13  ;;  %v1125_v13 = vld [vmem:[%s3796_s11 + $0x48] sm:$0xff] }
 0x26e   :  { %v456_v14 = vmul.f32 %v455_v5, %v452_v44 }
 0x26f   :  { %v382_v35 = vmul.f32 0.2, %v378_v9  ;;  %vm380_vm4 = vcmp.ge.f32.partialorder %v378_v9, 0.0 }
 0x270   :  { %v485_v4 = vpop.permute.xlu2 %484  ;;  %v458_v59 = vadd.f32 %v456_v14, %v412_v60 }
 0x271   :  { %v492_v42 = vadd.f32 %v491_v6, %v485_v4  ;;  %v384_v32 = vsel %vm380_vm4, %v378_v9, %v382_v35  ;;  %v259_v9 = vld [vmem:[#allocation10] sm:$0xff] }
 0x272   :  { %v1301_v35 = vld [vmem:[%s3800_s15 + $0x18] sm:$0xff] }
 0x273   :  { %v496_v11 = vmul.f32 0.2, %v492_v42  ;;  %vm494_vm10 = vcmp.ge.f32.partialorder %v492_v42, 0.0 }
 0x275   :  { %v498_v21 = vsel %vm494_vm10, %v492_v42, %v496_v11  ;;  %vm1204_vm10 = vcmask 31744  }
 0x276   :  { %v502_v62 = vmul.f32 %v501_v37, %v498_v21 }
 0x278   :  { %v3323_v51 = vpop.permute.xlu2 %350  ;;  %v504_v52 = vadd.f32 %v502_v62, %v458_v59 }
 0x279   :  { %v355_v20 = vadd.f32 %v353_v46, %v3323_v51  ;;  %v1126_v46 = vld [vmem:[%s3796_s11 + $0x50] sm:$0xff] }
 0x27a   :  { %v506_v4 = vadd.f32 %v504_v52, %v481_v36  ;;  %1139 = vmatpush.msra.mxu2 %v1126_v46 }
 0x27b   :  { %v359_v51 = vmul.f32 0.2, %v355_v20  ;;  %vm357_vm1 = vcmp.ge.f32.partialorder %v355_v20, 0.0 }
 0x27c   :  { %1140 = vmatpush.msra.mxu2 %v1125_v13 }
 0x27d   :  { %v361_v15 = vsel %vm357_vm1, %v355_v20, %v359_v51 }
 0x27e   :  { %1141 = vmatpush.msra.mxu2 %v1124_v18  ;;  %v365_v29 = vmul.f32 %v363_v12, %v361_v15  ;;  %v1261_v15 = vld [vmem:[#allocation13 + $0x8] sm:$0xff] }
 0x280   :  { %v443_v33 = vpop.permute.xlu2 %442  ;;  %1142 = vmatpush.msra.mxu2 %v1123_v39 }
 0x281   :  { %v447_v41 = vadd.f32 %v445_v25, %v443_v33  ;;  %v424_v25 = vadd.f32 %v422_v54, %v420_v16  ;;  %v336_v54 = vmul.f32 0.2, %v332_v19  ;;  %v388_v33 = vmul.f32 %v386_v27, %v384_v32  ;;  %v2182_v32 = vld [vmem:[#allocation11] ss:$0 sm:$0xff] }
 0x282   :  { %1143 = vmatpush.msra.mxu2 %v1122_v31 }
 0x283   :  { %v451_v11 = vmul.f32 0.2, %v447_v41  ;;  %vm449_vm3 = vcmp.ge.f32.partialorder %v447_v41, 0.0  ;;  %vm426_vm6 = vcmp.ge.f32.partialorder %v424_v25, 0.0  ;;  %v338_v21 = vsel %vm334_vm5, %v332_v19, %v336_v54  ;;  %v1299_v54 = vld [vmem:[%s3800_s15 + $0x8] sm:$0xff] }
 0x284   :  { %v342_v12 = vmul.f32 %v340_v58, %v338_v21  ;;  %v1100_v58 = vld [vmem:[%s3794_s9 + $0x8] sm:$0xff]  ;;  %s3685_s9 = sld [smem:[#allocation16 + $0x1d]] }
 0x285   :  { %v453_v44 = vsel %vm449_vm3, %v447_v41, %v451_v11  ;;  %v260_v41 = vld [vmem:[#allocation10 + $0x8] sm:$0xff] }
 0x286   :  { %v457_v56 = vmul.f32 %v455_v5, %v453_v44  ;;  %v390_v59 = vadd.f32 %v388_v33, %v342_v12  ;;  %279 = vmatpush.msra.mxu1 %v260_v41  ;;  %v1262_v11 = vld [vmem:[#allocation13 + $0x10] sm:$0xff]  ;;  %v2181_v44 = vld [vmem:[%s3792_s7] ss:$0 sm:$0xff]  ;;  %v3924_v41 = vmov 6   ;;  %s3646_s7 = sld [smem:[#allocation16 + $0x16]] }
 0x288   :  { %v1069_v43 = vpop.permute.xlu2 %1068  ;;  %280 = vmatpush.msra.mxu1 %v259_v9  ;;  %v3925_v9 = vmov 29  }
 0x289   :  { %v1091_v2 = vsel %vm1090_vm12, %v506_v4, %v1069_v43  ;;  %1953 = vmatmul.msk.f32.vlgmr.msra.gmra.mxu1 %vm223_vm0, %v2202_v57  ;;  %v3926_v57 = vmov 19  }
 0x290   :  { %v466_v50 = vpop.permute.xlu2 %465 }
 0x291   :  { %v470_v40 = vadd.f32 %v468_v26, %v466_v50  ;;  %v407_v26 = vsel %vm403_vm2, %v401_v49, %v405_v61  ;;  %v209_v50 = vld [vmem:[#allocation2] sm:$0xf] }
 0x292   :  { %v1077_v48 = vpop.permute.xlu1 %1076  ;;  %v411_v14 = vmul.f32 %v409_v55, %v407_v26  ;;  %1990 = vmatpush.msk.msrb.mxu1 %vm1211_vm9, %v209_v50  ;;  %v1263_v61 = vld [vmem:[#allocation13 + $0x18] sm:$0xff] }
 0x293   :  { %v1094_v17 = vsel %vm1093_vm13, %v1091_v2, %v1077_v48  ;;  %v474_v10 = vmul.f32 0.2, %v470_v40  ;;  %vm472_vm8 = vcmp.ge.f32.partialorder %v470_v40, 0.0  ;;  %v1121_v48 = vld [vmem:[%s3796_s11 + $0x28] sm:$0xff]  ;;  %v1120_v2 = vld [vmem:[%s3796_s11 + $0x20] sm:$0xff]  ;;  %1287 = vmatpush.msrb.mxu0 %v1263_v61 }
 0x294   :  { %v413_v62 = vadd.f32 %v411_v14, %v365_v29  ;;  %1144 = vmatpush.msra.mxu2 %v1121_v48  ;;  %1318 = vmatpush.msra.mxu1 %v1301_v35  ;;  %v3918_v48 = vmov 0   ;;  %v1835_v35 = vld [vmem:[%s3804_s19 + $0x8] sm:$0xff] }
 0x295   :  { %v476_v60 = vsel %vm472_vm8, %v470_v40, %v474_v10  ;;  %v1300_v40 = vld [vmem:[%s3800_s15 + $0x10] sm:$0xff]  ;;  %1288 = vmatpush.msrb.mxu0 %v1262_v11  ;;  %v3927_v11 = vmov 31  }
 0x296   :  { %v459_v1 = vadd.f32 %v457_v56, %v413_v62  ;;  %v480_v7 = vmul.f32 %v478_v53, %v476_v60  ;;  %1145 = vmatpush.msra.mxu2 %v1120_v2  ;;  %1319 = vmatpush.msra.mxu1 %v1300_v40  ;;  %v3919_v2 = vmov 20   ;;  %v3928_v40 = vmov 30  }
 0x297   :  { %1289 = vmatpush.msrb.mxu0 %v1261_v15 }
 0x298   :  { %v1079_v36 = vpop.permute.xlu2 %1078  ;;  %1320 = vmatpush.msra.mxu1 %v1299_v54  ;;  %v1834_v54 = vld [vmem:[%s3804_s19] sm:$0xff] }
 0x29a   :  { %v489_v42 = vpop.permute.xlu1 %488 }
 0x29b   :  { %v493_v28 = vadd.f32 %v491_v6, %v489_v42  ;;  %v428_v6 = vmul.f32 0.2, %v424_v25 }
 0x29d   :  { %v497_v47 = vmul.f32 0.2, %v493_v28  ;;  %vm495_vm7 = vcmp.ge.f32.partialorder %v493_v28, 0.0  ;;  %v430_v34 = vsel %vm426_vm6, %v424_v25, %v428_v6  ;;  %v1260_v6 = vld [vmem:[#allocation13] sm:$0xff] }
 0x29e   :  { %v434_v38 = vmul.f32 %v432_v30, %v430_v34  ;;  %1290 = vmatpush.msrb.mxu0 %v1260_v6 }
 0x29f   :  { %v499_v63 = vsel %vm495_vm7, %v493_v28, %v497_v47  ;;  %v1298_v47 = vld [vmem:[%s3800_s15] sm:$0xff]  ;;  %s3649_s15 = sld [smem:[#allocation16 + $0x17]] }
 0x2a0   :  { %v503_v16 = vmul.f32 %v501_v37, %v499_v63  ;;  %v436_v0 = vadd.f32 %v434_v38, %v390_v59  ;;  %1321 = vmatpush.msra.mxu1 %v1298_v47  ;;  %2031 = vmatpush.msk.msra.mxu0 %vm1211_vm9, %v209_v50 }
 0x2a2   :  { %v1085_v22 = vpop.permute.xlu0 %1084  ;;  %v505_v52 = vadd.f32 %v503_v16, %v459_v1  ;;  %v482_v55 = vadd.f32 %v480_v7, %v436_v0 }
 0x2a3   :  { %v1097_v24 = vsel %vm1096_vm14, %v1094_v17, %v1085_v22  ;;  %v1118_v17 = vld [vmem:[%s3796_s11 + $0x10] sm:$0xff]  ;;  %v1117_v22 = vld [vmem:[%s3796_s11 + $0x8] sm:$0xff] }
 0x2a4   :  { %v3363_v3 = vadd.f32 %v1099_v23, %v1097_v24  ;;  %v507_v45 = vadd.f32 %v505_v52, %v482_v55  ;;  %v1119_v23 = vld [vmem:[%s3796_s11 + $0x18] sm:$0xff]  ;;  %v1116_v24 = vld [vmem:[%s3796_s11] sm:$0xff]  ;;  %s3597_s11 = sld [smem:[#allocation16 + $0x9]] }
 0x2a5   :  { %1146 = vmatpush.msra.mxu2 %v1119_v23  ;;  %v3920_v23 = vmov 11  }
 0x2a6   :  { %v1104_v8 = vsel %vm1103_vm15, %v3363_v3, -inf }
 0x2a7   :  { %1105 = vmax.xlane.f32.xlu0 %v1104_v8  ;;  %1147 = vmatpush.msra.mxu2 %v1118_v17  ;;  %v3921_v17 = vmov 3  }
 0x2a9   :  { %1148 = vmatpush.msra.mxu2 %v1117_v22  ;;  %v3922_v22 = vmov 15  }
 0x2ab   :  { %1149 = vmatpush.msra.mxu2 %v1116_v24  ;;  %v3923_v24 = vmov 16  }
 0x2bd   :  { %v1071_v5 = vpop.permute.xlu0 %1070 }
 0x2be   :  { %v1092_v27 = vsel %vm1090_vm12, %v507_v45, %v1071_v5  ;;  %v2183_v5 = vld [vmem:[#allocation14] ss:$0 sm:$0xff] }
 0x2bf   :  { %v1095_v30 = vsel %vm1093_vm13, %v1092_v27, %v1079_v36 }
 0x2ca   :  { %v1087_v43 = vpop.permute.xlu1 %1086 }
 0x2cb   :  { %v1098_v37 = vsel %vm1096_vm14, %v1095_v30, %v1087_v43  ;;  %v3913_v43 = vmov 24   ;;  %v3914_v30 = vmov 9  }
 0x2cc   :  { %v1102_v4 = vadd.f32 %v1100_v58, %v1098_v37  ;;  %v3912_v58 = vmov 21   ;;  %v3915_v37 = vmov 22  }
 0x2ce   :  { %v1107_v53 = vsel %vm1103_vm15, %v1102_v4, -inf }
 0x2cf   :  { %1108 = vmax.xlane.f32.xlu2 %v1107_v53  ;;  %v3917_v53 = vmov 10  }
 0x306   :  { %v282_v18 = vpop.f32.mrf.mxu1 }
 0x307   :  { %v283_v21 = vadd.f32 %v2181_v44, %v282_v18  ;;  %v3929_v18 = vmov 12  }
 0x31a   :  { %v1106_v8 = vpop.xlane.xlu0 %1105 }
 0x31b   :  { %v1110_v20 = vsub.f32 %v3363_v3, %v1106_v8  ;;  %v2203_v3 = vld [vmem:[%s3884_s26 + $0x8] sm:$0xff]  ;;  %s3605_s26 = sld [smem:[#allocation16 + $0xc]] }
 0x31c   :  { %1954 = vmatmul.msk.f32.gmra.mxu1 %vm223_vm0, %v2203_v3  ;;  %v1839_v3 = vld [vmem:[%s3804_s19 + $0x28] sm:$0xff] }
 0x31d   :  { %v1112_v42 = vmul.f32 1.442695, %v1110_v20  ;;  %v1841_v20 = vld [vmem:[%s3804_s19 + $0x38] sm:$0xff] }
 0x31f   :  { %2186 = vpow2.f32 %v1112_v42 }
 0x325   :  { %v2187_v49 = vpop.eup %2186 }
 0x326   :  { %1986 = vmatmul.msk.f32.vlgmr.msra.gmra.mxu2 %vm1103_vm15, %v2187_v49  ;;  %1988 = vmatmul.msk.f32.vlgmr.msra.gmra.mxu3 %vm1103_vm15, %v2187_v49  ;;  %v1840_v49 = vld [vmem:[%s3804_s19 + $0x30] sm:$0xff] }
 0x342   :  { %v1109_v46 = vpop.xlane.xlu2 %1108 }
 0x343   :  { %v1111_v51 = vsub.f32 %v1102_v4, %v1109_v46  ;;  %v3916_v4 = vmov 26  }
 0x345   :  { %v1114_v19 = vmul.f32 1.442695, %v1111_v51  ;;  %v1838_v51 = vld [vmem:[%s3804_s19 + $0x20] sm:$0xff] }
 0x347   :  { %2188 = vpow2.f32 %v1114_v19 }
 0x34d   :  { %v2189_v25 = vpop.eup %2188 }
 0x34e   :  { %1987 = vmatmul.msk.f32.gmra.mxu2 %vm1103_vm15, %v2189_v25  ;;  %1989 = vmatmul.msk.f32.gmra.mxu3 %vm1103_vm15, %v2189_v25  ;;  %v1837_v25 = vld [vmem:[%s3804_s19 + $0x18] sm:$0xff] }
 0x399   :  { %v285_v39 = vpop.f32.mrf.mxu1 }
 0x39a   :  { %v286_v1 = vadd.f32 %v2181_v44, %v285_v39  ;;  %v3930_v39 = vmov 13   ;;  %v3932_v44 = vmov 27  }
 0x3a9   :  { %v1151_v28 = vpop.f32.mrf.mxu2  ;;  %v1198_v29 = vpop.f32.mrf.mxu3 }
 0x3aa   :  { %1991 = vmatmul.msk.f32.vlgmr.msrb.gmra.mxu1 %vm1204_vm10, %v1151_v28 }
 0x3d1   :  { %v1154_v13 = vpop.f32.mrf.mxu2  ;;  %v1201_v38 = vpop.f32.mrf.mxu3 }
 0x3d2   :  { %1992 = vmatmul.msk.f32.gmra.mxu1 %vm1204_vm10, %v1154_v13  ;;  %v1836_v13 = vld [vmem:[%s3804_s19 + $0x10] sm:$0xff]  ;;  %s3595_s19 = sld [smem:[#allocation16 + $0x8]] }
 0x427   :  { %v1232_v26 = vpop.f32.mrf.mxu1 }
 0x428   :  { %2190 = vrcp.f32 %v1232_v26  ;;  %v3931_v26 = vmov 25  }
 0x42e   :  { %v2191_v10 = vpop.eup %2190 }
 0x42f   :  { %v1240_v31 = vmul.f32 %v2191_v10, %v1198_v29  ;;  %v3934_v10 = vmov 28   ;;  %v3935_v29 = vmov 23  }
 0x431   :  { %v1246_v34 = vadd.f32 %v2182_v32, %v1240_v31  ;;  %v3936_v31 = vmov 1  }
 0x433   :  { %v1248_v63 = vadd.f32 %v1246_v34, %v283_v21  ;;  %v3937_v21 = vmov 2   ;;  %v3938_v34 = vmov 4  }
 0x435   :  { %v1252_v14 = vmul.f32 1.442695, %v1248_v63  ;;  %vm1250_vm12 = vcmp.gt.f32.partialorder %v1248_v63, 0.0 }
 0x437   :  { %2192 = vpow2.f32 %v1252_v14  ;;  %v3940_v14 = vmov 7  }
 0x43d   :  { %v2193_v56 = vpop.eup %2192 }
 0x43e   :  { %v1993_v33 = vadd.f32 -1.0, %v2193_v56 }
 0x440   :  { %v1258_v60 = vsel %vm1250_vm12, %v1248_v63, %v1993_v33  ;;  %v3939_v63 = vmov 5  }
 0x441   :  { %1995 = vmatmul.msk.f32.vlgmr.msrb.gmra.mxu0 %vm1268_vm11, %v1258_v60  ;;  %1997 = vmatmul.msk.f32.vlgmr.msra.gmra.mxu1 %vm1268_vm11, %v1258_v60 }
 0x44f   :  { %v1235_v62 = vpop.f32.mrf.mxu1 }
 0x450   :  { %2194 = vrcp.f32 %v1235_v62 }
 0x456   :  { %v2195_v12 = vpop.eup %2194 }
 0x457   :  { %v1241_v16 = vmul.f32 %v2195_v12, %v1201_v38 }
 0x459   :  { %v1247_v59 = vadd.f32 %v2182_v32, %v1241_v16  ;;  %v3933_v32 = vmov 14  }
 0x45b   :  { %v1249_v7 = vadd.f32 %v1247_v59, %v286_v1 }
 0x45d   :  { %v1254_v0 = vmul.f32 1.442695, %v1249_v7  ;;  %vm1251_vm14 = vcmp.gt.f32.partialorder %v1249_v7, 0.0 }
 0x45f   :  { %2196 = vpow2.f32 %v1254_v0 }
 0x465   :  { %v2197_v52 = vpop.eup %2196 }
 0x466   :  { %v1994_v55 = vadd.f32 -1.0, %v2197_v52 }
 0x468   :  { %v1259_v45 = vsel %vm1251_vm14, %v1249_v7, %v1994_v55 }
 0x469   :  { %1996 = vmatmul.msk.f32.gmra.mxu0 %vm1268_vm11, %v1259_v45 }
 0x4be   :  { %v1292_v27 = vpop.f32.mrf.mxu0 }
 0x4bf   :  { %v3480_v36 = vadd.f32 %v2183_v5, %v1292_v27 }
 0x4c1   :  { %1596 = vperm.xlu0 %2153, %v3480_v36   ;;  %1583 = vperm.xlu2 %2152, %v3480_v36   ;;  %v1848_v46 = vmul.f32 %v1840_v49, %v3480_v36  ;;  %v1846_v28 = vmul.f32 %v1838_v51, %v3480_v36  ;;  %v1844_v15 = vmul.f32 %v1836_v13, %v3480_v36 }
 0x4c2   :  { %1465 = vperm.xlu1 %2147, %v3480_v36   ;;  %v1842_v47 = vmul.f32 %v1834_v54, %v3480_v36 }
 0x4c9   :  { %2162 = vset.pattern.permute.xlu0 %v3912_v58  ;;  %2157 = vset.pattern.permute.xlu2 %v3913_v43 }
 0x4ca   :  { %2148 = vset.pattern.permute.xlu1 %v3914_v30  ;;  %1635 = vperm.xlu0 %2162, %v3480_v36  }
 0x4cb   :  { %1675 = vperm.xlu2 %2157, %v3480_v36   ;;  %1478 = vperm.xlu1 %2148, %v3480_v36  }
 0x4d2   :  { %2167 = vset.pattern.permute.xlu0 %v3915_v37 }
 0x4d3   :  { %2159 = vset.pattern.permute.xlu2 %v3916_v4  ;;  %2149 = vset.pattern.permute.xlu1 %v3917_v53 }
 0x4d4   :  { %1648 = vperm.xlu0 %2167, %v3480_v36   ;;  %1701 = vperm.xlu2 %2159, %v3480_v36  }
 0x4d5   :  { %1491 = vperm.xlu1 %2149, %v3480_v36  }
 0x4dc   :  { %2171 = vset.pattern.permute.xlu0 %v3918_v48  ;;  %2161 = vset.pattern.permute.xlu2 %v3919_v2 }
 0x4dd   :  { %2150 = vset.pattern.permute.xlu1 %v3920_v23  ;;  %1360 = vperm.xlu0 %2171, %v3480_v36   ;;  %v1474_v23 = vstv %s3595_s19 }
 0x4de   :  { %1622 = vperm.xlu2 %2161, %v3480_v36   ;;  %1504 = vperm.xlu1 %2150, %v3480_v36  }
 0x4e5   :  { %2174 = vset.pattern.permute.xlu0 %v3921_v17 }
 0x4e6   :  { %2164 = vset.pattern.permute.xlu2 %v3922_v22  ;;  %2151 = vset.pattern.permute.xlu1 %v3923_v24  ;;  %v1295_v8 = vpop.f32.mrf.mxu0  ;;  %v1487_v24 = vstv %s3597_s11  ;;  %s2513_s11 = smov [#allocation20]  }
 0x4e7   :  { %1399 = vperm.xlu0 %2174, %v3480_v36   ;;  %1556 = vperm.xlu2 %2164, %v3480_v36   ;;  %v1296_v42 = vadd.f32 %v2183_v5, %v1295_v8  ;;  %v1500_v8 = vstv %s3599_s17  ;;  %s3941_s17 = sld [smem:[#allocation38_spill]] }
 0x4e8   :  { %1570 = vperm.xlu1 %2151, %v3480_v36  }
 0x4e9   :  { %v1849_v50 = vmul.f32 %v1841_v20, %v1296_v42  ;;  %v1847_v19 = vmul.f32 %v1839_v3, %v1296_v42  ;;  %v1845_v61 = vmul.f32 %v1837_v25, %v1296_v42  ;;  %v1843_v6 = vmul.f32 %v1835_v35, %v1296_v42 }
 0x4ea   :  { %v1526_v35 = vstv %s3605_s26 }
 0x4eb   :  { %1858 = vmatpush.msrb.mxu3 %v1849_v50 }
 0x4ed   :  { %1859 = vmatpush.msrb.mxu3 %v1848_v46 }
 0x4ef   :  { %2177 = vset.pattern.permute.xlu0 %v3924_v41  ;;  %2166 = vset.pattern.permute.xlu2 %v3925_v9  ;;  %v1513_v41 = vstv %s3601_s2 }
 0x4f0   :  { %2154 = vset.pattern.permute.xlu1 %v3926_v57  ;;  %1438 = vperm.xlu0 %2177, %v3480_v36  }
 0x4f1   :  { %1740 = vperm.xlu2 %2166, %v3480_v36   ;;  %1609 = vperm.xlu1 %2154, %v3480_v36  }
 0x4f2   :  { %1860 = vmatpush.msrb.mxu3 %v1847_v19 }
 0x4f4   :  { %1861 = vmatpush.msrb.mxu3 %v1846_v28 }
 0x4f6   :  { %1862 = vmatpush.msrb.mxu3 %v1845_v61 }
 0x4f8   :  { %2179 = vset.pattern.permute.xlu0 %v3927_v11  ;;  %1863 = vmatpush.msrb.mxu3 %v1844_v15 }
 0x4f9   :  { %2169 = vset.pattern.permute.xlu2 %v3928_v40  ;;  %2155 = vset.pattern.permute.xlu1 %v3929_v18 }
 0x4fa   :  { %1753 = vperm.xlu2 %2169, %v3480_v36   ;;  %1517 = vperm.xlu1 %2155, %v3480_v36  }
 0x4fb   :  { %1864 = vmatpush.msrb.mxu3 %v1843_v6 }
 0x4fd   :  { %1865 = vmatpush.msrb.mxu3 %v1842_v47 }
 0x502   :  { %2156 = vset.pattern.permute.xlu1 %v3930_v39 }
 0x503   :  { %1530 = vperm.xlu1 %2156, %v3480_v36  }
 0x50b   :  { %2158 = vset.pattern.permute.xlu1 %v3931_v26 }
 0x50c   :  { %1688 = vperm.xlu1 %2158, %v3480_v36  }
 0x514   :  { %2160 = vset.pattern.permute.xlu1 %v3932_v44 }
 0x515   :  { %1714 = vperm.xlu1 %2160, %v3480_v36  }
 0x51b   :  { %v3573_v60 = vpop.permute.xlu2 %1583 }
 0x51d   :  { %2163 = vset.pattern.permute.xlu1 %v3933_v32 }
 0x51e   :  { %1543 = vperm.xlu1 %2163, %v3480_v36  }
 0x520   :  { %1326 = vxpose.xlu2.b32.start [1/2] (short) (narrow) %v3480_v36, 32 }
 0x525   :  { %v3575_v12 = vpop.permute.xlu2 %1675 }
 0x526   :  { %2165 = vset.pattern.permute.xlu1 %v3934_v10 }
 0x527   :  { %1727 = vperm.xlu1 %2165, %v3480_v36  }
 0x528   :  { %1327 = vxpose.xlu2.b32.end [2/2] (short) (narrow) %v1296_v42, 32 }
 0x52e   :  { %v3577_v16 = vpop.permute.xlu2 %1701 }
 0x52f   :  { %2168 = vset.pattern.permute.xlu1 %v3935_v29  ;;  %v1539_v29 = vstv %s3611_s3  ;;  %s3727_s3 = sld [smem:[#allocation16 + $0x5]] }
 0x530   :  { %1661 = vperm.xlu1 %2168, %v3480_v36  }
 0x533   :  { %v1597_v51 = vpop.permute.xlu0 %1596 }
 0x534   :  { %v1466_v56 = vpop.permute.xlu1 %1465 }
 0x538   :  { %2170 = vset.pattern.permute.xlu1 %v3927_v11  ;;  %v3581_v59 = vpop.permute.xlu2 %1622 }
 0x539   :  { %1766 = vperm.xlu1 %2170, %v3480_v36  }
 0x53d   :  { %v1479_v33 = vpop.permute.xlu1 %1478 }
 0x541   :  { %2172 = vset.pattern.permute.xlu1 %v3936_v31  ;;  %v3585_v0 = vpop.permute.xlu2 %1556 }
 0x542   :  { %1373 = vperm.xlu1 %2172, %v3480_v36  }
 0x547   :  { %v1492_v62 = vpop.permute.xlu1 %1491 }
 0x54a   :  { %2173 = vset.pattern.permute.xlu1 %v3937_v21 }
 0x54b   :  { %1386 = vperm.xlu1 %2173, %v3480_v36   ;;  %v3587_v55 = vpop.permute.xlu2 %1740 }
 0x550   :  { %v1505_v38 = vpop.permute.xlu1 %1504 }
 0x553   :  { %2175 = vset.pattern.permute.xlu1 %v3938_v34 }
 0x554   :  { %1412 = vperm.xlu1 %2175, %v3480_v36   ;;  %v3589_v5 = vpop.permute.xlu2 %1753 }
 0x55a   :  { %v3579_v1 = vpop.permute.xlu1 %1570 }
 0x55c   :  { %2176 = vset.pattern.permute.xlu1 %v3939_v63 }
 0x55d   :  { %1425 = vperm.xlu1 %2176, %v3480_v36  }
 0x563   :  { %v3583_v7 = vpop.permute.xlu1 %1609 }
 0x565   :  { %2178 = vset.pattern.permute.xlu1 %v3940_v14 }
 0x566   :  { %1451 = vperm.xlu1 %2178, %v3480_v36  }
 0x56c   :  { %v1518_v52 = vpop.permute.xlu1 %1517 }
 0x575   :  { %v1531_v45 = vpop.permute.xlu1 %1530 }
 0x57e   :  { %v3591_v27 = vpop.permute.xlu1 %1688 }
 0x587   :  { %v3603_v43 = vpop.permute.xlu1 %1714 }
 0x590   :  { %v1544_v47 = vpop.permute.xlu1 %1543 }
 0x5b9   :  { %v3593_v36 = vpop.trf.xlu2 }
 0x5c1   :  { %v1343_v58 = vpop.trf.xlu2 }
 0x5c2   :  { %v1468_v30 = vperm.slane %v1343_v58, 0  ;;  %v1481_v37 = vperm.slane %v1343_v58, 1  ;;  %v1494_v4 = vperm.slane %v1343_v58, 2  ;;  %v1507_v53 = vperm.slane %v1343_v58, 3 }
 0x5c3   :  { %v1520_v48 = vperm.slane %v1343_v58, 4  ;;  %v1533_v57 = vperm.slane %v1343_v58, 5  ;;  %v1546_v6 = vperm.slane %v1343_v58, 6  ;;  %v1559_v31 = vperm.slane %v1343_v58, 7 }
 0x5c4   :  { %v1469_v2 = vadd.f32 %v1468_v30, %v1466_v56  ;;  %v1482_v17 = vadd.f32 %v1481_v37, %v1479_v33  ;;  %v1495_v22 = vadd.f32 %v1494_v4, %v1492_v62  ;;  %v1508_v20 = vadd.f32 %v1507_v53, %v1505_v38  ;;  %v1636_v4 = vpop.permute.xlu0 %1635 }
 0x5c5   :  { %v1521_v42 = vadd.f32 %v1520_v48, %v1518_v52  ;;  %v1534_v54 = vadd.f32 %v1533_v57, %v1531_v45  ;;  %v1547_v32 = vadd.f32 %v1546_v6, %v1544_v47  ;;  %v1552_v56 = vstv %s3613_s30  ;;  %s3730_s30 = sld [smem:[#allocation16 + $0x7]] }
 0x5c6   :  { %vm1470_vm15 = vcmp.ge.f32.partialorder %v1469_v2, 0.0  ;;  %v1471_v49 = vmul.f32 0.2, %v1469_v2  ;;  %vm1483_vm1 = vcmp.ge.f32.partialorder %v1482_v17, 0.0  ;;  %v1484_v9 = vmul.f32 0.2, %v1482_v17 }
 0x5c7   :  { %vm1496_vm2 = vcmp.ge.f32.partialorder %v1495_v22, 0.0  ;;  %v1497_v50 = vmul.f32 0.2, %v1495_v22  ;;  %vm1509_vm3 = vcmp.ge.f32.partialorder %v1508_v20, 0.0  ;;  %v1510_v46 = vmul.f32 0.2, %v1508_v20 }
 0x5c8   :  { %v1472_v3 = vsel %vm1470_vm15, %v1469_v2, %v1471_v49  ;;  %vm1522_vm4 = vcmp.ge.f32.partialorder %v1521_v42, 0.0  ;;  %v1485_v25 = vsel %vm1483_vm1, %v1482_v17, %v1484_v9  ;;  %v1523_v13 = vmul.f32 0.2, %v1521_v42 }
 0x5c9   :  { %v1475_v19 = vmul.f32 %v1474_v23, %v1472_v3  ;;  %v1498_v28 = vsel %vm1496_vm2, %v1495_v22, %v1497_v50  ;;  %v1488_v61 = vmul.f32 %v1487_v24, %v1485_v25  ;;  %v3618_v40 = vpop.trf.xlu2  ;;  %v1511_v18 = vsel %vm1509_vm3, %v1508_v20, %v1510_v46  ;;  %v3639_v24 = vpop.permute.xlu1 %1727 }
 0x5ca   :  { %v1501_v11 = vmul.f32 %v1500_v8, %v1498_v28  ;;  %v1524_v15 = vsel %vm1522_vm4, %v1521_v42, %v1523_v13  ;;  %v1514_v39 = vmul.f32 %v1513_v41, %v1511_v18  ;;  %vm1535_vm5 = vcmp.ge.f32.partialorder %v1534_v54, 0.0 }
 0x5cb   :  { %v1536_v44 = vmul.f32 0.2, %v1534_v54  ;;  %v1527_v10 = vmul.f32 %v1526_v35, %v1524_v15  ;;  %v1573_v21 = vperm.slane %v3618_v40, 0  ;;  %vm1548_vm6 = vcmp.ge.f32.partialorder %v1547_v32, 0.0 }
 0x5cc   :  { %v1502_v26 = vadd.f32 %v1501_v11, %v1475_v19  ;;  %v1515_v34 = vadd.f32 %v1514_v39, %v1488_v61  ;;  %v1549_v14 = vmul.f32 0.2, %v1547_v32  ;;  %v1560_v33 = vadd.f32 %v1559_v31, %v3585_v0 }
 0x5cd   :  { %v1537_v63 = vsel %vm1535_vm5, %v1534_v54, %v1536_v44  ;;  %v1574_v62 = vadd.f32 %v1573_v21, %v3579_v1  ;;  %v1586_v30 = vperm.slane %v3618_v40, 1  ;;  %v1565_v37 = vstv %s3616_s5  ;;  %v1649_v54 = vpop.permute.xlu0 %1648 }
 0x5ce   :  { %v1528_v38 = vadd.f32 %v1527_v10, %v1502_v26  ;;  %v1540_v52 = vmul.f32 %v1539_v29, %v1537_v63  ;;  %v1550_v45 = vsel %vm1548_vm6, %v1547_v32, %v1549_v14  ;;  %vm1561_vm7 = vcmp.ge.f32.partialorder %v1560_v33, 0.0 }
 0x5cf   :  { %v1562_v58 = vmul.f32 0.2, %v1560_v33  ;;  %v1553_v48 = vmul.f32 %v1552_v56, %v1550_v45  ;;  %vm1575_vm8 = vcmp.ge.f32.partialorder %v1574_v62, 0.0  ;;  %v1576_v0 = vmul.f32 0.2, %v1574_v62 }
 0x5d0   :  { %v1541_v53 = vadd.f32 %v1540_v52, %v1515_v34  ;;  %v1587_v2 = vadd.f32 %v1586_v30, %v3573_v60  ;;  %v1599_v23 = vperm.slane %v3618_v40, 2  ;;  %v1579_v20 = vstv %s3622_s8 }
 0x5d1   :  { %v1563_v1 = vsel %vm1561_vm7, %v1560_v33, %v1562_v58  ;;  %v1554_v17 = vadd.f32 %v1553_v48, %v1528_v38  ;;  %v1577_v8 = vsel %vm1575_vm8, %v1574_v62, %v1576_v0  ;;  %v1612_v9 = vperm.slane %v3618_v40, 3  ;;  %v3659_v32 = vpop.trf.xlu2  ;;  %v1662_v21 = vpop.permute.xlu1 %1661 }
 0x5d2   :  { %v1566_v22 = vmul.f32 %v1565_v37, %v1563_v1  ;;  %v1589_v49 = vmul.f32 0.2, %v1587_v2  ;;  %v1600_v41 = vadd.f32 %v1599_v23, %v1597_v51  ;;  %vm1588_vm9 = vcmp.ge.f32.partialorder %v1587_v2, 0.0 }
 0x5d3   :  { %v1625_v60 = vperm.slane %v3618_v40, 4  ;;  %v1605_v3 = vstv %s3628_s29  ;;  %v1580_v46 = vmul.f32 %v1579_v20, %v1577_v8  ;;  %v1613_v51 = vadd.f32 %v1612_v9, %v3583_v7  ;;  %s2003_s29 = sld [smem:[#allocation16 + $0x6]] }
 0x5d4   :  { %v1567_v42 = vadd.f32 %v1566_v22, %v1541_v53  ;;  %vm1601_vm12 = vcmp.ge.f32.partialorder %v1600_v41, 0.0  ;;  %v1602_v57 = vmul.f32 0.2, %v1600_v41  ;;  %v1638_v25 = vperm.slane %v3618_v40, 5 }
 0x5d5   :  { %v1626_v19 = vadd.f32 %v1625_v60, %v3581_v59  ;;  %v1590_v28 = vsel %vm1588_vm9, %v1587_v2, %v1589_v49  ;;  %v1592_v13 = vstv %s3631_s0  ;;  %v1651_v11 = vperm.slane %v3618_v40, 6 }
 0x5d6   :  { %v1568_v50 = vadd.f32 %v1567_v42, %v1554_v17  ;;  %v1603_v61 = vsel %vm1601_vm12, %v1600_v41, %v1602_v57  ;;  %vm1614_vm14 = vcmp.ge.f32.partialorder %v1613_v51, 0.0  ;;  %v1618_v18 = vstv %s3633_s6 }
 0x5d7   :  { %v1606_v35 = vmul.f32 %v1605_v3, %v1603_v61  ;;  %v1631_v15 = vstv %s3637_s27  ;;  %v1615_v6 = vmul.f32 0.2, %v1613_v51  ;;  %vm1627_vm15 = vcmp.ge.f32.partialorder %v1626_v19, 0.0  ;;  %s3942_s27 = sld [smem:[#allocation37_spill]] }
 0x5d8   :  { %1780 = vrot.lane.b32.xlu1 %v1568_v50, %s2511_s10  ;;  %v1628_v7 = vmul.f32 0.2, %v1626_v19  ;;  %v1639_v47 = vadd.f32 %v1638_v25, %v1636_v4  ;;  %v1593_v59 = vmul.f32 %v1592_v13, %v1590_v28  ;;  %v1652_v26 = vadd.f32 %v1651_v11, %v1649_v54 }
 0x5d9   :  { %v1607_v39 = vadd.f32 %v1606_v35, %v1580_v46  ;;  %v1664_v44 = vperm.slane %v3618_v40, 7  ;;  %v1616_v10 = vsel %vm1614_vm14, %v1613_v51, %v1615_v6  ;;  %v1644_v31 = vstv %s3643_s14 }
 0x5da   :  { %v1629_v29 = vsel %vm1627_vm15, %v1626_v19, %v1628_v7  ;;  %vm1640_vm1 = vcmp.ge.f32.partialorder %v1639_v47, 0.0  ;;  %v1619_v34 = vmul.f32 %v1618_v18, %v1616_v10  ;;  %v1641_v14 = vmul.f32 0.2, %v1639_v47 }
 0x5db   :  { %v1632_v63 = vmul.f32 %v1631_v15, %v1629_v29  ;;  %vm1653_vm2 = vcmp.ge.f32.partialorder %v1652_v26, 0.0  ;;  %v1654_v56 = vmul.f32 0.2, %v1652_v26  ;;  %v1657_v33 = vstv %s3646_s7 }
 0x5dc   :  { %v1665_v62 = vadd.f32 %v1664_v44, %v1662_v21  ;;  %v1670_v40 = vstv %s3649_s15  ;;  %v1620_v38 = vadd.f32 %v1619_v34, %v1593_v59  ;;  %v1642_v45 = vsel %vm1640_vm1, %v1639_v47, %v1641_v14  ;;  %v1767_v47 = vpop.permute.xlu1 %1766 }
 0x5dd   :  { %v1633_v52 = vadd.f32 %v1632_v63, %v1607_v39  ;;  %v1678_v30 = vperm.slane %v3659_v32, 0  ;;  %v1645_v58 = vmul.f32 %v1644_v31, %v1642_v45  ;;  %v1655_v37 = vsel %vm1653_vm2, %v1652_v26, %v1654_v56 }
 0x5de   :  { %vm1666_vm3 = vcmp.ge.f32.partialorder %v1665_v62, 0.0  ;;  %v1667_v4 = vmul.f32 0.2, %v1665_v62  ;;  %v1658_v53 = vmul.f32 %v1657_v33, %v1655_v37  ;;  %v1691_v0 = vperm.slane %v3659_v32, 1 }
 0x5df   :  { %v1679_v48 = vadd.f32 %v1678_v30, %v3575_v12  ;;  %v1646_v1 = vadd.f32 %v1645_v58, %v1620_v38  ;;  %v1704_v23 = vperm.slane %v3659_v32, 2  ;;  %v1684_v20 = vstv %s3662_s21 }
 0x5e0   :  { %v1668_v2 = vsel %vm1666_vm3, %v1665_v62, %v1667_v4  ;;  %v1659_v17 = vadd.f32 %v1658_v53, %v1633_v52  ;;  %v1692_v42 = vadd.f32 %v1691_v0, %v3591_v27  ;;  %v1717_v12 = vperm.slane %v3659_v32, 3  ;;  %v1361_v0 = vpop.permute.xlu0 %1360 }
 0x5e1   :  { %v1671_v22 = vmul.f32 %v1670_v40, %v1668_v2  ;;  %vm1680_vm4 = vcmp.ge.f32.partialorder %v1679_v48, 0.0  ;;  %v1681_v8 = vmul.f32 0.2, %v1679_v48  ;;  %v1705_v49 = vadd.f32 %v1704_v23, %v3577_v16 }
 0x5e2   :  { %v1697_v60 = vstv %s3664_s18  ;;  %v1730_v50 = vperm.slane %v3659_v32, 4  ;;  %vm1693_vm5 = vcmp.ge.f32.partialorder %v1692_v42, 0.0  ;;  %v1694_v57 = vmul.f32 0.2, %v1692_v42 }
 0x5e3   :  { %v1672_v41 = vadd.f32 %v1671_v22, %v1646_v1  ;;  %v1682_v9 = vsel %vm1680_vm4, %v1679_v48, %v1681_v8  ;;  %vm1706_vm6 = vcmp.ge.f32.partialorder %v1705_v49, 0.0  ;;  %v1710_v3 = vstv %s3668_s12 }
 0x5e4   :  { %v1707_v27 = vmul.f32 0.2, %v1705_v49  ;;  %v1718_v16 = vadd.f32 %v1717_v12, %v3603_v43  ;;  %v1731_v51 = vadd.f32 %v1730_v50, %v3639_v24  ;;  %v1685_v19 = vmul.f32 %v1684_v20, %v1682_v9  ;;  %v1374_v4 = vpop.permute.xlu1 %1373  ;;  %v1809_v50 = vld [vmem:[%s3941_s17 + $0x30] sm:$0xff] }
 0x5e5   :  { %v1673_v46 = vadd.f32 %v1672_v41, %v1659_v17  ;;  %v1695_v25 = vsel %vm1693_vm5, %v1692_v42, %v1694_v57  ;;  %v1723_v28 = vstv %s3672_s28  ;;  %v1743_v13 = vperm.slane %v3659_v32, 5 }
 0x5e6   :  { %v1698_v61 = vmul.f32 %v1697_v60, %v1695_v25  ;;  %v1708_v11 = vsel %vm1706_vm6, %v1705_v49, %v1707_v27  ;;  %vm1719_vm7 = vcmp.ge.f32.partialorder %v1718_v16, 0.0  ;;  %v1720_v35 = vmul.f32 0.2, %v1718_v16  ;;  %v1810_v60 = vld [vmem:[%s3941_s17 + $0x38] sm:$0xff] }
 0x5e7   :  { %1784 = vrot.lane.b32.xlu2 %v1673_v46, %s2512_s23  ;;  %v1711_v18 = vmul.f32 %v1710_v3, %v1708_v11  ;;  %vm1732_vm8 = vcmp.ge.f32.partialorder %v1731_v51, 0.0  ;;  %v1733_v43 = vmul.f32 0.2, %v1731_v51  ;;  %v1744_v24 = vadd.f32 %v1743_v13, %v3587_v55  ;;  %1822 = vmatpush.msrb.mxu2 %v1810_v60  ;;  %s3943_s23 = sld [smem:[#allocation33_spill]] }
 0x5e8   :  { %v1721_v15 = vsel %vm1719_vm7, %v1718_v16, %v1720_v35  ;;  %v1736_v54 = vstv %s3677_s22  ;;  %v1756_v6 = vperm.slane %v3659_v32, 6  ;;  %v1769_v7 = vperm.slane %v3659_v32, 7  ;;  %v1400_v17 = vpop.permute.xlu0 %1399 }
 0x5e9   :  { %v1712_v59 = vadd.f32 %v1711_v18, %v1685_v19  ;;  %v1724_v39 = vmul.f32 %v1723_v28, %v1721_v15  ;;  %v1734_v26 = vsel %vm1732_vm8, %v1731_v51, %v1733_v43  ;;  %vm1745_vm9 = vcmp.ge.f32.partialorder %v1744_v24, 0.0  ;;  %v1808_v51 = vld [vmem:[%s3941_s17 + $0x28] sm:$0xff]  ;;  %1823 = vmatpush.msrb.mxu2 %v1809_v50 }
 0x5ea   :  { %v1746_v44 = vmul.f32 0.2, %v1744_v24  ;;  %v1749_v10 = vstv %s3685_s9  ;;  %v1757_v29 = vadd.f32 %v1756_v6, %v3589_v5  ;;  %v1770_v31 = vadd.f32 %v1769_v7, %v1767_v47 }
 0x5eb   :  { %v1725_v21 = vadd.f32 %v1724_v39, %v1698_v61  ;;  %v1737_v55 = vmul.f32 %v1736_v54, %v1734_v26  ;;  %v1762_v34 = vstv %s3688_s13  ;;  %v1775_v56 = vstv %s3692_s4  ;;  %1824 = vmatpush.msrb.mxu2 %v1808_v51 }
 0x5ec   :  { %v1747_v63 = vsel %vm1745_vm9, %v1744_v24, %v1746_v44  ;;  %vm1758_vm12 = vcmp.ge.f32.partialorder %v1757_v29, 0.0  ;;  %v1759_v14 = vmul.f32 0.2, %v1757_v29  ;;  %vm1771_vm14 = vcmp.ge.f32.partialorder %v1770_v31, 0.0  ;;  %v1387_v53 = vpop.permute.xlu1 %1386 }
 0x5ed   :  { %v1738_v33 = vadd.f32 %v1737_v55, %v1712_v59  ;;  %v1750_v32 = vmul.f32 %v1749_v10, %v1747_v63  ;;  %v1772_v62 = vmul.f32 0.2, %v1770_v31  ;;  %v1376_v2 = vperm.slane %v3593_v36, 1  ;;  %v211_v51 = vld [vmem:[%s3943_s23 + $0x8] sm:$0xff] }
 0x5ee   :  { %v1760_v40 = vsel %vm1758_vm12, %v1757_v29, %v1759_v14  ;;  %v1402_v23 = vperm.slane %v3593_v36, 3  ;;  %v1363_v22 = vperm.slane %v3593_v36, 0  ;;  %v1389_v8 = vperm.slane %v3593_v36, 2 }
 0x5ef   :  { %v1751_v38 = vadd.f32 %v1750_v32, %v1725_v21  ;;  %v1763_v52 = vmul.f32 %v1762_v34, %v1760_v40  ;;  %v1773_v45 = vsel %vm1771_vm14, %v1770_v31, %v1772_v62  ;;  %v1377_v20 = vadd.f32 %v1376_v2, %v1374_v4  ;;  %v1794_v2 = vld [vmem:[%s3942_s27] sm:$0xff] }
 0x5f0   :  { %v1776_v30 = vmul.f32 %v1775_v56, %v1773_v45  ;;  %v1390_v42 = vadd.f32 %v1389_v8, %v1387_v53  ;;  %v1415_v49 = vperm.slane %v3593_v36, 4  ;;  %v1403_v12 = vadd.f32 %v1402_v23, %v1400_v17  ;;  %v1439_v15 = vpop.permute.xlu0 %1438 }
 0x5f1   :  { %v1764_v58 = vadd.f32 %v1763_v52, %v1738_v33  ;;  %v1428_v41 = vperm.slane %v3593_v36, 5  ;;  %v1364_v57 = vadd.f32 %v1363_v22, %v1361_v0  ;;  %v1454_v27 = vperm.slane %v3593_v36, 7 }
 0x5f2   :  { %v1777_v37 = vadd.f32 %v1776_v30, %v1751_v38  ;;  %vm1378_vm15 = vcmp.ge.f32.partialorder %v1377_v20, 0.0  ;;  %v1379_v16 = vmul.f32 0.2, %v1377_v20  ;;  %v1392_v19 = vmul.f32 0.2, %v1390_v42 }
 0x5f3   :  { %v1405_v25 = vmul.f32 0.2, %v1403_v12  ;;  %v1441_v13 = vperm.slane %v3593_v36, 6  ;;  %v1395_v61 = vstv %s3706_s1  ;;  %vm1391_vm1 = vcmp.ge.f32.partialorder %v1390_v42, 0.0 }
 0x5f4   :  { %v1778_v5 = vadd.f32 %v1777_v37, %v1764_v58  ;;  %v1413_v48 = vpop.permute.xlu1 %1412  ;;  %v1382_v11 = vstv %s3709_s24  ;;  %vm1404_vm2 = vcmp.ge.f32.partialorder %v1403_v12, 0.0  ;;  %v1366_v35 = vmul.f32 0.2, %v1364_v57 }
 0x5f5   :  { %v1416_v3 = vadd.f32 %v1415_v49, %v1413_v48  ;;  %v1408_v43 = vstv %s3713_s25  ;;  %vm1365_vm3 = vcmp.ge.f32.partialorder %v1364_v57, 0.0  ;;  %v1380_v54 = vsel %vm1378_vm15, %v1377_v20, %v1379_v16  ;;  %v1806_v49 = vld [vmem:[%s3941_s17 + $0x18] sm:$0xff]  ;;  %v212_v16 = vld [vmem:[%s3943_s23 + $0x10] sm:$0xff] }
 0x5f6   :  { %1788 = vrot.lane.b32.xlu0 %v1778_v5, %s2509_s20  ;;  %s3715_s20 = sld [smem:[#allocation16]]  ;;  %v1393_v36 = vsel %vm1391_vm1, %v1390_v42, %v1392_v19  ;;  %v1406_v6 = vsel %vm1404_vm2, %v1403_v12, %v1405_v25  ;;  %v1442_v47 = vadd.f32 %v1441_v13, %v1439_v15  ;;  %v1421_v39 = vstv %s3719_s16  ;;  %v1807_v42 = vld [vmem:[%s3941_s17 + $0x20] sm:$0xff]  ;;  %v1805_v12 = vld [vmem:[%s3941_s17 + $0x10] sm:$0xff] }
 0x5f7   :  { %v1418_v18 = vmul.f32 0.2, %v1416_v3  ;;  %vm1417_vm4 = vcmp.ge.f32.partialorder %v1416_v3, 0.0  ;;  %v1367_v26 = vsel %vm1365_vm3, %v1364_v57, %v1366_v35  ;;  %v1434_v10 = vstv %s3727_s3  ;;  %1825 = vmatpush.msrb.mxu2 %v1807_v42  ;;  %v210_v19 = vld [vmem:[%s3943_s23] sm:$0xff]  ;;  %v2184_v35 = vld [vmem:[#allocation17] ss:$0 sm:$0xff] }
 0x5f8   :  { %v1396_v31 = vmul.f32 %v1395_v61, %v1393_v36  ;;  %v1383_v21 = vmul.f32 %v1382_v11, %v1380_v54  ;;  %v1409_v55 = vmul.f32 %v1408_v43, %v1406_v6  ;;  %v1460_v34 = vstv %s3730_s30  ;;  %v1323_v11 = vpop.f32.mrf.mxu1  ;;  %s3944_s3 = sld [smem:[#allocation39_spill]] }
 0x5f9   :  { %v1419_v44 = vsel %vm1417_vm4, %v1416_v3, %v1418_v18  ;;  %v1444_v14 = vmul.f32 0.2, %v1442_v47  ;;  %vm1443_vm7 = vcmp.ge.f32.partialorder %v1442_v47, 0.0  ;;  %v1447_v45 = vstv %s2003_s29  ;;  %1826 = vmatpush.msrb.mxu2 %v1806_v49  ;;  %v2185_v18 = vld [vmem:[#allocation18] ss:$0 sm:$0xff] }
 0x5fa   :  { %v1422_v33 = vmul.f32 %v1421_v39, %v1419_v44  ;;  %v1410_v40 = vadd.f32 %v1409_v55, %v1383_v21  ;;  %vm1796_vm8 = vcmask 523264   ;;  %v1324_v15 = vadd.f32 %v2184_v35, %v1323_v11 }
 0x5fb   :  { %v1445_v52 = vsel %vm1443_vm7, %v1442_v47, %v1444_v14  ;;  %1827 = vmatpush.msrb.mxu2 %v1805_v12 }
 0x5fc   :  { %v1426_v1 = vpop.permute.xlu1 %1425  ;;  %v1369_v59 = vstv %s3715_s20  ;;  %v1448_v5 = vmul.f32 %v1447_v45, %v1445_v52 }
 0x5fd   :  { %v1429_v46 = vadd.f32 %v1428_v41, %v1426_v1  ;;  %v1370_v56 = vmul.f32 %v1369_v59, %v1367_v26  ;;  %v1804_v41 = vld [vmem:[%s3941_s17 + $0x8] sm:$0xff] }
 0x5fe   :  { %1828 = vmatpush.msrb.mxu2 %v1804_v41  ;;  %s1934_s30 = sshll.u32 %s3944_s3, 4  ;;  %s1935_s30 = int_to_ptr.hbm [resolvable:$true] %s1934_s30 }
 0x5ff   :  { %v1431_v24 = vmul.f32 0.2, %v1429_v46  ;;  %vm1430_vm5 = vcmp.ge.f32.partialorder %v1429_v46, 0.0  ;;  %v1397_v62 = vadd.f32 %v1396_v31, %v1370_v56 }
 0x601   :  { %v1432_v29 = vsel %vm1430_vm5, %v1429_v46, %v1431_v24  ;;  %v1423_v30 = vadd.f32 %v1422_v33, %v1397_v62 }
 0x602   :  { %v1435_v32 = vmul.f32 %v1434_v10, %v1432_v29 }
 0x603   :  { %v1449_v4 = vadd.f32 %v1448_v5, %v1423_v30 }
 0x604   :  { %v1452_v9 = vpop.permute.xlu1 %1451  ;;  %v1436_v58 = vadd.f32 %v1435_v32, %v1410_v40 }
 0x605   :  { %v1455_v28 = vadd.f32 %v1454_v27, %v1452_v9  ;;  %v1803_v9 = vld [vmem:[%s3941_s17] sm:$0xff]  ;;  %v213_v27 = vld [vmem:[%s3943_s23 + $0x18] sm:$0xff]  ;;  %s1932_s17 = sshll.u32 %s2513_s11, 4  ;;  %s1933_s17 = int_to_ptr.vmem [resolvable:$true] %s1932_s17 }
 0x606   :  { %1829 = vmatpush.msrb.mxu2 %v1803_v9  ;;  %1910 = vmatpush.msrb.mxu1 %v213_v27 }
 0x607   :  { %v1457_v7 = vmul.f32 0.2, %v1455_v28  ;;  %vm1456_vm6 = vcmp.ge.f32.partialorder %v1455_v28, 0.0 }
 0x608   :  { %1911 = vmatpush.msrb.mxu1 %v212_v16 }
 0x609   :  { %v1458_v63 = vsel %vm1456_vm6, %v1455_v28, %v1457_v7 }
 0x60a   :  { %v1461_v38 = vmul.f32 %v1460_v34, %v1458_v63  ;;  %1912 = vmatpush.msrb.mxu1 %v211_v51 }
 0x60c   :  { %v1462_v37 = vadd.f32 %v1461_v38, %v1436_v58  ;;  %1913 = vmatpush.msrb.mxu1 %v210_v19 }
 0x60e   :  { %v1463_v48 = vadd.f32 %v1462_v37, %v1449_v4 }
 0x641   :  { %v1785_v1 = vpop.permute.xlu2 %1784 }
 0x64a   :  { %v1781_v53 = vpop.permute.xlu1 %1780 }
 0x64b   :  { %v1791_v0 = vsel %vm223_vm0, %v1463_v48, %v1781_v53  ;;  %vm1925_vm0 = vcmask 64512  }
 0x64c   :  { %v1792_v17 = vsel %vm1268_vm11, %v1791_v0, %v1785_v1 }
 0x668   :  { %v1789_v23 = vpop.permute.xlu0 %1788 }
 0x669   :  { %v1793_v22 = vsel %vm1093_vm13, %v1792_v17, %v1789_v23 }
 0x66a   :  { %v1795_v8 = vadd.f32 %v1794_v2, %v1793_v22 }
 0x66c   :  { %v1797_v20 = vsel %vm1796_vm8, %v1795_v8, -inf }
 0x66d   :  { %1798 = vmax.xlane.f32.xlu1 %v1797_v20 }
 0x6e0   :  { %v1799_v60 = vpop.xlane.xlu1 %1798 }
 0x6e1   :  { %v1800_v50 = vsub.f32 %v1795_v8, %v1799_v60 }
 0x6e3   :  { %v1801_v57 = vmul.f32 1.442695, %v1800_v50 }
 0x6e5   :  { %2198 = vpow2.f32 %v1801_v57 }
 0x6eb   :  { %v2199_v3 = vpop.eup %2198 }
 0x6ec   :  { %2029 = vmatmul.msk.f32.vlgmr.msrb.gmra.mxu2 %vm1796_vm8, %v2199_v3  ;;  %2030 = vmatmul.msk.f32.vlgmr.msrb.gmra.mxu3 %vm1796_vm8, %v2199_v3 }
 0x76f   :  { %v1831_v46 = vpop.f32.mrf.mxu2  ;;  %v1867_v13 = vpop.f32.mrf.mxu3 }
 0x770   :  { %2032 = vmatmul.msk.f32.vlgmr.msra.gmra.mxu0 %vm1204_vm10, %v1831_v46 }
 0x7ed   :  { %v1890_v25 = vpop.f32.mrf.mxu0 }
 0x7ee   :  { %2200 = vrcp.f32 %v1890_v25 }
 0x7f4   :  { %v2201_v28 = vpop.eup %2200 }
 0x7f5   :  { %v1894_v61 = vmul.f32 %v2201_v28, %v1867_v13 }
 0x7f7   :  { %2033 = vmatmul.msk.f32.vlgmr.msrb.gmra.mxu1 %vm1268_vm11, %v1894_v61 }
 0x874   :  { %v1915_v43 = vpop.f32.mrf.mxu1 }
 0x875   :  { %v1918_v24 = vmul.f32 0.25, %v1915_v43 }
 0x877   :  { %v1923_v54 = vadd.f32 %v2185_v18, %v1918_v24 }
 0x879   :  { %v1924_v36 = vadd.f32 %v1923_v54, %v1324_v15 }
 0x87b   :  { %1926 = vst.msk [vmem:[#allocation20] sm:$0xff] %vm1925_vm0, %v1924_v36 }
 0x87c   :  { %1937 = dma.vmem_to_hbm [thread:$0]  %s1933_s17, 128, %s1935_s30, [#allocation4]  }
 0x87d   :  { %2462 = dma.done.wait [#allocation4], 128  }
 0x87e   :  { %2463 = vsyncadd [#allocation4], 4294967168 }
 0x87f   :  { %1942 = vsyncpa [#allocation3], 1 }
 0x880   :  { %1943 = vsyncpa [#allocation8], 1 }
 0x881   :  { %1944 = vsyncpa [#allocation12], 1 }
 0x882   :  { %1945 = vsyncpa [#allocation15], 1 }
 0x883   :  { %1946 = vsyncpa [#allocation19], 1 }
 0x884   :  { %1947 = vsyncpa [#allocation4], 1 }
 0x885   :  { %1948 = vsyncpa [#allocation5], 1 }
 0x886   :  { %1949 = vsyncpa [#allocation6], 1 }

</bundles_post_ra>
